<compile_context>
chip_gen: v5e
topology: v5e:2x2
jax: 0.10.0
libtpu: 0.0.40
codegen_flags: <defaults>
</compile_context>

<pallas_src>
import functools

import numpy as np
import jax
import jax.numpy as jnp
from jax.experimental import pallas as pl
from jax.experimental.pallas import tpu as pltpu


# ----------------------------- Pallas kernel -----------------------------

def _bottleneck_kernel(x_ref, w1_ref, b1_ref, w2_ref, b2_ref, w3_ref, b3_ref,
                       sew1_ref, sew2_ref, o_ref, h1p_ref, *, W, HW, PAD_TOP):
    """Fully fused Bottleneck (+SE) forward for one image.

    x_ref   : (HW, Cin)  f32  -- conv input AND residual identity (Cin == Cout)
    w1_ref  : (Cin, Cmid) bf16          b1_ref : (1, Cmid) f32
    w2_ref  : (3, 3*Cmid, Cmid) bf16    b2_ref : (1, Cmid) f32   (taps grouped by kx)
    w3_ref  : (Cmid, Cout) bf16         b3_ref : (1, Cout) f32
    sew1_ref: (Cout, Cred) f32          sew2_ref: (Cred, Cout) f32
    o_ref   : (HW, Cout) f32 out
    h1p_ref : (TOTAL_ROWS, Cmid) bf16 scratch -- row-padded h1, top pad = PAD_TOP
    """
    cmid = h1p_ref.shape[1]
    total_rows = h1p_ref.shape[0]

    x = x_ref[...]                                                 # f32 residual

    # --- conv1 (1x1, BN scale folded into w1) + bias + relu --------------------
    h1 = jnp.dot(x.astype(jnp.bfloat16), w1_ref[...],
                 preferred_element_type=jnp.float32)
    h1 = jnp.maximum(h1 + b1_ref[...], 0.0)

    # --- stage-2 input: row-padded copy of h1 in VMEM --------------------------
    # Zero only the halo rows (the interior is fully overwritten every grid step).
    h1p_ref[0:PAD_TOP, :] = jnp.zeros((PAD_TOP, cmid), h1p_ref.dtype)
    h1p_ref[PAD_TOP + HW:total_rows, :] = jnp.zeros(
        (total_rows - PAD_TOP - HW, cmid), h1p_ref.dtype)
    # PAD_TOP is a multiple of 16 -> sublane-aligned store of the interior.
    h1p_ref[PAD_TOP:PAD_TOP + HW, :] = h1.astype(h1p_ref.dtype)

    # --- conv2: 3x3 (BN folded) + relu ------------------------------------------
    # Output pixel p = y*W + x needs source pixel p + (ky-1)*W + (kx-1), which sits
    # at scratch row p + BASE + ky*W + kx with BASE = PAD_TOP - W - 1.  Row
    # under/overflow lands in the zero halo; column wrap-around is removed with a
    # single mask per kx group (mask depends only on x = p mod W).
    BASE = PAD_TOP - (W + 1)
    col = jax.lax.broadcasted_iota(jnp.int32, (HW, 1), 0) % W
    acc = jnp.zeros_like(h1)
    for kx in range(3):
        slab = jnp.concatenate(
            [h1p_ref[BASE + ky * W + kx: BASE + ky * W + kx + HW, :]
             for ky in range(3)], axis=1)                          # (HW, 3*Cmid)
        if kx == 0:
            slab = jnp.where(col >= 1, slab, jnp.zeros_like(slab))
        elif kx == 2:
            slab = jnp.where(col <= W - 2, slab, jnp.zeros_like(slab))
        acc = acc + jnp.dot(slab, w2_ref[kx],
                            preferred_element_type=jnp.float32)
    h2 = jnp.maximum(acc + b2_ref[...], 0.0)

    # --- conv3 (1x1 expansion, BN folded) ----------------------------------------
    h3 = jnp.dot(h2.astype(jnp.bfloat16), w3_ref[...],
                 preferred_element_type=jnp.float32) + b3_ref[...]  # (HW, Cout) f32

    # --- SE: squeeze (global average pool) + excitation MLP, all in VMEM ----------
    pool = jnp.sum(h3, axis=0, keepdims=True) * (1.0 / HW)          # (1, Cout)
    y = jnp.maximum(jnp.dot(pool, sew1_ref[...],
                            preferred_element_type=jnp.float32), 0.0)
    gate = jax.nn.sigmoid(jnp.dot(y, sew2_ref[...],
                                  preferred_element_type=jnp.float32))  # (1, Cout)

    # --- SE gating + residual add + relu (identity = x, Cin == Cout, stride 1) ----
    o_ref[...] = jnp.maximum(h3 * gate + x, 0.0).astype(o_ref.dtype)


# ----------------------------- parameters -----------------------------

def init_params(key, in_channels, out_channels, expansion=4, reduction=16):
    cout = out_channels * expansion
    ks = jax.random.split(key, 8)

    def bn_params(k, c):
        k1, k2, k3, k4 = jax.random.split(k, 4)
        return dict(
            gamma=1.0 + 0.1 * jax.random.normal(k1, (c,), jnp.float32),
            beta=0.1 * jax.random.normal(k2, (c,), jnp.float32),
            mean=0.1 * jax.random.normal(k3, (c,), jnp.float32),
            var=1.0 + 0.1 * jnp.abs(jax.random.normal(k4, (c,), jnp.float32)),
        )

    return {
        # same shapes as the nn.Conv2d / nn.Linear weights in the PyTorch module
        "w_conv1": 0.1 * jax.random.normal(ks[0], (out_channels, in_channels, 1, 1), jnp.float32),
        "w_conv2": 0.1 * jax.random.normal(ks[1], (out_channels, out_channels, 3, 3), jnp.float32),
        "w_conv3": 0.1 * jax.random.normal(ks[2], (cout, out_channels, 1, 1), jnp.float32),
        "bn1": bn_params(ks[3], out_channels),
        "bn2": bn_params(ks[4], out_channels),
        "bn3": bn_params(ks[5], cout),
        "se_w1": 0.1 * jax.random.normal(ks[6], (cout // reduction, cout), jnp.float32),
        "se_w2": 0.1 * jax.random.normal(ks[7], (cout, cout // reduction), jnp.float32),
    }


# ----------------------------- wrapper -----------------------------

def _round_up(v, m):
    return ((v + m - 1) // m) * m


def _vmem_limit_bytes():
    # 96 MiB on the 128-MiB parts (v5e/v6e), ~48 MiB on the 64-MiB v7x.
    try:
        cap = pltpu.get_tpu_info().vmem_capacity_bytes
    except Exception:
        cap = 128 * 1024 * 1024
    return int(min(96 * 1024 * 1024, cap * 3 // 4))


def bottleneck_forward(x_nchw, p, eps=1e-5):
    # NCHW -> (N, H*W, C) glue; these two transposes can be dropped entirely if
    # the surrounding graph stays NHWC.
    x = jnp.transpose(x_nchw, (0, 2, 3, 1)).astype(jnp.float32)       # NHWC
    N, H, W, Cin = x.shape
    Cmid = p["w_conv1"].shape[0]
    Cout = p["w_conv3"].shape[0]
    Cred = p["se_w1"].shape[0]
    assert Cin == Cout, "downsample=None requires in_channels == out_channels*expansion"
    HW = H * W

    def fold_bn(bn):
        scale = bn["gamma"] / jnp.sqrt(bn["var"] + eps)
        bias = bn["beta"] - bn["mean"] * scale
        return scale.astype(jnp.float32), bias.astype(jnp.float32)

    s1, b1 = fold_bn(p["bn1"])
    s2, b2 = fold_bn(p["bn2"])
    s3, b3 = fold_bn(p["bn3"])

    # Fold BN scales into the conv weights; the kernel only adds the bias.
    w1 = (p["w_conv1"].reshape(Cmid, Cin).T * s1[None, :]).astype(jnp.bfloat16)   # (Cin, Cmid)
    # 3x3 taps grouped by kx: w2g[kx] is (3*Cmid, Cmid) with rows ordered [ky0|ky1|ky2].
    w2g = (jnp.transpose(p["w_conv2"], (3, 2, 1, 0))                   # (kx, ky, I, O)
           * s2[None, None, None, :]).reshape(3, 3 * Cmid, Cmid).astype(jnp.bfloat16)
    w3 = (p["w_conv3"].reshape(Cout, Cmid).T * s3[None, :]).astype(jnp.bfloat16)  # (Cmid, Cout)
    b1 = b1[None, :]
    b2 = b2[None, :]
    b3 = b3[None, :]
    sew1 = p["se_w1"].T.astype(jnp.float32)   # (Cout, Cred)
    sew2 = p["se_w2"].T.astype(jnp.float32)   # (Cred, Cout)

    x = x.reshape(N, HW, Cin)                 # single f32 activation input

    # Row-padded scratch geometry (sublane-aligned top pad; bf16 packs 16 rows/vreg).
    PAD_TOP = _round_up(W + 1, 16)
    TOTAL_ROWS = _round_up(PAD_TOP + HW + W + 1, 16)

    kernel = functools.partial(_bottleneck_kernel, W=W, HW=HW, PAD_TOP=PAD_TOP)
    out = pl.pallas_call(
        kernel,
        grid=(N,),
        in_specs=[
            pl.BlockSpec((None, HW, Cin), lambda n: (n, 0, 0)),
            # weights / biases: constant index_maps -> stay VMEM-resident across
            # the grid.  TODO(synk): on v7x add pipeline_mode=pl.Buffered(1) here
            # to single-buffer the (large) deep-layer weights.
            pl.BlockSpec((Cin, Cmid), lambda n: (0, 0)),
            pl.BlockSpec((1, Cmid), lambda n: (0, 0)),
            pl.BlockSpec((3, 3 * Cmid, Cmid), lambda n: (0, 0, 0)),
            pl.BlockSpec((1, Cmid), lambda n: (0, 0)),
            pl.BlockSpec((Cmid, Cout), lambda n: (0, 0)),
            pl.BlockSpec((1, Cout), lambda n: (0, 0)),
            pl.BlockSpec((Cout, Cred), lambda n: (0, 0)),
            pl.BlockSpec((Cred, Cout), lambda n: (0, 0)),
        ],
        out_specs=pl.BlockSpec((None, HW, Cout), lambda n: (n, 0, 0)),
        out_shape=jax.ShapeDtypeStruct((N, HW, Cout), jnp.float32),
        scratch_shapes=[pltpu.VMEM((TOTAL_ROWS, Cmid), jnp.bfloat16)],
        compiler_params=pltpu.CompilerParams(
            dimension_semantics=("parallel",),
            vmem_limit_bytes=_vmem_limit_bytes()),
    )(x, w1, b1, w2g, b2, w3, b3, sew1, sew2)

    # back to NCHW to match the PyTorch output convention
    return jnp.transpose(out.reshape(N, H, W, Cout), (0, 3, 1, 2))


# ----------------------------- pure-JAX reference -----------------------------

def reference_forward(x_nchw, p, eps=1e-5):
    hp = jax.lax.Precision.HIGHEST

    def conv(x, w, pad=0):
        return jax.lax.conv_general_dilated(
            x, w, (1, 1), [(pad, pad), (pad, pad)],
            dimension_numbers=("NCHW", "OIHW", "NCHW"), precision=hp)

    def bn(x, b):
        scale = b["gamma"] / jnp.sqrt(b["var"] + eps)
        bias = b["beta"] - b["mean"] * scale
        return x * scale[None, :, None, None] + bias[None, :, None, None]

    out = jax.nn.relu(bn(conv(x_nchw, p["w_conv1"]), p["bn1"]))
    out = jax.nn.relu(bn(conv(out, p["w_conv2"], pad=1), p["bn2"]))
    out = bn(conv(out, p["w_conv3"]), p["bn3"])
    y = jnp.mean(out, axis=(2, 3))
    y = jax.nn.relu(jnp.dot(y, p["se_w1"].T, precision=hp))
    y = jax.nn.sigmoid(jnp.dot(y, p["se_w2"].T, precision=hp))
    out = out * y[:, :, None, None]
    out = out + x_nchw
    return jax.nn.relu(out)


# ----------------------------- main -----------------------------

if __name__ == "__main__":
    key = jax.random.PRNGKey(0)
    kx, kp = jax.random.split(key)

    # small shapes: in_channels must equal out_channels*expansion (downsample=None)
    N, Cin, H, W = 2, 16, 16, 16
    out_channels = 4  # expansion 4 -> Cout = 16 == Cin

    x = jax.random.normal(kx, (N, Cin, H, W), jnp.float32)
    params = init_params(kp, Cin, out_channels)

    out = bottleneck_forward(x, params)
    out = jax.block_until_ready(out)

    assert out.shape == (N, out_channels * 4, H, W)
    ref = reference_forward(x, params)
    # tolerances account for bf16 matmul operands (f32 accumulation everywhere)
    np.testing.assert_allclose(np.asarray(out), np.asarray(ref), rtol=2e-2, atol=2e-2)

    print("KERNEL_OK")
</pallas_src>

<mosaic_0001>
module attributes {stable_mosaic.version = 11 : i64} {
  func.func @_bottleneck_kernel(%arg0: i32, %arg1: memref<1x256x16xf32, #tpu.memory_space<vmem>>, %arg2: memref<16x4xbf16, #tpu.memory_space<vmem>>, %arg3: memref<1x4xf32, #tpu.memory_space<vmem>>, %arg4: memref<3x12x4xbf16, #tpu.memory_space<vmem>>, %arg5: memref<1x4xf32, #tpu.memory_space<vmem>>, %arg6: memref<4x16xbf16, #tpu.memory_space<vmem>>, %arg7: memref<1x16xf32, #tpu.memory_space<vmem>>, %arg8: memref<16x1xf32, #tpu.memory_space<vmem>>, %arg9: memref<1x16xf32, #tpu.memory_space<vmem>>, %arg10: memref<1x256x16xf32, #tpu.memory_space<vmem>>, %arg11: memref<320x4xbf16, #tpu.memory_space<vmem>>) attributes {dimension_semantics = [#tpu.dimension_semantics<parallel>], iteration_bounds = array<i64: 2>, scalar_prefetch = 0 : i64, scratch_operands = 1 : i64, tpu.core_type = #tpu.core_type<tc>, window_params = [{transform_indices = @transform_0, window_bounds = array<i64: 1, 256, 16>}, {pipeline_mode = #tpu.pipeline_mode<synchronous>, transform_indices = @transform_1, window_bounds = array<i64: 16, 4>}, {pipeline_mode = #tpu.pipeline_mode<synchronous>, transform_indices = @transform_2, window_bounds = array<i64: 1, 4>}, {pipeline_mode = #tpu.pipeline_mode<synchronous>, transform_indices = @transform_3, window_bounds = array<i64: 3, 12, 4>}, {pipeline_mode = #tpu.pipeline_mode<synchronous>, transform_indices = @transform_4, window_bounds = array<i64: 1, 4>}, {pipeline_mode = #tpu.pipeline_mode<synchronous>, transform_indices = @transform_5, window_bounds = array<i64: 4, 16>}, {pipeline_mode = #tpu.pipeline_mode<synchronous>, transform_indices = @transform_6, window_bounds = array<i64: 1, 16>}, {pipeline_mode = #tpu.pipeline_mode<synchronous>, transform_indices = @transform_7, window_bounds = array<i64: 16, 1>}, {pipeline_mode = #tpu.pipeline_mode<synchronous>, transform_indices = @transform_8, window_bounds = array<i64: 1, 16>}, {transform_indices = @transform_9, window_bounds = array<i64: 1, 256, 16>}]} {
    %c0 = arith.constant 0 : index
    %c0_0 = arith.constant 0 : index
    %c0_1 = arith.constant 0 : index
    %0 = vector.load %arg1[%c0, %c0_0, %c0_1] : memref<1x256x16xf32, #tpu.memory_space<vmem>>, vector<1x256x16xf32>
    %1 = vector.shape_cast %0 : vector<1x256x16xf32> to vector<256x16xf32>
    %2 = arith.truncf %1 : vector<256x16xf32> to vector<256x16xbf16>
    %c0_2 = arith.constant 0 : index
    %c0_3 = arith.constant 0 : index
    %3 = vector.load %arg2[%c0_2, %c0_3] : memref<16x4xbf16, #tpu.memory_space<vmem>>, vector<16x4xbf16>
    %cst = arith.constant dense<0.000000e+00> : vector<256x4xf32>
    %4 = tpu.matmul %2, %3, %cst {dimension_numbers = #tpu.dot_dimension_numbers<[1], [0], [0], [1], [0, 0, 1, 1], [], []>} : vector<256x16xbf16>, vector<16x4xbf16>, vector<256x4xf32> -> vector<256x4xf32>
    %c0_4 = arith.constant 0 : index
    %c0_5 = arith.constant 0 : index
    %5 = vector.load %arg3[%c0_4, %c0_5] : memref<1x4xf32, #tpu.memory_space<vmem>>, vector<1x4xf32>
    %6 = vector.broadcast %5 : vector<1x4xf32> to vector<256x4xf32>
    %7 = arith.addf %4, %6 : vector<256x4xf32>
    %cst_6 = arith.constant 0.000000e+00 : f32
    %8 = vector.broadcast %cst_6 : f32 to vector<256x4xf32>
    %9 = arith.maximumf %7, %8 : vector<256x4xf32>
    %cst_7 = arith.constant 0.000000e+00 : bf16
    %10 = vector.broadcast %cst_7 : bf16 to vector<32x4xbf16>
    %c0_8 = arith.constant 0 : index
    %c0_9 = arith.constant 0 : index
    %11 = vector.load %arg11[%c0_8, %c0_9] : memref<320x4xbf16, #tpu.memory_space<vmem>>, vector<32x4xbf16>
    tpu.vector_store %arg11[%c0_8, %c0_9], %10 {strides = array<i32>} : memref<320x4xbf16, #tpu.memory_space<vmem>>, vector<32x4xbf16>,
    %cst_10 = arith.constant 0.000000e+00 : bf16
    %12 = vector.broadcast %cst_10 : bf16 to vector<32x4xbf16>
    %c288 = arith.constant 288 : index
    %c0_11 = arith.constant 0 : index
    %13 = vector.load %arg11[%c288, %c0_11] : memref<320x4xbf16, #tpu.memory_space<vmem>>, vector<32x4xbf16>
    tpu.vector_store %arg11[%c288, %c0_11], %12 {strides = array<i32>} : memref<320x4xbf16, #tpu.memory_space<vmem>>, vector<32x4xbf16>,
    %14 = arith.truncf %9 : vector<256x4xf32> to vector<256x4xbf16>
    %c32 = arith.constant 32 : index
    %c0_12 = arith.constant 0 : index
    %15 = vector.load %arg11[%c32, %c0_12] : memref<320x4xbf16, #tpu.memory_space<vmem>>, vector<256x4xbf16>
    tpu.vector_store %arg11[%c32, %c0_12], %14 {strides = array<i32>} : memref<320x4xbf16, #tpu.memory_space<vmem>>, vector<256x4xbf16>,
    %16 = tpu.iota {dimensions = array<i32: 0>} : vector<256x1xi32>
    %c16_i32 = arith.constant 16 : i32
    %c0_i32 = arith.constant 0 : i32
    %17 = arith.cmpi eq, %c16_i32, %c0_i32 : i32
    %c1_i32 = arith.constant 1 : i32
    %18 = arith.select %17, %c1_i32, %c16_i32 : i32
    %19 = vector.broadcast %18 : i32 to vector<256x1xi32>
    %20 = arith.remsi %16, %19 : vector<256x1xi32>
    %c0_i32_13 = arith.constant 0 : i32
    %21 = vector.broadcast %c0_i32_13 : i32 to vector<256x1xi32>
    %22 = arith.cmpi ne, %20, %21 : vector<256x1xi32>
    %c0_i32_14 = arith.constant 0 : i32
    %23 = vector.broadcast %c0_i32_14 : i32 to vector<256x1xi32>
    %24 = arith.cmpi slt, %20, %23 : vector<256x1xi32>
    %c0_i32_15 = arith.constant 0 : i32
    %25 = arith.cmpi slt, %18, %c0_i32_15 : i32
    %26 = vector.broadcast %25 : i1 to vector<256x1xi1>
    %27 = vector.broadcast %26 : vector<256x1xi1> to vector<256x1xi1>
    %28 = arith.xori %24, %27 : vector<256x1xi1>
    %29 = arith.andi %28, %22 : vector<256x1xi1>
    %30 = vector.broadcast %18 : i32 to vector<256x1xi32>
    %31 = arith.addi %20, %30 : vector<256x1xi32>
    %32 = arith.select %29, %31, %20 : vector<256x1xi1>, vector<256x1xi32>
    %cst_16 = arith.constant 0.000000e+00 : f32
    %33 = vector.broadcast %cst_16 : f32 to vector<256x4xf32>
    %c15 = arith.constant 15 : index
    %c0_17 = arith.constant 0 : index
    %34 = vector.load %arg11[%c15, %c0_17] : memref<320x4xbf16, #tpu.memory_space<vmem>>, vector<256x4xbf16>
    %c31 = arith.constant 31 : index
    %c0_18 = arith.constant 0 : index
    %35 = vector.load %arg11[%c31, %c0_18] : memref<320x4xbf16, #tpu.memory_space<vmem>>, vector<256x4xbf16>
    %c47 = arith.constant 47 : index
    %c0_19 = arith.constant 0 : index
    %36 = vector.load %arg11[%c47, %c0_19] : memref<320x4xbf16, #tpu.memory_space<vmem>>, vector<256x4xbf16>
    %37 = tpu.concatenate %34, %35, %36 in 1 : vector<256x4xbf16>, vector<256x4xbf16>, vector<256x4xbf16> -> vector<256x12xbf16>
    %c1_i32_20 = arith.constant 1 : i32
    %38 = vector.broadcast %c1_i32_20 : i32 to vector<256x1xi32>
    %39 = arith.cmpi sge, %32, %38 : vector<256x1xi32>
    %cst_21 = arith.constant 0.000000e+00 : bf16
    %40 = vector.broadcast %cst_21 : bf16 to vector<256x12xbf16>
    %41 = vector.shape_cast %39 : vector<256x1xi1> to vector<256x1xi1>
    %42 = vector.broadcast %41 : vector<256x1xi1> to vector<256x12xi1>
    %43 = arith.select %42, %37, %40 : vector<256x12xi1>, vector<256x12xbf16>
    %c0_22 = arith.constant 0 : index
    %c0_23 = arith.constant 0 : index
    %c0_24 = arith.constant 0 : index
    %44 = vector.load %arg4[%c0_22, %c0_23, %c0_24] : memref<3x12x4xbf16, #tpu.memory_space<vmem>>, vector<1x12x4xbf16>
    %45 = vector.shape_cast %44 : vector<1x12x4xbf16> to vector<12x4xbf16>
    %cst_25 = arith.constant dense<0.000000e+00> : vector<256x4xf32>
    %46 = tpu.matmul %43, %45, %cst_25 {dimension_numbers = #tpu.dot_dimension_numbers<[1], [0], [0], [1], [0, 0, 1, 1], [], []>} : vector<256x12xbf16>, vector<12x4xbf16>, vector<256x4xf32> -> vector<256x4xf32>
    %47 = arith.addf %33, %46 : vector<256x4xf32>
    %c16 = arith.constant 16 : index
    %c0_26 = arith.constant 0 : index
    %48 = vector.load %arg11[%c16, %c0_26] : memref<320x4xbf16, #tpu.memory_space<vmem>>, vector<256x4xbf16>
    %c32_27 = arith.constant 32 : index
    %c0_28 = arith.constant 0 : index
    %49 = vector.load %arg11[%c32_27, %c0_28] : memref<320x4xbf16, #tpu.memory_space<vmem>>, vector<256x4xbf16>
    %c48 = arith.constant 48 : index
    %c0_29 = arith.constant 0 : index
    %50 = vector.load %arg11[%c48, %c0_29] : memref<320x4xbf16, #tpu.memory_space<vmem>>, vector<256x4xbf16>
    %51 = tpu.concatenate %48, %49, %50 in 1 : vector<256x4xbf16>, vector<256x4xbf16>, vector<256x4xbf16> -> vector<256x12xbf16>
    %c1 = arith.constant 1 : index
    %c0_30 = arith.constant 0 : index
    %c0_31 = arith.constant 0 : index
    %52 = vector.load %arg4[%c1, %c0_30, %c0_31] : memref<3x12x4xbf16, #tpu.memory_space<vmem>>, vector<1x12x4xbf16>
    %53 = vector.shape_cast %52 : vector<1x12x4xbf16> to vector<12x4xbf16>
    %cst_32 = arith.constant dense<0.000000e+00> : vector<256x4xf32>
    %54 = tpu.matmul %51, %53, %cst_32 {dimension_numbers = #tpu.dot_dimension_numbers<[1], [0], [0], [1], [0, 0, 1, 1], [], []>} : vector<256x12xbf16>, vector<12x4xbf16>, vector<256x4xf32> -> vector<256x4xf32>
    %55 = arith.addf %47, %54 : vector<256x4xf32>
    %c17 = arith.constant 17 : index
    %c0_33 = arith.constant 0 : index
    %56 = vector.load %arg11[%c17, %c0_33] : memref<320x4xbf16, #tpu.memory_space<vmem>>, vector<256x4xbf16>
    %c33 = arith.constant 33 : index
    %c0_34 = arith.constant 0 : index
    %57 = vector.load %arg11[%c33, %c0_34] : memref<320x4xbf16, #tpu.memory_space<vmem>>, vector<256x4xbf16>
    %c49 = arith.constant 49 : index
    %c0_35 = arith.constant 0 : index
    %58 = vector.load %arg11[%c49, %c0_35] : memref<320x4xbf16, #tpu.memory_space<vmem>>, vector<256x4xbf16>
    %59 = tpu.concatenate %56, %57, %58 in 1 : vector<256x4xbf16>, vector<256x4xbf16>, vector<256x4xbf16> -> vector<256x12xbf16>
    %c14_i32 = arith.constant 14 : i32
    %60 = vector.broadcast %c14_i32 : i32 to vector<256x1xi32>
    %61 = arith.cmpi sle, %32, %60 : vector<256x1xi32>
    %cst_36 = arith.constant 0.000000e+00 : bf16
    %62 = vector.broadcast %cst_36 : bf16 to vector<256x12xbf16>
    %63 = vector.shape_cast %61 : vector<256x1xi1> to vector<256x1xi1>
    %64 = vector.broadcast %63 : vector<256x1xi1> to vector<256x12xi1>
    %65 = arith.select %64, %59, %62 : vector<256x12xi1>, vector<256x12xbf16>
    %c2 = arith.constant 2 : index
    %c0_37 = arith.constant 0 : index
    %c0_38 = arith.constant 0 : index
    %66 = vector.load %arg4[%c2, %c0_37, %c0_38] : memref<3x12x4xbf16, #tpu.memory_space<vmem>>, vector<1x12x4xbf16>
    %67 = vector.shape_cast %66 : vector<1x12x4xbf16> to vector<12x4xbf16>
    %cst_39 = arith.constant dense<0.000000e+00> : vector<256x4xf32>
    %68 = tpu.matmul %65, %67, %cst_39 {dimension_numbers = #tpu.dot_dimension_numbers<[1], [0], [0], [1], [0, 0, 1, 1], [], []>} : vector<256x12xbf16>, vector<12x4xbf16>, vector<256x4xf32> -> vector<256x4xf32>
    %69 = arith.addf %55, %68 : vector<256x4xf32>
    %c0_40 = arith.constant 0 : index
    %c0_41 = arith.constant 0 : index
    %70 = vector.load %arg5[%c0_40, %c0_41] : memref<1x4xf32, #tpu.memory_space<vmem>>, vector<1x4xf32>
    %71 = vector.broadcast %70 : vector<1x4xf32> to vector<256x4xf32>
    %72 = arith.addf %69, %71 : vector<256x4xf32>
    %cst_42 = arith.constant 0.000000e+00 : f32
    %73 = vector.broadcast %cst_42 : f32 to vector<256x4xf32>
    %74 = arith.maximumf %72, %73 : vector<256x4xf32>
    %75 = arith.truncf %74 : vector<256x4xf32> to vector<256x4xbf16>
    %c0_43 = arith.constant 0 : index
    %c0_44 = arith.constant 0 : index
    %76 = vector.load %arg6[%c0_43, %c0_44] : memref<4x16xbf16, #tpu.memory_space<vmem>>, vector<4x16xbf16>
    %cst_45 = arith.constant dense<0.000000e+00> : vector<256x16xf32>
    %77 = tpu.matmul %75, %76, %cst_45 {dimension_numbers = #tpu.dot_dimension_numbers<[1], [0], [0], [1], [0, 0, 1, 1], [], []>} : vector<256x4xbf16>, vector<4x16xbf16>, vector<256x16xf32> -> vector<256x16xf32>
    %c0_46 = arith.constant 0 : index
    %c0_47 = arith.constant 0 : index
    %78 = vector.load %arg7[%c0_46, %c0_47] : memref<1x16xf32, #tpu.memory_space<vmem>>, vector<1x16xf32>
    %79 = vector.broadcast %78 : vector<1x16xf32> to vector<256x16xf32>
    %80 = arith.addf %77, %79 : vector<256x16xf32>
    %cst_48 = arith.constant dense<0.000000e+00> : vector<16xf32>
    %81 = vector.multi_reduction <add>, %80, %cst_48 [0] : vector<256x16xf32> to vector<16xf32>
    %82 = vector.shape_cast %81 : vector<16xf32> to vector<1x16xf32>
    %cst_49 = arith.constant 3.906250e-03 : f32
    %83 = vector.broadcast %cst_49 : f32 to vector<1x16xf32>
    %84 = arith.mulf %82, %83 : vector<1x16xf32>
    %c0_50 = arith.constant 0 : index
    %c0_51 = arith.constant 0 : index
    %85 = vector.load %arg8[%c0_50, %c0_51] : memref<16x1xf32, #tpu.memory_space<vmem>>, vector<16x1xf32>
    %cst_52 = arith.constant dense<0.000000e+00> : vector<1x1xf32>
    %86 = tpu.matmul %84, %85, %cst_52 {dimension_numbers = #tpu.dot_dimension_numbers<[1], [0], [0], [1], [0, 0, 1, 1], [], []>} : vector<1x16xf32>, vector<16x1xf32>, vector<1x1xf32> -> vector<1x1xf32>
    %cst_53 = arith.constant 0.000000e+00 : f32
    %87 = vector.broadcast %cst_53 : f32 to vector<1x1xf32>
    %88 = arith.maximumf %86, %87 : vector<1x1xf32>
    %c0_54 = arith.constant 0 : index
    %c0_55 = arith.constant 0 : index
    %89 = vector.load %arg9[%c0_54, %c0_55] : memref<1x16xf32, #tpu.memory_space<vmem>>, vector<1x16xf32>
    %cst_56 = arith.constant dense<0.000000e+00> : vector<1x16xf32>
    %90 = tpu.matmul %88, %89, %cst_56 {dimension_numbers = #tpu.dot_dimension_numbers<[1], [0], [0], [1], [0, 0, 1, 1], [], []>} : vector<1x1xf32>, vector<1x16xf32>, vector<1x16xf32> -> vector<1x16xf32>
    %91 = arith.negf %90 : vector<1x16xf32>
    %92 = math.exp %91 : vector<1x16xf32>
    %cst_57 = arith.constant 1.000000e+00 : f32
    %93 = vector.broadcast %cst_57 : f32 to vector<1x16xf32>
    %94 = arith.addf %93, %92 : vector<1x16xf32>
    %95 = arith.divf %93, %94 : vector<1x16xf32>
    %96 = vector.broadcast %95 : vector<1x16xf32> to vector<256x16xf32>
    %97 = arith.mulf %80, %96 : vector<256x16xf32>
    %98 = arith.addf %97, %1 : vector<256x16xf32>
    %cst_58 = arith.constant 0.000000e+00 : f32
    %99 = vector.broadcast %cst_58 : f32 to vector<256x16xf32>
    %100 = arith.maximumf %98, %99 : vector<256x16xf32>
    %c0_59 = arith.constant 0 : index
    %c0_60 = arith.constant 0 : index
    %c0_61 = arith.constant 0 : index
    %101 = vector.load %arg10[%c0_59, %c0_60, %c0_61] : memref<1x256x16xf32, #tpu.memory_space<vmem>>, vector<1x256x16xf32>
    %102 = vector.shape_cast %101 : vector<1x256x16xf32> to vector<256x16xf32>
    %103 = vector.shape_cast %100 : vector<256x16xf32> to vector<1x256x16xf32>
    tpu.vector_store %arg10[%c0_59, %c0_60, %c0_61], %103 {strides = array<i32>} : memref<1x256x16xf32, #tpu.memory_space<vmem>>, vector<1x256x16xf32>,
    return
  }
  func.func @transform_0(%arg0: i32) -> (i32, i32, i32) {
    %c0_i32 = arith.constant 0 : i32
    %c0_i32_0 = arith.constant 0 : i32
    %c0_i32_1 = arith.constant 0 : i32
    return %arg0, %c0_i32, %c0_i32_0 : i32, i32, i32
  }
  func.func @transform_1(%arg0: i32) -> (i32, i32) {
    %c0_i32 = arith.constant 0 : i32
    %c0_i32_0 = arith.constant 0 : i32
    %c0_i32_1 = arith.constant 0 : i32
    return %c0_i32, %c0_i32_0 : i32, i32
  }
  func.func @transform_2(%arg0: i32) -> (i32, i32) {
    %c0_i32 = arith.constant 0 : i32
    %c0_i32_0 = arith.constant 0 : i32
    %c0_i32_1 = arith.constant 0 : i32
    return %c0_i32, %c0_i32_0 : i32, i32
  }
  func.func @transform_3(%arg0: i32) -> (i32, i32, i32) {
    %c0_i32 = arith.constant 0 : i32
    %c0_i32_0 = arith.constant 0 : i32
    %c0_i32_1 = arith.constant 0 : i32
    %c0_i32_2 = arith.constant 0 : i32
    return %c0_i32, %c0_i32_0, %c0_i32_1 : i32, i32, i32
  }
  func.func @transform_4(%arg0: i32) -> (i32, i32) {
    %c0_i32 = arith.constant 0 : i32
    %c0_i32_0 = arith.constant 0 : i32
    %c0_i32_1 = arith.constant 0 : i32
    return %c0_i32, %c0_i32_0 : i32, i32
  }
  func.func @transform_5(%arg0: i32) -> (i32, i32) {
    %c0_i32 = arith.constant 0 : i32
    %c0_i32_0 = arith.constant 0 : i32
    %c0_i32_1 = arith.constant 0 : i32
    return %c0_i32, %c0_i32_0 : i32, i32
  }
  func.func @transform_6(%arg0: i32) -> (i32, i32) {
    %c0_i32 = arith.constant 0 : i32
    %c0_i32_0 = arith.constant 0 : i32
    %c0_i32_1 = arith.constant 0 : i32
    return %c0_i32, %c0_i32_0 : i32, i32
  }
  func.func @transform_7(%arg0: i32) -> (i32, i32) {
    %c0_i32 = arith.constant 0 : i32
    %c0_i32_0 = arith.constant 0 : i32
    %c0_i32_1 = arith.constant 0 : i32
    return %c0_i32, %c0_i32_0 : i32, i32
  }
  func.func @transform_8(%arg0: i32) -> (i32, i32) {
    %c0_i32 = arith.constant 0 : i32
    %c0_i32_0 = arith.constant 0 : i32
    %c0_i32_1 = arith.constant 0 : i32
    return %c0_i32, %c0_i32_0 : i32, i32
  }
  func.func @transform_9(%arg0: i32) -> (i32, i32, i32) {
    %c0_i32 = arith.constant 0 : i32
    %c0_i32_0 = arith.constant 0 : i32
    %c0_i32_1 = arith.constant 0 : i32
    return %arg0, %c0_i32, %c0_i32_0 : i32, i32, i32
  }
}

</mosaic_0001>

<bundles_post_ra>
// kernel: tpu_custom_call.1
= control target key start
LH: loop header
LB: loop body
LE: loop exit
PB: predicated region body
PF: predicated region fallthrough
CT: control target
= control target key end

     0   :  { %s4656_s30 = smov 0   ;;  %s7041_s0 = inlined_call_operand.vmem [shape: f32[2,256,16], index: 0, kind: input, shape index: {}]   ;;  %s7042_s1 = inlined_call_operand.vmem [shape: bf16[16,4], index: 1, kind: input, shape index: {}]   ;;  %s7043_s2 = inlined_call_operand.vmem [shape: f32[1,4], index: 2, kind: input, shape index: {}]   ;;  %s7044_s3 = inlined_call_operand.vmem [shape: bf16[3,12,4], index: 3, kind: input, shape index: {}]   ;;  %s7045_s4 = inlined_call_operand.vmem [shape: f32[1,4], index: 4, kind: input, shape index: {}]   ;;  %s7046_s5 = inlined_call_operand.vmem [shape: bf16[4,16], index: 5, kind: input, shape index: {}]   ;;  %s7047_s6 = inlined_call_operand.vmem [shape: f32[1,16], index: 6, kind: input, shape index: {}]   ;;  %s7048_s7 = inlined_call_operand.vmem [shape: f32[16,1], index: 7, kind: input, shape index: {}]   ;;  %s7049_s8 = inlined_call_operand.vmem [shape: f32[1,16], index: 8, kind: input, shape index: {}]   ;;  %s7050_s9 = inlined_call_operand.vmem [shape: f32[2,256,16], index: 9, kind: output, shape index: {}]  }
   0x1 LB: > { %s4103_s10 = sadd.s32 4294967295, %s4600_s30   ;;  %p4107_p0 = scmp.ge.s32.totalorder %s4600_s30, 1  ;;  %s4600_s30 = sphi %s4656_s30, %s19_s30  }
   0x2   : > { %p287_p1 = scmp.lt.s32.totalorder %s4600_s30, 3 }
   0x4   : > { %p288_p2 = pnand %p4107_p0, %p287_p1 }
   0x5   : > { %p323_p3 = scmp.lt.s32.totalorder (!%p288_p2), %s4103_s10, 1  ;;  %s4603_s19 = smov (!%p288_p2), 4  }
   0x6   : > { %291 = sbr.rel (%p288_p2) target bundleno = 1193 (0x4a9), region = 56  ;;  %s4604_s20 = smov (!%p288_p2), 8  }
   0xb   : > { %v4292_v0 = vld [vmem:[%s7042_s1] sm:$0xff]  ;;  %s7250_s10 = smov (!%p323_p3, %s4103_s10), 1  ;;  %vm396_vm0 = vcmask 130048   ;;  %vm566_vm1 = vcmask 27648   ;;  %v4602_v34 = vmov 0   ;;  %vm2061_vm2 = vcmask 1045504  }
   0xc   : > { %452 = vmatpush.bf16.msra.mxu0 %v4292_v0  ;;  %4473 = vmatpush.bf16.msra.mxu1 %v4292_v0  ;;  %s4290_s13 = sshll.u32 %s7250_s10, 8  ;;  %570 = vst.msk [vmem:[#allocation2 + $0xc] sm:$0xf] %vm566_vm1, %v4602_v34  ;;  %v4728_v38 = vld [vmem:[%s7043_s2] ss:$0 sm:$0xff]  ;;  %vm4605_vm4 = vmmov 1  }
   0xd   : > { %4474 = vmatpush.bf16.msra.mxu2 %v4292_v0  ;;  %4475 = vmatpush.bf16.msra.mxu3 %v4292_v0  ;;  %s4675_s16 = scalar_lea.vmem %s7041_s0, %s4290_s13  ;;  %568 = vst.msk [vmem:[#allocation2 + $0x4] sm:$0xf] %vm566_vm1, %v4602_v34  ;;  %vm1465_vm5 = vmpackc.low %vm4605_vm4, %vm4605_vm4  ;;  %vm1264_vm15 = vcmask 31744   ;;  %s6899_s17 = scalar_lea.vmem %s7050_s9, %s4290_s13 }
   0xe   : > { %v336_v1 = vld [vmem:[%s4675_s16] sm:$0xff]  ;;  %v337_v2 = vld [vmem:[%s4675_s16 + $0x8] sm:$0xff]  ;;  %v338_v4 = vld [vmem:[%s4675_s16 + $0x10] sm:$0xff]  ;;  %569 = vst.msk [vmem:[#allocation2 + $0x8] sm:$0xf] %vm566_vm1, %v4602_v34 }
   0xf   : > { %v368_v3 = vpack.c.bf16 %v337_v2, %v336_v1  ;;  %v339_v5 = vld [vmem:[%s4675_s16 + $0x18] sm:$0xff]  ;;  %v340_v7 = vld [vmem:[%s4675_s16 + $0x20] sm:$0xff]  ;;  %v341_v8 = vld [vmem:[%s4675_s16 + $0x28] sm:$0xff]  ;;  %571 = vst.msk [vmem:[#allocation2 + $0x90] sm:$0xf] %vm566_vm1, %v4602_v34 }
  0x10   : > { %v369_v6 = vpack.c.bf16 %v339_v5, %v338_v4  ;;  %v370_v9 = vpack.c.bf16 %v341_v8, %v340_v7  ;;  %v346_v10 = vld [vmem:[%s4675_s16 + $0x50] sm:$0xff]  ;;  %v347_v11 = vld [vmem:[%s4675_s16 + $0x58] sm:$0xff]  ;;  %v348_v16 = vld [vmem:[%s4675_s16 + $0x60] sm:$0xff]  ;;  %572 = vst.msk [vmem:[#allocation2 + $0x94] sm:$0xf] %vm566_vm1, %v4602_v34 }
  0x11   : > { %4116 = vmatmul.msk.bf16.vlgmr.msra.gmra.mxu0 %vm396_vm0, %v368_v3  ;;  %v373_v12 = vpack.c.bf16 %v347_v11, %v346_v10  ;;  %v342_v13 = vld [vmem:[%s4675_s16 + $0x30] sm:$0xff]  ;;  %v343_v14 = vld [vmem:[%s4675_s16 + $0x38] sm:$0xff]  ;;  %v349_v17 = vld [vmem:[%s4675_s16 + $0x68] sm:$0xff]  ;;  %573 = vst.msk [vmem:[#allocation2 + $0x98] sm:$0xf] %vm566_vm1, %v4602_v34 }
  0x12   : > { %v371_v15 = vpack.c.bf16 %v343_v14, %v342_v13  ;;  %v374_v18 = vpack.c.bf16 %v349_v17, %v348_v16  ;;  %v354_v19 = vld [vmem:[%s4675_s16 + $0x90] sm:$0xff]  ;;  %v355_v20 = vld [vmem:[%s4675_s16 + $0x98] sm:$0xff]  ;;  %v344_v22 = vld [vmem:[%s4675_s16 + $0x40] sm:$0xff] }
  0x13   : > { %4121 = vmatmul.msk.bf16.vlgmr.msra.gmra.mxu1 %vm396_vm0, %v373_v12  ;;  %v377_v21 = vpack.c.bf16 %v355_v20, %v354_v19  ;;  %v345_v23 = vld [vmem:[%s4675_s16 + $0x48] sm:$0xff]  ;;  %v350_v25 = vld [vmem:[%s4675_s16 + $0x70] sm:$0xff]  ;;  %v351_v26 = vld [vmem:[%s4675_s16 + $0x78] sm:$0xff] }
  0x14   : > { %v372_v24 = vpack.c.bf16 %v345_v23, %v344_v22  ;;  %v375_v27 = vpack.c.bf16 %v351_v26, %v350_v25  ;;  %v352_v28 = vld [vmem:[%s4675_s16 + $0x80] sm:$0xff]  ;;  %v353_v29 = vld [vmem:[%s4675_s16 + $0x88] sm:$0xff]  ;;  %v358_v35 = vld [vmem:[%s4675_s16 + $0xb0] sm:$0xff] }
  0x15   : > { %4125 = vmatmul.msk.bf16.vlgmr.msra.gmra.mxu2 %vm396_vm0, %v377_v21  ;;  %v376_v30 = vpack.c.bf16 %v353_v29, %v352_v28  ;;  %v356_v31 = vld [vmem:[%s4675_s16 + $0xa0] sm:$0xff]  ;;  %v357_v32 = vld [vmem:[%s4675_s16 + $0xa8] sm:$0xff]  ;;  %v359_v36 = vld [vmem:[%s4675_s16 + $0xb8] sm:$0xff] }
  0x16   : > { %v378_v33 = vpack.c.bf16 %v357_v32, %v356_v31  ;;  %v379_v37 = vpack.c.bf16 %v359_v36, %v358_v35  ;;  %v360_v43 = vld [vmem:[%s4675_s16 + $0xc0] sm:$0xff]  ;;  %v361_v44 = vld [vmem:[%s4675_s16 + $0xc8] sm:$0xff]  ;;  %v362_v56 = vld [vmem:[%s4675_s16 + $0xd0] sm:$0xff] }
  0x17   : > { %v380_v45 = vpack.c.bf16 %v361_v44, %v360_v43  ;;  %v1089_v52 = vld [vmem:[#allocation2 + $0xc] sm:$0x8]  ;;  %v363_v57 = vld [vmem:[%s4675_s16 + $0xd8] sm:$0xff]  ;;  %v366_v36 = vld [vmem:[%s4675_s16 + $0xf0] sm:$0xff] }
  0x18   : > { %4127 = vmatmul.msk.bf16.vlgmr.msra.gmra.mxu3 %vm396_vm0, %v379_v37  ;;  %v1181_v55 = vunpack.c.l.b16 %v1089_v52  ;;  %v381_v60 = vpack.c.bf16 %v363_v57, %v362_v56  ;;  %v365_v10 = vld [vmem:[%s4675_s16 + $0xe8] sm:$0xff]  ;;  %v367_v37 = vld [vmem:[%s4675_s16 + $0xf8] sm:$0xff] }
  0x21   : > { %4117 = vmatmul.msk.bf16.gmra.mxu0 %vm396_vm0, %v369_v6 }
  0x23   : > { %4122 = vmatmul.msk.bf16.gmra.mxu1 %vm396_vm0, %v374_v18 }
  0x25   : > { %4126 = vmatmul.msk.bf16.gmra.mxu2 %vm396_vm0, %v378_v33 }
  0x28   : > { %4128 = vmatmul.msk.bf16.gmra.mxu3 %vm396_vm0, %v380_v45 }
  0x31   : > { %4118 = vmatmul.msk.bf16.gmra.mxu0 %vm396_vm0, %v370_v9  ;;  %v364_v9 = vld [vmem:[%s4675_s16 + $0xe0] sm:$0xff] }
  0x32   : > { %v382_v13 = vpack.c.bf16 %v365_v10, %v364_v9 }
  0x33   : > { %4123 = vmatmul.msk.bf16.gmra.mxu1 %vm396_vm0, %v375_v27 }
  0x38   : > { %4129 = vmatmul.msk.bf16.gmra.mxu3 %vm396_vm0, %v381_v60  ;;  %v4250_v60 = vld [vmem:[%s7044_s3 + $0x10] sm:$0xf] }
  0x41   : > { %4119 = vmatmul.msk.bf16.gmra.mxu0 %vm396_vm0, %v371_v15 }
  0x43   : > { %4124 = vmatmul.msk.bf16.gmra.mxu1 %vm396_vm0, %v376_v30 }
  0x48   : > { %4130 = vmatmul.msk.bf16.gmra.mxu3 %vm396_vm0, %v382_v13 }
  0x51   : > { %4120 = vmatmul.msk.bf16.gmra.mxu0 %vm396_vm0, %v372_v24 }
  0x8e   : > { %v454_v39 = vpop.f32.mrf.mxu0 }
  0x8f   : > { %v455_v40 = vadd.f32 %v4728_v38, %v454_v39 }
  0x90   : > { %v479_v6 = vpop.f32.mrf.mxu1 }
  0x91   : > { %v534_v41 = vmax.f32 %v455_v40, 0.0  ;;  %v480_v17 = vadd.f32 %v4728_v38, %v479_v6  ;;  %v383_v40 = vpack.c.bf16 %v367_v37, %v366_v36  ;;  %v639_v37 = vlaneseq }
  0x93   : > { %v575_v42 = vpack.c.bf16 %v534_v41, %v534_v41  ;;  %v544_v22 = vmax.f32 %v480_v17, 0.0  ;;  %4131 = vmatmul.msk.bf16.gmra.mxu3 %vm396_vm0, %v383_v40 }
  0x95   : > { %607 = vst.msk [vmem:[#allocation2 + $0x10] sm:$0xf] %vm566_vm1, %v575_v42  ;;  %v585_v24 = vpack.c.bf16 %v544_v22, %v544_v22 }
  0x96   : > { %v456_v46 = vpop.f32.mrf.mxu0 }
  0x97   : > { %v457_v47 = vadd.f32 %v4728_v38, %v456_v46  ;;  %617 = vst.msk [vmem:[#allocation2 + $0x38] sm:$0xf] %vm566_vm1, %v585_v24 }
  0x98   : > { %v481_v25 = vpop.f32.mrf.mxu1 }
  0x99   : > { %v535_v48 = vmax.f32 %v457_v47, 0.0  ;;  %v482_v27 = vadd.f32 %v4728_v38, %v481_v25 }
  0x9b   : > { %v576_v49 = vpack.c.bf16 %v535_v48, %v535_v48  ;;  %v545_v31 = vmax.f32 %v482_v27, 0.0 }
  0x9d   : > { %608 = vst.msk [vmem:[#allocation2 + $0x14] sm:$0xf] %vm566_vm1, %v576_v49  ;;  %v586_v33 = vpack.c.bf16 %v545_v31, %v545_v31  ;;  %v499_v31 = vpop.f32.mrf.mxu2 }
  0x9e   : > { %v459_v50 = vpop.f32.mrf.mxu0 }
  0x9f   : > { %v460_v51 = vadd.f32 %v4728_v38, %v459_v50  ;;  %618 = vst.msk [vmem:[#allocation2 + $0x3c] sm:$0xf] %vm566_vm1, %v586_v33  ;;  %v500_v33 = vadd.f32 %v4728_v38, %v499_v31 }
  0xa0   : > { %v484_v35 = vpop.f32.mrf.mxu1 }
  0xa1   : > { %v536_v53 = vmax.f32 %v460_v51, 0.0  ;;  %v485_v39 = vadd.f32 %v4728_v38, %v484_v35  ;;  %v552_v36 = vmax.f32 %v500_v33, 0.0 }
  0xa3   : > { %v577_v54 = vpack.c.bf16 %v536_v53, %v536_v53  ;;  %v546_v42 = vmax.f32 %v485_v39, 0.0  ;;  %v593_v40 = vpack.c.bf16 %v552_v36, %v552_v36 }
  0xa4   : > { %v4740_v58 = vld [vmem:[#allocation2 + $0x10] sm:$0xff] }
  0xa5   : > { %v4742_v59 = vld [vmem:[#allocation2 + $0x10] sm:$0xff]   ;;  %609 = vst.msk [vmem:[#allocation2 + $0x18] sm:$0xf] %vm566_vm1, %v577_v54  ;;  %2582 = vrot.lane.b32.xlu2 %v4740_v58, %s4603_s19  ;;  %v587_v44 = vpack.c.bf16 %v546_v42, %v546_v42 }
  0xa6   : > { %v4320_v61 = vunpack.c.l.b16 %v4742_v59  ;;  %v461_v62 = vpop.f32.mrf.mxu0  ;;  %v1092_v7 = vld [vmem:[#allocation2 + $0x14] sm:$0x8]  ;;  %v4321_v16 = vunpack.c.h.b16 %v4742_v59  ;;  %625 = vst.msk [vmem:[#allocation2 + $0x58] sm:$0xf] %vm566_vm1, %v593_v40  ;;  %v4301_v42 = vld [vmem:[#allocation2 + $0x38] sm:$0xff] }
  0xa7   : > { %v462_v63 = vadd.f32 %v4728_v38, %v461_v62  ;;  %v1224_v15 = vunpack.c.l.b16 %v1092_v7  ;;  %619 = vst.msk [vmem:[#allocation2 + $0x40] sm:$0xf] %vm566_vm1, %v587_v44  ;;  %v4313_v62 = vld [vmem:[%s7044_s3 + $0x10] sm:$0x30] }
  0xa8   : > { %v1184_v0 = vpack.c.b16 %v4320_v61, %v1181_v55  ;;  %v486_v48 = vpop.f32.mrf.mxu1 }
  0xa9   : > { %v537_v1 = vmax.f32 %v462_v63, 0.0  ;;  %v487_v49 = vadd.f32 %v4728_v38, %v486_v48 }
  0xaa   : > { %1187 = vrot.lane.b32.xlu0 %v1184_v0, %s4603_s19  ;;  %v4251_v0 = vor.u32 %v4313_v62, %v4250_v60 }
  0xab   : > { %v578_v2 = vpack.c.bf16 %v537_v1, %v537_v1  ;;  %v547_v52 = vmax.f32 %v487_v49, 0.0 }
  0xad   : > { %610 = vst.msk [vmem:[#allocation2 + $0x1c] sm:$0xf] %vm566_vm1, %v578_v2  ;;  %v588_v54 = vpack.c.bf16 %v547_v52, %v547_v52  ;;  %v4156_v52 = vld [vmem:[%s7044_s3] sm:$0xf] }
  0xae   : > { %v464_v3 = vpop.f32.mrf.mxu0  ;;  %v4487_v49 = vld [vmem:[#allocation2 + $0x3c] sm:$0xff]  }
  0xaf   : > { %v465_v4 = vadd.f32 %v4728_v38, %v464_v3  ;;  %620 = vst.msk [vmem:[#allocation2 + $0x44] sm:$0xf] %vm566_vm1, %v588_v54  ;;  %v3422_v3 = vsel %vm2061_vm2, %v4251_v0, 0 }
  0xb0   : > { %v489_v57 = vpop.f32.mrf.mxu1  ;;  %3431 = vmatpush.bf16.msrb.mxu3 %v3422_v3 }
  0xb1   : > { %v538_v5 = vmax.f32 %v465_v4, 0.0  ;;  %v490_v63 = vadd.f32 %v4728_v38, %v489_v57 }
  0xb3   : > { %v579_v8 = vpack.c.bf16 %v538_v5, %v538_v5  ;;  %v548_v2 = vmax.f32 %v490_v63, 0.0 }
  0xb4   : > { %v4757_v11 = vld [vmem:[#allocation2 + $0x18] sm:$0xff] }
  0xb5   : > { %v4759_v12 = vld [vmem:[#allocation2 + $0x18] sm:$0xff]   ;;  %611 = vst.msk [vmem:[#allocation2 + $0x20] sm:$0xf] %vm566_vm1, %v579_v8  ;;  %2624 = vrot.lane.b32.xlu2 %v4757_v11, %s4604_s20  ;;  %v589_v5 = vpack.c.bf16 %v548_v2, %v548_v2 }
  0xb6   : > { %v4324_v14 = vunpack.c.l.b16 %v4759_v12  ;;  %v466_v18 = vpop.f32.mrf.mxu0  ;;  %v4302_v3 = vld [vmem:[#allocation2 + $0x40] sm:$0xff] }
  0xb7   : > { %v467_v19 = vadd.f32 %v4728_v38, %v466_v18  ;;  %621 = vst.msk [vmem:[#allocation2 + $0x48] sm:$0xf] %vm566_vm1, %v589_v5  ;;  %v4136_v18 = vld [vmem:[%s7044_s3 + $0x8] sm:$0xf] }
  0xb8   : > { %v1227_v20 = vpack.c.b16 %v4324_v14, %v1224_v15  ;;  %v4769_v21 = vpack.c.b16 %v4324_v14, %v4321_v16  ;;  %v491_v10 = vpop.f32.mrf.mxu1 }
  0xb9   : > { %v539_v23 = vmax.f32 %v467_v19, 0.0  ;;  %v492_v13 = vadd.f32 %v4728_v38, %v491_v10  ;;  %v4294_v19 = vld [vmem:[%s7044_s3 + $0x8] sm:$0x30] }
  0xba   : > { %1230 = vrot.lane.b32.xlu1 %v1227_v20, %s4604_s20  ;;  %1189 = vrot.lane.b32.xlu0 %v4769_v21, %s4603_s19  ;;  %v4137_v22 = vor.u32 %v4294_v19, %v4136_v18 }
  0xbb   : > { %v580_v26 = vpack.c.bf16 %v539_v23, %v539_v23  ;;  %v549_v16 = vmax.f32 %v492_v13, 0.0 }
  0xbc   : > { %v4780_v30 = vld [vmem:[#allocation2 + $0x1c] sm:$0xff]   ;;  %v2063_v24 = vsel %vm2061_vm2, %v4137_v22, 0 }
  0xbd   : > { %612 = vst.msk [vmem:[#allocation2 + $0x24] sm:$0xf] %vm566_vm1, %v580_v26  ;;  %1875 = vrot.lane.b32.xlu2 %v4742_v59, %s4603_s19  ;;  %2072 = vmatpush.bf16.msrb.mxu1 %v2063_v24 }
  0xbe   : > { %v469_v28 = vpop.f32.mrf.mxu0 }
  0xbf   : > { %v470_v29 = vadd.f32 %v4728_v38, %v469_v28 }
  0xc0   : > { %v494_v17 = vpop.f32.mrf.mxu1 }
  0xc1   : > { %v540_v32 = vmax.f32 %v470_v29, 0.0  ;;  %v495_v20 = vadd.f32 %v4728_v38, %v494_v17 }
  0xc2   : > { %1232 = vrot.lane.b32.xlu1 %v4780_v30, %s4604_s20  ;;  %2584 = vrot.lane.b32.xlu0 %v4757_v11, %s4603_s19 }
  0xc3   : > { %v581_v41 = vpack.c.bf16 %v540_v32, %v540_v32  ;;  %v550_v23 = vmax.f32 %v495_v20, 0.0 }
  0xc4   : > { %v4793_v46 = vld [vmem:[#allocation2 + $0x20] sm:$0xff] }
  0xc5   : > { %613 = vst.msk [vmem:[#allocation2 + $0x28] sm:$0xf] %vm566_vm1, %v581_v41  ;;  %v4389_v8 = vld [vmem:[#allocation2 + $0x20] sm:$0xff]   ;;  %v591_v25 = vpack.c.bf16 %v550_v23, %v550_v23  ;;  %v4848_v41 = vshrl.u32 %v639_v37, 7 }
  0xc6   : > { %v471_v43 = vpop.f32.mrf.mxu0 }
  0xc7   : > { %v472_v45 = vadd.f32 %v4728_v38, %v471_v43  ;;  %623 = vst.msk [vmem:[#allocation2 + $0x50] sm:$0xf] %vm566_vm1, %v591_v25  ;;  %v501_v43 = vpop.f32.mrf.mxu2  ;;  %v642_v62 = vadd.s32 16, %v4848_v41  ;;  %v676_v63 = vand.u32 15, %v4848_v41 }
  0xc8   : > { %v496_v29 = vpop.f32.mrf.mxu1 }
  0xc9   : > { %v541_v47 = vmax.f32 %v472_v45, 0.0  ;;  %v497_v32 = vadd.f32 %v4728_v38, %v496_v29  ;;  %v502_v45 = vadd.f32 %v4728_v38, %v501_v43  ;;  %v690_v2 = vand.u32 15, %v642_v62 }
  0xca   : > { %2626 = vrot.lane.b32.xlu1 %v4793_v46, %s4604_s20  ;;  %1908 = vrot.lane.b32.xlu0 %v4759_v12, %s4604_s20  ;;  %vm4880_vm7 = vcmp.ge.s32.totalorder %v676_v63, 1 }
  0xcb   : > { %v582_v50 = vpack.c.bf16 %v541_v47, %v541_v47  ;;  %v551_v35 = vmax.f32 %v497_v32, 0.0  ;;  %v641_v47 = vadd.s32 8, %v4848_v41  ;;  %v553_v48 = vmax.f32 %v502_v45, 0.0  ;;  %vm1464_vm8 = vmpackc.low %vm4880_vm7, %vm4880_vm7 }
  0xcc   : > { %v4481_v51 = vld [vmem:[#allocation2 + $0x24] sm:$0xff]   ;;  %vm1370_vm9 = vcmp.ge.s32.totalorder %v690_v2, 1  ;;  %v1496_v17 = vsel %vm1464_vm8, 65537, %v4602_v34 }
  0xcd   : > { %614 = vst.msk [vmem:[#allocation2 + $0x2c] sm:$0xf] %vm566_vm1, %v582_v50  ;;  %1234 = vrot.lane.b32.xlu2 %v4481_v51, %s4604_s20  ;;  %v592_v39 = vpack.c.bf16 %v551_v35, %v551_v35  ;;  %v594_v50 = vpack.c.bf16 %v553_v48, %v553_v48  ;;  %vm1466_vm10 = vmpackc.low %vm1370_vm9, %vm1370_vm9  ;;  %v1528_v23 = vunpack.c.l.b16 %v1496_v17 }
  0xce   : > { %v474_v53 = vpop.f32.mrf.mxu0  ;;  %v1498_v24 = vsel %vm1466_vm10, 65537, %v4602_v34  ;;  %vm2968_vm10 = vsmask.f32 256 }
  0xcf   : > { %v475_v55 = vadd.f32 %v4728_v38, %v474_v53  ;;  %624 = vst.msk [vmem:[#allocation2 + $0x54] sm:$0xf] %vm566_vm1, %v592_v39  ;;  %v4293_v53 = vld [vmem:[%s7044_s3] sm:$0x30]  ;;  %v1530_v32 = vunpack.c.l.b16 %v1498_v24  ;;  %v4406_v24 = vld [vmem:[#allocation2 + $0x4] sm:$0x8] }
  0xd0   : > { %626 = vst.msk [vmem:[#allocation2 + $0x5c] sm:$0xf] %vm566_vm1, %v594_v50  ;;  %v4157_v54 = vor.u32 %v4293_v53, %v4156_v52 }
  0xd1   : > { %v542_v56 = vmax.f32 %v475_v55, 0.0 }
  0xd2   : > { %1191 = vrot.lane.b32.xlu1 %v4780_v30, %s4603_s19  ;;  %2586 = vrot.lane.b32.xlu0 %v4793_v46, %s4603_s19  ;;  %v2361_v57 = vsel %vm2061_vm2, %v4157_v54, 0  ;;  %vm1316_vm2 = vcmask 64512  }
  0xd3   : > { %v583_v1 = vpack.c.bf16 %v542_v56, %v542_v56  ;;  %v504_v56 = vpop.f32.mrf.mxu2  ;;  %2370 = vmatpush.bf16.msrb.mxu2 %v2361_v57 }
  0xd4   : > { %v4299_v7 = vld [vmem:[#allocation2 + $0x28] sm:$0xff]  ;;  %v505_v60 = vadd.f32 %v4728_v38, %v504_v56 }
  0xd5   : > { %615 = vst.msk [vmem:[#allocation2 + $0x30] sm:$0xf] %vm566_vm1, %v583_v1  ;;  %1877 = vrot.lane.b32.xlu2 %v4759_v12, %s4603_s19  ;;  %v590_v12 = vpack.c.bf16 %v549_v16, %v549_v16  ;;  %v4390_v27 = vld [vmem:[#allocation2 + $0x28] sm:$0xff]  }
  0xd6   : > { %v476_v4 = vpop.f32.mrf.mxu0  ;;  %v554_v0 = vmax.f32 %v505_v60, 0.0  ;;  %v4894_v16 = vld [vmem:[#allocation2 + $0x44] sm:$0xff]   ;;  %v645_v60 = vadd.s32 40, %v4848_v41 }
  0xd7   : > { %v477_v6 = vadd.f32 %v4728_v38, %v476_v4  ;;  %622 = vst.msk [vmem:[#allocation2 + $0x4c] sm:$0xf] %vm566_vm1, %v590_v12  ;;  %v1497_v4 = vsel %vm1465_vm5, 65537, %v4602_v34 }
  0xd8   : > { %v595_v1 = vpack.c.bf16 %v554_v0, %v554_v0  ;;  %v4888_v13 = vunpack.c.l.b16 %v1497_v4 }
  0xd9   : > { %v543_v9 = vmax.f32 %v477_v6, 0.0  ;;  %v4949_v6 = vunpack.c.h.b16 %v4602_v34 }
  0xda   : > { %2628 = vrot.lane.b32.xlu1 %v4299_v7, %s4604_s20  ;;  %1910 = vrot.lane.b32.xlu0 %v4389_v8, %s4604_s20  ;;  %627 = vst.msk [vmem:[#allocation2 + $0x60] sm:$0xf] %vm566_vm1, %v595_v1  ;;  %v1560_v35 = vpack.c.b16 %v4888_v13, %v1528_v23  ;;  %v4295_v23 = vld [vmem:[#allocation2 + $0x8] sm:$0xff] }
  0xdb   : > { %v584_v14 = vpack.c.bf16 %v543_v9, %v543_v9  ;;  %v509_v9 = vpop.f32.mrf.mxu3  ;;  %v506_v25 = vpop.f32.mrf.mxu2 }
  0xdc   : > { %v4483_v15 = vld [vmem:[#allocation2 + $0x2c] sm:$0xff]   ;;  %v507_v29 = vadd.f32 %v4728_v38, %v506_v25  ;;  %v1578_v52 = vshrl.u32 %v1560_v35, 16  ;;  %v1581_v53 = vshll.u32 %v1560_v35, 16 }
  0xdd   : > { %616 = vst.msk [vmem:[#allocation2 + $0x34] sm:$0xf] %vm566_vm1, %v584_v14  ;;  %1236 = vrot.lane.b32.xlu2 %v4483_v15, %s4604_s20 }
  0xde   : > { %v555_v36 = vmax.f32 %v507_v29, 0.0  ;;  %v4303_v48 = vld [vmem:[#allocation2 + $0x48] sm:$0xff]  ;;  %v1580_v1 = vrot.slane %v1578_v52, 4  ;;  %v1583_v2 = vrot.slane %v1581_v53, 5  ;;  %v4304_v52 = vld [vmem:[#allocation2 + $0x50] sm:$0xff] }
  0xdf   : > { %v4942_v0 = vld [vmem:[#allocation2 + $0x4c] sm:$0xff]  }
  0xe2   : > { %1193 = vrot.lane.b32.xlu1 %v4481_v51, %s4603_s19  ;;  %2588 = vrot.lane.b32.xlu0 %v4299_v7, %s4603_s19  ;;  %v683_v51 = vand.u32 15, %v641_v47  ;;  %v643_v7 = vadd.s32 24, %v4848_v41 }
  0xe4   : > { %v4300_v26 = vld [vmem:[#allocation2 + $0x30] sm:$0xff]  ;;  %vm4866_vm3 = vcmp.le.s32.totalorder %v683_v51, 14  ;;  %v697_v10 = vand.u32 15, %v643_v7  ;;  %v4928_v51 = vld [vmem:[#allocation2 + $0x40] sm:$0xff]  }
  0xe5   : > { %1879 = vrot.lane.b32.xlu2 %v4389_v8, %s4603_s19  ;;  %v4485_v28 = vld [vmem:[#allocation2 + $0x34] sm:$0xff]   ;;  %vm2857_vm6 = vmpackc.low %vm4866_vm3, %vm4866_vm3 }
  0xe6   : > { %v4391_v44 = vld [vmem:[#allocation2 + $0x30] sm:$0xff]   ;;  %v2889_v5 = vsel %vm2857_vm6, 65537, %v4602_v34  ;;  %v4392_v8 = vld [vmem:[#allocation2 + $0x38] sm:$0xff]   ;;  %vm4897_vm11 = vcmp.le.s32.totalorder %v697_v10, 14  ;;  %v711_v10 = vand.u32 15, %v645_v60 }
  0xe7   : > { %v2921_v14 = vunpack.c.l.b16 %v2889_v5  ;;  %vm2859_vm12 = vmpackc.low %vm4897_vm11, %vm4897_vm11  ;;  %v4946_v5 = vunpack.c.l.b16 %v4602_v34  ;;  %vm1576_vm6 = vsmask.f32 3328 }
  0xe8   : > { %v2891_v33 = vsel %vm2859_vm12, 65537, %v4602_v34  ;;  %vm4963_vm3 = vcmp.le.s32.totalorder %v711_v10, 14 }
  0xe9   : > { %v2952_v20 = vpack.c.b16 %v2921_v14, %v4888_v13  ;;  %v2923_v47 = vunpack.c.l.b16 %v2891_v33  ;;  %vm2861_vm7 = vmpackc.low %vm4963_vm3, %vm4963_vm3 }
  0xea   : > { %2630 = vrot.lane.b32.xlu1 %v4300_v26, %s4604_s20  ;;  %1912 = vrot.lane.b32.xlu0 %v4390_v27, %s4604_s20 }
  0xeb   : > { %v2973_v39 = vshll.u32 %v2952_v20, 16  ;;  %v2953_v57 = vpack.c.b16 %v2923_v47, %v4888_v13 }
  0xed   : > { %1238 = vrot.lane.b32.xlu2 %v4485_v28, %s4604_s20  ;;  %v2980_v25 = vshll.u32 %v2953_v57, 16 }
  0xf2   : > { %1195 = vrot.lane.b32.xlu1 %v4483_v15, %s4603_s19  ;;  %2590 = vrot.lane.b32.xlu0 %v4300_v26, %s4603_s19  ;;  %v510_v15 = vadd.f32 %v4728_v38, %v509_v9  ;;  %v511_v26 = vpop.f32.mrf.mxu3  ;;  %v2977_v9 = vshrl.u32 %v2953_v57, 16 }
  0xf3   : > { %v512_v31 = vadd.f32 %v4728_v38, %v511_v26 }
  0xf4   : > { %v556_v12 = vmax.f32 %v510_v15, 0.0 }
  0xf5   : > { %1881 = vrot.lane.b32.xlu2 %v4390_v27, %s4603_s19  ;;  %v644_v27 = vadd.s32 32, %v4848_v41  ;;  %v557_v37 = vmax.f32 %v512_v31, 0.0 }
  0xf6   : > { %v597_v22 = vpack.c.bf16 %v556_v12, %v556_v12 }
  0xf7   : > { %v704_v40 = vand.u32 15, %v644_v27  ;;  %v598_v45 = vpack.c.bf16 %v557_v37, %v557_v37  ;;  %v4476_v27 = vld [vmem:[#allocation2 + $0x4] sm:$0xf0]  }
  0xf8   : > { %629 = vst.msk [vmem:[#allocation2 + $0x68] sm:$0xf] %vm566_vm1, %v597_v22  ;;  %v646_v22 = vadd.s32 48, %v4848_v41  ;;  %v4407_v47 = vor.u32 %v4476_v27, %v4406_v24 }
  0xf9   : > { %vm4924_vm13 = vcmp.ge.s32.totalorder %v704_v40, 1  ;;  %630 = vst.msk [vmem:[#allocation2 + $0x6c] sm:$0xf] %vm566_vm1, %v598_v45 }
  0xfa   : > { %2632 = vrot.lane.b32.xlu1 %v4301_v42, %s4604_s20  ;;  %1914 = vrot.lane.b32.xlu0 %v4391_v44, %s4604_s20  ;;  %v514_v54 = vpop.f32.mrf.mxu3  ;;  %vm1468_vm14 = vmpackc.low %vm4924_vm13, %vm4924_vm13 }
  0xfb   : > { %v515_v56 = vadd.f32 %v4728_v38, %v514_v54  ;;  %v1500_v4 = vsel %vm1468_vm14, 65537, %v4602_v34 }
  0xfc   : > { %v1532_v17 = vunpack.c.l.b16 %v1500_v4 }
  0xfd   : > { %1240 = vrot.lane.b32.xlu2 %v4487_v49, %s4604_s20 }
  0xfe   : > { %v1562_v37 = vpack.c.b16 %v4888_v13, %v1532_v17 }
  0xff   : > { %v4901_v19 = vpop.permute.xlu2 %2582 }
 0x100   : > { %v2660_v45 = vsel %vm1264_vm15, %v4295_v23, %v4901_v19  ;;  %v1595_v54 = vshrl.u32 %v1562_v37, 16  ;;  %v1598_v60 = vshll.u32 %v1562_v37, 16 }
 0x102   : > { %1197 = vrot.lane.b32.xlu1 %v4485_v28, %s4603_s19  ;;  %2592 = vrot.lane.b32.xlu0 %v4301_v42, %s4603_s19  ;;  %v2970_v28 = vshrl.u32 %v2952_v20, 16  ;;  %v1584_v20 = vor.u32 %v1583_v2, %v1580_v1  ;;  %v516_v26 = vpop.f32.mrf.mxu3  ;;  %v5035_v2 = vld [vmem:[#allocation2 + $0x8] sm:$0xff]   ;;  %v1600_v23 = vrot.slane %v1598_v60, 5 }
 0x103   : > { %v517_v29 = vadd.f32 %v4728_v38, %v516_v26  ;;  %v4317_v26 = vunpack.c.h.b16 %v5035_v2 }
 0x104   : > { %v4918_v42 = vrot.slane %v2970_v28, 7  ;;  %v4960_v28 = vrot.slane %v2977_v9, 7  ;;  %v1721_v40 = vunpack.c.h.b16 %v1584_v20 }
 0x105   : > { %1883 = vrot.lane.b32.xlu2 %v4391_v44, %s4603_s19  ;;  %v596_v44 = vpack.c.bf16 %v555_v36, %v555_v36 }
 0x106   : > { %v2975_v55 = vor.u32 %v2973_v39, %v4918_v42  ;;  %v1720_v39 = vunpack.c.l.b16 %v1584_v20  ;;  %vm5011_vm12 = vcmp.ne.s32.totalorder %v1721_v40, %v4949_v6 }
 0x107   : > { %628 = vst.msk [vmem:[#allocation2 + $0x64] sm:$0xf] %vm566_vm1, %v596_v44  ;;  %v559_v44 = vmax.f32 %v517_v29, 0.0 }
 0x108   : > { %v3096_v7 = vunpack.c.l.b16 %v2975_v55  ;;  %v3097_v14 = vunpack.c.h.b16 %v2975_v55  ;;  %v647_v55 = vadd.s32 56, %v4848_v41  ;;  %vm5006_vm11 = vcmp.ne.s32.totalorder %v1720_v39, %v4946_v5 }
 0x109   : > { %v600_v50 = vpack.c.bf16 %v559_v44, %v559_v44  ;;  %vm1726_vm14 = vmpackc.low %vm5011_vm12, %vm5006_vm11 }
 0x10a   : > { %2634 = vrot.lane.b32.xlu1 %v4302_v3, %s4604_s20  ;;  %1916 = vrot.lane.b32.xlu0 %v4392_v8, %s4604_s20  ;;  %vm4968_vm4 = vcmp.ne.s32.totalorder %v3096_v7, %v4946_v5  ;;  %vm4973_vm5 = vcmp.ne.s32.totalorder %v3097_v14, %v4949_v6  ;;  %v519_v1 = vpop.f32.mrf.mxu3  ;;  %v725_v17 = vand.u32 15, %v647_v55 }
 0x10b   : > { %vm3102_vm8 = vmpackc.low %vm4973_vm5, %vm4968_vm4  ;;  %632 = vst.msk [vmem:[#allocation2 + $0x74] sm:$0xf] %vm566_vm1, %v600_v50 }
 0x10c   : > { %vm5071_vm5 = vcmp.le.s32.totalorder %v725_v17, 14 }
 0x10d   : > { %1242 = vrot.lane.b32.xlu2 %v4894_v16, %s4604_s20 }
 0x10f   : > { %v4920_v43 = vpop.permute.xlu2 %2624 }
 0x112   : > { %1199 = vrot.lane.b32.xlu1 %v4487_v49, %s4603_s19  ;;  %2594 = vrot.lane.b32.xlu0 %v4302_v3, %s4603_s19  ;;  %v1561_v49 = vpack.c.b16 %v4888_v13, %v1530_v32  ;;  %v558_v3 = vmax.f32 %v515_v56, 0.0  ;;  %v718_v32 = vand.u32 15, %v646_v22  ;;  %v5046_v22 = vld [vmem:[#allocation2 + $0x54] sm:$0xff]  }
 0x114   : > { %v1586_v62 = vshrl.u32 %v1561_v49, 16  ;;  %v1589_v63 = vshll.u32 %v1561_v49, 16  ;;  %v2982_v49 = vor.u32 %v2980_v25, %v4960_v28  ;;  %vm4994_vm9 = vcmp.ge.s32.totalorder %v718_v32, 1 }
 0x115   : > { %1885 = vrot.lane.b32.xlu2 %v4392_v8, %s4603_s19  ;;  %v599_v8 = vpack.c.bf16 %v558_v3, %v558_v3  ;;  %vm1470_vm13 = vmpackc.low %vm4994_vm9, %vm4994_vm9 }
 0x116   : > { %v1588_v15 = vrot.slane %v1586_v62, 4  ;;  %v1591_v12 = vrot.slane %v1589_v63, 5  ;;  %v2893_v62 = vsel %vm2861_vm7, 65537, %v4602_v34  ;;  %v2983_v7 = vsel %vm2968_vm10, %v4918_v42, %v2982_v49  ;;  %vm2863_vm9 = vmpackc.low %vm5071_vm5, %vm5071_vm5 }
 0x117   : > { %v4953_v18 = vpop.permute.xlu2 %1875  ;;  %631 = vst.msk [vmem:[#allocation2 + $0x70] sm:$0xf] %vm566_vm1, %v599_v8  ;;  %v520_v8 = vadd.f32 %v4728_v38, %v519_v1  ;;  %v1502_v24 = vsel %vm1470_vm13, 65537, %v4602_v34  ;;  %v3103_v33 = vunpack.c.l.b16 %v2983_v7  ;;  %v3104_v40 = vunpack.c.h.b16 %v2983_v7 }
 0x118   : > { %v4977_v36 = vor.u32 %v1591_v12, %v1588_v15  ;;  %v1597_v15 = vrot.slane %v1595_v54, 4  ;;  %v2925_v12 = vunpack.c.l.b16 %v2893_v62  ;;  %v648_v49 = vadd.s32 64, %v4848_v41 }
 0x119   : > { %v560_v42 = vmax.f32 %v520_v8, 0.0  ;;  %vm5098_vm11 = vcmp.ne.s32.totalorder %v3103_v33, %v4946_v5  ;;  %vm5106_vm12 = vcmp.ne.s32.totalorder %v3104_v40, %v4949_v6  ;;  %v2895_v7 = vsel %vm2863_vm9, 65537, %v4602_v34 }
 0x11a   : > { %2636 = vrot.lane.b32.xlu1 %v4303_v48, %s4604_s20  ;;  %1918 = vrot.lane.b32.xlu0 %v4928_v51, %s4604_s20  ;;  %v1593_v53 = vsel %vm1576_vm6, %v1584_v20, %v4977_v36  ;;  %v5077_v44 = vor.u32 %v1600_v23, %v1597_v15  ;;  %v732_v8 = vand.u32 15, %v648_v49  ;;  %vm2028_vm13 = vcmask 97280  }
 0x11b   : > { %v1727_v3 = vunpack.c.l.b16 %v1593_v53  ;;  %v1728_v4 = vunpack.c.h.b16 %v1593_v53  ;;  %v601_v32 = vpack.c.bf16 %v560_v42, %v560_v42  ;;  %v1942_v42 = vsel %vm1264_vm15, %v5035_v2, %v4953_v18 }
 0x11c   : > { %v1188_v35 = vpop.permute.xlu0 %1187  ;;  %v5113_v62 = vsel %vm1576_vm6, %v4977_v36, %v5077_v44  ;;  %v4305_v36 = vld [vmem:[#allocation2 + $0x58] sm:$0xff]  ;;  %v2927_v31 = vunpack.c.l.b16 %v2895_v7  ;;  %v649_v2 = vadd.s32 72, %v4848_v41  ;;  %vm3235_vm5 = vsmask.f32 7424 }
 0x11d   : > { %1244 = vrot.lane.b32.xlu2 %v4942_v0, %s4604_s20  ;;  %v1267_v9 = vsel %vm1264_vm15, %v4407_v47, %v1188_v35  ;;  %vm5059_vm3 = vcmp.ne.s32.totalorder %v1727_v3, %v4946_v5  ;;  %vm5064_vm4 = vcmp.ne.s32.totalorder %v1728_v4, %v4949_v6  ;;  %v1534_v35 = vunpack.c.l.b16 %v1502_v24  ;;  %633 = vst.msk [vmem:[#allocation2 + $0x78] sm:$0xf] %vm566_vm1, %v601_v32 }
 0x11e   : > { %v1162_v47 = vpack.c.b16 %v4320_v61, %v4317_v26  ;;  %vm1733_vm7 = vmpackc.low %vm5064_vm4, %vm5059_vm3 }
 0x11f   : > { %vm3109_vm3 = vmpackc.low %vm5106_vm12, %vm5098_vm11 }
 0x122   : > { %1201 = vrot.lane.b32.xlu1 %v4894_v16, %s4603_s19  ;;  %2596 = vrot.lane.b32.xlu0 %v4303_v48, %s4603_s19  ;;  %v2710_v48 = vsel %vm1316_vm2, %v2660_v45, %v4920_v43  ;;  %v5003_v43 = vld [vmem:[#allocation2 + $0x48] sm:$0xff]   ;;  %v5069_v16 = vpack.c.b16 %v2925_v12, %v4888_v13 }
 0x123   : > { %v5027_v63 = vsel %vm3102_vm8, %v2710_v48, 0  ;;  %v521_v48 = vpop.f32.mrf.mxu3  ;;  %vm2154_vm8 = vsmask.f32 4352 }
 0x124   : > { %v3239_v25 = vshll.u32 %v5027_v63, 16  ;;  %v522_v53 = vadd.f32 %v4728_v38, %v521_v48  ;;  %v2985_v55 = vshrl.u32 %v5069_v16, 16  ;;  %v2988_v17 = vshll.u32 %v5069_v16, 16 }
 0x125   : > { %1887 = vrot.lane.b32.xlu2 %v4928_v51, %s4603_s19  ;;  %v1563_v51 = vpack.c.b16 %v4888_v13, %v1534_v35  ;;  %v1735_v16 = vunpack.c.h.b16 %v5113_v62 }
 0x126   : > { %v5090_v50 = vrot.slane %v3239_v25, 1  ;;  %v561_v1 = vmax.f32 %v522_v53, 0.0  ;;  %v5123_v12 = vrot.slane %v2985_v55, 7 }
 0x127   : > { %v5001_v56 = vpop.permute.xlu2 %1234  ;;  %v1607_v23 = vshll.u32 %v1563_v51, 16  ;;  %vm5191_vm9 = vcmp.ne.s32.totalorder %v1735_v16, %v4949_v6 }
 0x128   : > { %v602_v15 = vpack.c.bf16 %v561_v1, %v561_v1 }
 0x129   : > { %v1609_v49 = vrot.slane %v1607_v23, 5 }
 0x12a   : > { %2638 = vrot.lane.b32.xlu1 %v4304_v52, %s4604_s20  ;;  %1920 = vrot.lane.b32.xlu0 %v5003_v43, %s4604_s20  ;;  %634 = vst.msk [vmem:[#allocation2 + $0x7c] sm:$0xf] %vm566_vm1, %v602_v15 }
 0x12b   : > { %v524_v29 = vpop.f32.mrf.mxu3 }
 0x12c   : > { %v1231_v10 = vpop.permute.xlu1 %1230  ;;  %v1190_v14 = vpop.permute.xlu0 %1189  ;;  %v525_v35 = vadd.f32 %v4728_v38, %v524_v29 }
 0x12d   : > { %v1318_v20 = vsel %vm1316_vm2, %v1267_v9, %v1231_v10  ;;  %1246 = vrot.lane.b32.xlu2 %v5046_v22, %s4604_s20  ;;  %v1270_v61 = vsel %vm1264_vm15, %v1162_v47, %v1190_v14  ;;  %v2990_v47 = vor.u32 %v2988_v17, %v5123_v12 }
 0x12e   : > { %v1839_v27 = vsel %vm1726_vm14, %v1318_v20, 0  ;;  %v1604_v20 = vshrl.u32 %v1563_v51, 16  ;;  %vm5138_vm14 = vcmp.ge.s32.totalorder %v732_v8, 1  ;;  %v562_v55 = vmax.f32 %v525_v35, 0.0 }
 0x12f   : > { %v5075_v39 = vpop.permute.xlu2 %1877  ;;  %v2156_v45 = vshrl.u32 %v1839_v27, 16  ;;  %v2159_v19 = vshll.u32 %v1839_v27, 16  ;;  %v5131_v27 = vld [vmem:[#allocation2 + $0x50] sm:$0xff]   ;;  %vm1472_vm4 = vmpackc.low %vm5138_vm14, %vm5138_vm14  ;;  %v2955_v51 = vpack.c.b16 %v2927_v31, %v4888_v13  ;;  %v2991_v54 = vsel %vm2968_vm10, %v4960_v28, %v2990_v47 }
 0x130   : > { %v1606_v48 = vrot.slane %v1604_v20, 4  ;;  %v1504_v1 = vsel %vm1472_vm4, 65537, %v4602_v34  ;;  %v3110_v17 = vunpack.c.l.b16 %v2991_v54 }
 0x131   : > { %v2158_v3 = vrot.slane %v2156_v45, 3  ;;  %v2161_v9 = vrot.slane %v2159_v19, 4  ;;  %v2993_v28 = vshrl.u32 %v2955_v51, 16  ;;  %v1536_v23 = vunpack.c.l.b16 %v1504_v1 }
 0x132   : > { %1203 = vrot.lane.b32.xlu1 %v4942_v0, %s4603_s19  ;;  %2598 = vrot.lane.b32.xlu0 %v4304_v52, %s4603_s19  ;;  %v2996_v18 = vshll.u32 %v2955_v51, 16  ;;  %v1945_v51 = vsel %vm1264_vm15, %v4742_v59, %v5075_v39 }
 0x133   : > { %v2162_v32 = vor.u32 %v2161_v9, %v2158_v3  ;;  %v526_v9 = vpop.f32.mrf.mxu3  ;;  %v5226_v31 = vrot.slane %v2993_v28, 7  ;;  %v1564_v16 = vpack.c.b16 %v4888_v13, %v1536_v23 }
 0x134   : > { %v1233_v0 = vpop.permute.xlu1 %1232  ;;  %v2585_v52 = vpop.permute.xlu0 %2584  ;;  %v527_v20 = vadd.f32 %v4728_v38, %v526_v9  ;;  %v5271_v9 = vld [vmem:[#allocation2 + $0x64] sm:$0xff]  }
 0x135   : > { %v1321_v57 = vsel %vm1316_vm2, %v1270_v61, %v1233_v0  ;;  %1889 = vrot.lane.b32.xlu2 %v5003_v43, %s4603_s19  ;;  %v1734_v43 = vunpack.c.l.b16 %v5113_v62  ;;  %v2663_v37 = vsel %vm1264_vm15, %v4740_v58, %v2585_v52  ;;  %v5158_v0 = vld [vmem:[#allocation2 + $0x5c] sm:$0xff]   ;;  %v3237_v58 = vshrl.u32 %v5027_v63, 16 }
 0x136   : > { %v1840_v4 = vsel %vm1733_vm7, %v1321_v57, 0  ;;  %v739_v57 = vand.u32 15, %v649_v2  ;;  %v603_v63 = vpack.c.bf16 %v562_v55, %v562_v55  ;;  %v1616_v8 = vshll.u32 %v1564_v16, 16 }
 0x137   : > { %v2164_v10 = vshrl.u32 %v1840_v4, 16  ;;  %v2167_v14 = vshll.u32 %v1840_v4, 16  ;;  %v5129_v26 = vpop.permute.xlu2 %1236  ;;  %v3242_v60 = vor.u32 %v5090_v50, %v3237_v58  ;;  %vm5186_vm7 = vcmp.ne.s32.totalorder %v1734_v43, %v4946_v5 }
 0x138   : > { %v5195_v50 = vor.u32 %v1609_v49, %v1606_v48  ;;  %635 = vst.msk [vmem:[#allocation2 + $0x80] sm:$0xf] %vm566_vm1, %v603_v63  ;;  %vm5201_vm11 = vcmp.le.s32.totalorder %v739_v57, 14  ;;  %vm1740_vm12 = vmpackc.low %vm5191_vm9, %vm5186_vm7  ;;  %v563_v43 = vmax.f32 %v527_v20, 0.0  ;;  %v651_v49 = vadd.s32 88, %v4848_v41 }
 0x139   : > { %v2166_v24 = vrot.slane %v2164_v10, 3  ;;  %v2169_v25 = vrot.slane %v2167_v14, 4  ;;  %v650_v14 = vadd.s32 80, %v4848_v41  ;;  %vm2865_vm14 = vmpackc.low %vm5201_vm11, %vm5201_vm11  ;;  %v1613_v57 = vshrl.u32 %v1564_v16, 16 }
 0x13a   : > { %2640 = vrot.lane.b32.xlu1 %v4305_v36, %s4604_s20  ;;  %1922 = vrot.lane.b32.xlu0 %v5131_v27, %s4604_s20  ;;  %v753_v28 = vand.u32 15, %v651_v49 }
 0x13b   : > { %v5143_v33 = vor.u32 %v2169_v25, %v2166_v24  ;;  %v5219_v25 = vsel %vm1576_vm6, %v5077_v44, %v5195_v50  ;;  %v746_v2 = vand.u32 15, %v650_v14  ;;  %v604_v44 = vpack.c.bf16 %v563_v43, %v563_v43  ;;  %v529_v55 = vpop.f32.mrf.mxu3 }
 0x13c   : > { %v2627_v40 = vpop.permute.xlu1 %2626  ;;  %v1909_v45 = vpop.permute.xlu0 %1908  ;;  %v1741_v48 = vunpack.c.l.b16 %v5219_v25  ;;  %v1742_v10 = vunpack.c.h.b16 %v5219_v25 }
 0x13d   : > { %v2713_v19 = vsel %vm1316_vm2, %v2663_v37, %v2627_v40  ;;  %v1989_v53 = vsel %vm1316_vm2, %v1942_v42, %v1909_v45  ;;  %v2171_v61 = vsel %vm2154_vm8, %v2162_v32, %v5143_v33  ;;  %1248 = vrot.lane.b32.xlu2 %v5158_v0, %s4604_s20  ;;  %v3111_v42 = vunpack.c.h.b16 %v2991_v54  ;;  %v4306_v40 = vld [vmem:[#allocation2 + $0x60] sm:$0xff]  ;;  %636 = vst.msk [vmem:[#allocation2 + $0x84] sm:$0xf] %vm566_vm1, %v604_v44 }
 0x13e   : > { %v5169_v52 = vsel %vm3109_vm3, %v2713_v19, 0  ;;  %4138 = vmatmul.msk.bf16.vlgmr.msrb.gmra.mxu1 %vm2028_vm13, %v1989_v53  ;;  %4158 = vmatmul.msk.bf16.vlgmr.msrb.gmra.mxu2 %vm2028_vm13, %v2171_v61  ;;  %vm5231_vm3 = vcmp.ne.s32.totalorder %v3110_v17, %v4946_v5  ;;  %v2897_v45 = vsel %vm2865_vm14, 65537, %v4602_v34  ;;  %v2998_v61 = vor.u32 %v2996_v18, %v5226_v31  ;;  %v4522_v44 = vld [vmem:[%s7043_s2] ss:$0 sm:$0xff] }
 0x13f   : > { %v3244_v62 = vshll.u32 %v5169_v52, 16  ;;  %v5183_v4 = vpop.permute.xlu2 %1879  ;;  %vm5237_vm4 = vcmp.ne.s32.totalorder %v3111_v42, %v4949_v6  ;;  %vm5253_vm7 = vcmp.ge.s32.totalorder %v746_v2, 1  ;;  %v2929_v63 = vunpack.c.l.b16 %v2897_v45 }
 0x140   : > { %vm3116_vm9 = vmpackc.low %vm5237_vm4, %vm5231_vm3  ;;  %v2999_v17 = vsel %vm2968_vm10, %v5123_v12, %v2998_v61  ;;  %v3248_v20 = vshrl.u32 %v5169_v52, 16  ;;  %v1618_v42 = vrot.slane %v1616_v8, 5  ;;  %vm5302_vm14 = vcmp.le.s32.totalorder %v753_v28, 14  ;;  %v5361_v8 = vld [vmem:[#allocation2 + $0x60] sm:$0xff]  }
 0x141   : > { %v5181_v3 = vrot.slane %v3244_v62, 1  ;;  %v530_v62 = vadd.f32 %v4728_v38, %v529_v55  ;;  %vm1474_vm11 = vmpackc.low %vm5253_vm7, %vm5253_vm7  ;;  %vm5312_vm3 = vcmp.ne.s32.totalorder %v1742_v10, %v4949_v6  ;;  %v3117_v18 = vunpack.c.l.b16 %v2999_v17  ;;  %v4523_v10 = vld [vmem:[#allocation2 + $0x18] sm:$0xff]  }
 0x142   : > { %1205 = vrot.lane.b32.xlu1 %v5046_v22, %s4603_s19  ;;  %2600 = vrot.lane.b32.xlu0 %v4305_v36, %s4603_s19  ;;  %v3118_v2 = vunpack.c.h.b16 %v2999_v17  ;;  %vm2867_vm4 = vmpackc.low %vm5302_vm14, %vm5302_vm14 }
 0x143   : > { %v3247_v15 = vsel %vm3235_vm5, %v3242_v60, %v5181_v3  ;;  %v564_v14 = vmax.f32 %v530_v62, 0.0  ;;  %v3250_v12 = vor.u32 %v3248_v20, %v5181_v3  ;;  %v2899_v55 = vsel %vm2867_vm4, 65537, %v4602_v34 }
 0x144   : > { %v1192_v22 = vpop.permute.xlu1 %1191  ;;  %4252 = vmatmul.msk.bf16.vlgmr.msrb.gmra.mxu3 %vm2028_vm13, %v3247_v15  ;;  %v2587_v36 = vpop.permute.xlu0 %2586 }
 0x145   : > { %v1273_v24 = vsel %vm1264_vm15, %v4769_v21, %v1192_v22  ;;  %1891 = vrot.lane.b32.xlu2 %v5131_v27, %s4603_s19  ;;  %v5244_v27 = vld [vmem:[#allocation2 + $0x58] sm:$0xff]   ;;  %v2666_v60 = vsel %vm1264_vm15, %v4757_v11, %v2587_v36  ;;  %v605_v22 = vpack.c.bf16 %v564_v14, %v564_v14  ;;  %v1615_v36 = vrot.slane %v1613_v57, 4 }
 0x146   : > { %v1324_v29 = vsel %vm1316_vm2, %v1273_v24, %v5001_v56  ;;  %v1506_v24 = vsel %vm1474_vm11, 65537, %v4602_v34  ;;  %v652_v56 = vadd.s32 96, %v4848_v41  ;;  %vm5346_vm11 = vcmp.ne.s32.totalorder %v3118_v2, %v4949_v6 }
 0x147   : > { %v1841_v32 = vsel %vm1740_vm12, %v1324_v29, 0  ;;  %v5242_v47 = vpop.permute.xlu2 %1238  ;;  %vm5289_vm12 = vcmp.ne.s32.totalorder %v1741_v48, %v4946_v5  ;;  %637 = vst.msk [vmem:[#allocation2 + $0x88] sm:$0xf] %vm566_vm1, %v605_v22  ;;  %v654_v48 = vadd.s32 112, %v4848_v41 }
 0x148   : > { %v2173_v35 = vshrl.u32 %v1841_v32, 16  ;;  %v2176_v37 = vshll.u32 %v1841_v32, 16  ;;  %v531_v32 = vpop.f32.mrf.mxu3  ;;  %vm1747_vm7 = vmpackc.low %vm5312_vm3, %vm5289_vm12 }
 0x149   : > { %v532_v16 = vadd.f32 %v4522_v44, %v531_v32 }
 0x14a   : > { %v2175_v19 = vrot.slane %v2173_v35, 3  ;;  %v2178_v53 = vrot.slane %v2176_v37, 4  ;;  %2642 = vrot.lane.b32.xlu1 %v4306_v40, %s4604_s20  ;;  %1924 = vrot.lane.b32.xlu0 %v5244_v27, %s4604_s20  ;;  %v1538_v35 = vunpack.c.l.b16 %v1506_v24  ;;  %v5385_v24 = vld [vmem:[#allocation2 + $0x6c] sm:$0xff]  }
 0x14b   : > { %v565_v49 = vmax.f32 %v532_v16, 0.0 }
 0x14c   : > { %v2629_v54 = vpop.permute.xlu1 %2628  ;;  %v1911_v1 = vpop.permute.xlu0 %1910  ;;  %v5267_v7 = vor.u32 %v2178_v53, %v2175_v19  ;;  %v1565_v57 = vpack.c.b16 %v4888_v13, %v1538_v35 }
 0x14d   : > { %v2716_v59 = vsel %vm1316_vm2, %v2666_v60, %v2629_v54  ;;  %v1991_v39 = vsel %vm1316_vm2, %v1945_v51, %v1911_v1  ;;  %1250 = vrot.lane.b32.xlu2 %v5271_v9, %s4604_s20  ;;  %v606_v51 = vpack.c.bf16 %v565_v49, %v565_v49  ;;  %v760_v54 = vand.u32 15, %v652_v56 }
 0x14e   : > { %v5282_v38 = vsel %vm3116_vm9, %v2716_v59, 0  ;;  %4139 = vmatmul.msk.bf16.gmra.mxu1 %vm2028_vm13, %v1991_v39  ;;  %v2180_v11 = vsel %vm2154_vm8, %v5143_v33, %v5267_v7  ;;  %v2956_v33 = vpack.c.b16 %v2929_v63, %v4888_v13  ;;  %vm5339_vm9 = vcmp.ne.s32.totalorder %v3117_v18, %v4946_v5 }
 0x14f   : > { %v3252_v23 = vshll.u32 %v5282_v38, 16  ;;  %4159 = vmatmul.msk.bf16.gmra.mxu2 %vm2028_vm13, %v2180_v11  ;;  %v5309_v43 = vpop.permute.xlu2 %1881  ;;  %638 = vst.msk [vmem:[#allocation2 + $0x8c] sm:$0xf] %vm566_vm1, %v606_v51  ;;  %v653_v39 = vadd.s32 104, %v4848_v41  ;;  %vm3123_vm12 = vmpackc.low %vm5346_vm11, %vm5339_vm9  ;;  %v1622_v15 = vshrl.u32 %v1565_v57, 16  ;;  %vm5379_vm1 = vcmp.ge.s32.totalorder %v760_v54, 1 }
 0x150   : > { %v3001_v21 = vshrl.u32 %v2956_v33, 16  ;;  %v3004_v61 = vshll.u32 %v2956_v33, 16  ;;  %v1625_v33 = vshll.u32 %v1565_v57, 16  ;;  %v3256_v2 = vshrl.u32 %v5282_v38, 16  ;;  %vm1476_vm14 = vmpackc.low %vm5379_vm1, %vm5379_vm1 }
 0x151   : > { %v5307_v52 = vrot.slane %v3252_v23, 1  ;;  %v767_v18 = vand.u32 15, %v653_v39  ;;  %v1624_v38 = vrot.slane %v1622_v15, 4 }
 0x152   : > { %1207 = vrot.lane.b32.xlu1 %v5158_v0, %s4603_s19  ;;  %2602 = vrot.lane.b32.xlu0 %v4306_v40, %s4603_s19  ;;  %v5333_v40 = vor.u32 %v1618_v42, %v1615_v36 }
 0x153   : > { %v3255_v3 = vsel %vm3235_vm5, %v3250_v12, %v5307_v52  ;;  %v3258_v44 = vor.u32 %v3256_v2, %v5307_v52 }
 0x154   : > { %v1194_v0 = vpop.permute.xlu1 %1193  ;;  %4253 = vmatmul.msk.bf16.gmra.mxu3 %vm2028_vm13, %v3255_v3  ;;  %v2589_v37 = vpop.permute.xlu0 %2588  ;;  %v1620_v60 = vsel %vm1576_vm6, %v5195_v50, %v5333_v40  ;;  %v1948_v50 = vsel %vm1264_vm15, %v4523_v10, %v5183_v4  ;;  %v5460_v10 = vld [vmem:[#allocation2 + $0x68] sm:$0xff]  }
 0x155   : > { %v1276_v45 = vsel %vm1264_vm15, %v4780_v30, %v1194_v0  ;;  %1893 = vrot.lane.b32.xlu2 %v5244_v27, %s4603_s19  ;;  %v5353_v30 = vrot.slane %v3001_v21, 7  ;;  %v2931_v27 = vunpack.c.l.b16 %v2899_v55  ;;  %v1748_v14 = vunpack.c.l.b16 %v1620_v60 }
 0x156   : > { %v1327_v19 = vsel %vm1316_vm2, %v1276_v45, %v5129_v26  ;;  %v4307_v26 = vld [vmem:[#allocation2 + $0x68] sm:$0xff]  ;;  %v2669_v17 = vsel %vm1264_vm15, %v4793_v46, %v2589_v37  ;;  %v1749_v25 = vunpack.c.h.b16 %v1620_v60  ;;  %v1627_v21 = vrot.slane %v1625_v33, 5 }
 0x157   : > { %v1842_v58 = vsel %vm1747_vm7, %v1327_v19, 0  ;;  %v5359_v1 = vpop.permute.xlu2 %1240  ;;  %v3006_v11 = vor.u32 %v3004_v61, %v5353_v30  ;;  %v2957_v12 = vpack.c.b16 %v2931_v27, %v4888_v13  ;;  %vm5403_vm3 = vcmp.ne.s32.totalorder %v1748_v14, %v4946_v5  ;;  %v4524_v61 = vld [vmem:[#allocation2 + $0x24] sm:$0xff]  }
 0x158   : > { %v2182_v62 = vshrl.u32 %v1842_v58, 16  ;;  %v2185_v63 = vshll.u32 %v1842_v58, 16  ;;  %vm5415_vm4 = vcmp.ne.s32.totalorder %v1749_v25, %v4949_v6  ;;  %vm5423_vm7 = vcmp.le.s32.totalorder %v767_v18, 14 }
 0x159   : > { %v3009_v37 = vshrl.u32 %v2957_v12, 16  ;;  %vm1754_vm9 = vmpackc.low %vm5415_vm4, %vm5403_vm3  ;;  %v5435_v53 = vor.u32 %v1627_v21, %v1624_v38  ;;  %v3012_v51 = vshll.u32 %v2957_v12, 16  ;;  %vm3682_vm3 = vcmask 1041408  }
 0x15a   : > { %v2184_v28 = vrot.slane %v2182_v62, 3  ;;  %v2187_v59 = vrot.slane %v2185_v63, 4  ;;  %2644 = vrot.lane.b32.xlu1 %v4307_v26, %s4604_s20  ;;  %1926 = vrot.lane.b32.xlu0 %v5361_v8, %s4604_s20  ;;  %vm2869_vm11 = vmpackc.low %vm5423_vm7, %vm5423_vm7  ;;  %v774_v63 = vand.u32 15, %v654_v48  ;;  %v656_v60 = vadd.s32 128, %v4848_v41 }
 0x15b   : > { %v5438_v58 = vrot.slane %v3009_v37, 7 }
 0x15c   : > { %v2631_v20 = vpop.permute.xlu1 %2630  ;;  %v1913_v23 = vpop.permute.xlu0 %1912  ;;  %v5377_v22 = vor.u32 %v2187_v59, %v2184_v28  ;;  %v4308_v28 = vld [vmem:[#allocation2 + $0x70] sm:$0xff]  ;;  %v5649_v59 = vld [vmem:[#allocation2 + $0x88] sm:$0xff]  }
 0x15d   : > { %v2719_v4 = vsel %vm1316_vm2, %v2669_v17, %v2631_v20  ;;  %v1993_v42 = vsel %vm1316_vm2, %v1948_v50, %v1913_v23  ;;  %1252 = vrot.lane.b32.xlu2 %v5385_v24, %s4604_s20  ;;  %v3014_v50 = vor.u32 %v3012_v51, %v5438_v58  ;;  %v3629_v20 = vld [vmem:[%s7046_s5] sm:$0x3] }
 0x15e   : > { %v5388_v29 = vsel %vm3123_vm12, %v2719_v4, 0  ;;  %4140 = vmatmul.msk.bf16.gmra.mxu1 %vm2028_vm13, %v1993_v42  ;;  %v2189_v46 = vsel %vm2154_vm8, %v5267_v7, %v5377_v22  ;;  %v3007_v7 = vsel %vm2968_vm10, %v5226_v31, %v3006_v11  ;;  %v1508_v31 = vsel %vm1476_vm14, 65537, %v4602_v34  ;;  %v4525_v23 = vld [vmem:[#allocation2 + $0x20] sm:$0xff]   ;;  %v4526_v42 = vld [vmem:[#allocation2 + $0x28] sm:$0xff] }
 0x15f   : > { %v3260_v32 = vshll.u32 %v5388_v29, 16  ;;  %4160 = vmatmul.msk.bf16.gmra.mxu2 %vm2028_vm13, %v2189_v46  ;;  %v5412_v35 = vpop.permute.xlu2 %1883  ;;  %v3124_v45 = vunpack.c.l.b16 %v3007_v7  ;;  %v3125_v19 = vunpack.c.h.b16 %v3007_v7  ;;  %v1540_v57 = vunpack.c.l.b16 %v1508_v31  ;;  %v5489_v7 = vld [vmem:[#allocation2 + $0x74] sm:$0xff]  }
 0x160   : > { %vm5467_vm14 = vcmp.ge.s32.totalorder %v774_v63, 1  ;;  %v1951_v33 = vsel %vm1264_vm15, %v4525_v23, %v5309_v43  ;;  %v3684_v36 = vsel %vm3682_vm3, %v3629_v20, 0  ;;  %v3015_v38 = vsel %vm2968_vm10, %v5353_v30, %v3014_v50  ;;  %v4309_v20 = vld [vmem:[#allocation2 + $0x78] sm:$0xff] }
 0x161   : > { %v5410_v16 = vrot.slane %v3260_v32, 1  ;;  %vm5448_vm12 = vcmp.ne.s32.totalorder %v3124_v45, %v4946_v5  ;;  %vm5453_vm1 = vcmp.ne.s32.totalorder %v3125_v19, %v4949_v6  ;;  %v1566_v14 = vpack.c.b16 %v4888_v13, %v1540_v57  ;;  %3693 = vmatpush.bf16.msrb.mxu0 %v3684_v36  ;;  %vm1478_vm7 = vmpackc.low %vm5467_vm14, %vm5467_vm14  ;;  %v5570_v36 = vld [vmem:[#allocation2 + $0x70] sm:$0xff]  }
 0x162   : > { %1209 = vrot.lane.b32.xlu1 %v5271_v9, %s4603_s19  ;;  %2604 = vrot.lane.b32.xlu0 %v4307_v26, %s4603_s19  ;;  %vm3130_vm4 = vmpackc.low %vm5453_vm1, %vm5448_vm12  ;;  %v3264_v31 = vshrl.u32 %v5388_v29, 16  ;;  %v3131_v19 = vunpack.c.l.b16 %v3015_v38  ;;  %v788_v23 = vand.u32 15, %v656_v60  ;;  %v658_v60 = vadd.s32 144, %v4848_v41 }
 0x163   : > { %v3263_v52 = vsel %vm3235_vm5, %v3258_v44, %v5410_v16  ;;  %v1631_v21 = vshrl.u32 %v1566_v14, 16  ;;  %v1634_v37 = vshll.u32 %v1566_v14, 16 }
 0x164   : > { %v1196_v9 = vpop.permute.xlu1 %1195  ;;  %4254 = vmatmul.msk.bf16.gmra.mxu3 %vm2028_vm13, %v3263_v52  ;;  %v2591_v49 = vpop.permute.xlu0 %2590  ;;  %v3266_v48 = vor.u32 %v3264_v31, %v5410_v16  ;;  %vm5551_vm3 = vcmp.ne.s32.totalorder %v3131_v19, %v4946_v5 }
 0x165   : > { %v1279_v55 = vsel %vm1264_vm15, %v4524_v61, %v1196_v9  ;;  %1895 = vrot.lane.b32.xlu2 %v5361_v8, %s4603_s19  ;;  %v1629_v8 = vsel %vm1576_vm6, %v5333_v40, %v5435_v53  ;;  %v655_v40 = vadd.s32 120, %v4848_v41  ;;  %v2672_v25 = vsel %vm1264_vm15, %v4526_v42, %v2591_v49  ;;  %v4528_v42 = vld [vmem:[#allocation2 + $0x28] sm:$0xff]  }
 0x166   : > { %v1330_v62 = vsel %vm1316_vm2, %v1279_v55, %v5242_v47  ;;  %v2901_v47 = vsel %vm2869_vm11, 65537, %v4602_v34  ;;  %v1755_v2 = vunpack.c.l.b16 %v1629_v8  ;;  %v1756_v32 = vunpack.c.h.b16 %v1629_v8 }
 0x167   : > { %v1843_v26 = vsel %vm1754_vm9, %v1330_v62, 0  ;;  %v5458_v39 = vpop.permute.xlu2 %1242  ;;  %v2933_v4 = vunpack.c.l.b16 %v2901_v47  ;;  %v781_v30 = vand.u32 15, %v655_v40  ;;  %v3132_v61 = vunpack.c.h.b16 %v3015_v38 }
 0x168   : > { %v2191_v54 = vshrl.u32 %v1843_v26, 16  ;;  %v2194_v27 = vshll.u32 %v1843_v26, 16  ;;  %vm5514_vm9 = vcmp.ne.s32.totalorder %v1755_v2, %v4946_v5  ;;  %vm5525_vm11 = vcmp.ne.s32.totalorder %v1756_v32, %v4949_v6 }
 0x169   : > { %v2958_v52 = vpack.c.b16 %v2933_v4, %v4888_v13  ;;  %v1633_v55 = vrot.slane %v1631_v21, 4  ;;  %v1636_v51 = vrot.slane %v1634_v37, 5  ;;  %vm5532_vm12 = vcmp.le.s32.totalorder %v781_v30, 14  ;;  %vm1761_vm1 = vmpackc.low %vm5525_vm11, %vm5514_vm9 }
 0x16a   : > { %v2193_v15 = vrot.slane %v2191_v54, 3  ;;  %v2196_v17 = vrot.slane %v2194_v27, 4  ;;  %2646 = vrot.lane.b32.xlu1 %v4308_v28, %s4604_s20  ;;  %1928 = vrot.lane.b32.xlu0 %v5460_v10, %s4604_s20  ;;  %v4527_v54 = vld [vmem:[#allocation2 + $0x2c] sm:$0xff]   ;;  %vm2871_vm14 = vmpackc.low %vm5532_vm12, %vm5532_vm12  ;;  %v657_v4 = vadd.s32 136, %v4848_v41  ;;  %vm5589_vm9 = vcmp.ge.s32.totalorder %v788_v23, 1 }
 0x16b   : > { %v3017_v62 = vshrl.u32 %v2958_v52, 16  ;;  %v5560_v8 = vor.u32 %v1636_v51, %v1633_v55  ;;  %v3020_v11 = vshll.u32 %v2958_v52, 16  ;;  %v2903_v40 = vsel %vm2871_vm14, 65537, %v4602_v34  ;;  %v5595_v52 = vld [vmem:[#allocation2 + $0x7c] sm:$0xff]   ;;  %vm1480_vm11 = vmpackc.low %vm5589_vm9, %vm5589_vm9 }
 0x16c   : > { %v2633_v12 = vpop.permute.xlu1 %2632  ;;  %v1915_v46 = vpop.permute.xlu0 %1914  ;;  %v5485_v18 = vor.u32 %v2196_v17, %v2193_v15  ;;  %v4380_v23 = vunpack.c.l.b16 %v5649_v59 }
 0x16d   : > { %v2722_v3 = vsel %vm1316_vm2, %v2672_v25, %v2633_v12  ;;  %v1995_v43 = vsel %vm1316_vm2, %v1951_v33, %v1915_v46  ;;  %1254 = vrot.lane.b32.xlu2 %v5489_v7, %s4604_s20  ;;  %v5564_v14 = vrot.slane %v3017_v62, 7  ;;  %v1638_v46 = vsel %vm1576_vm6, %v5435_v53, %v5560_v8 }
 0x16e   : > { %v5501_v44 = vsel %vm3130_vm4, %v2722_v3, 0  ;;  %4141 = vmatmul.msk.bf16.gmra.mxu1 %vm2028_vm13, %v1995_v43  ;;  %v2198_v0 = vsel %vm2154_vm8, %v5377_v22, %v5485_v18  ;;  %v1510_v22 = vsel %vm1478_vm7, 65537, %v4602_v34  ;;  %vm5556_vm4 = vcmp.ne.s32.totalorder %v3132_v61, %v4949_v6  ;;  %v4529_v43 = vld [vmem:[#allocation2 + $0x30] sm:$0xff] }
 0x16f   : > { %v3268_v56 = vshll.u32 %v5501_v44, 16  ;;  %4161 = vmatmul.msk.bf16.gmra.mxu2 %vm2028_vm13, %v2198_v0  ;;  %v5522_v29 = vpop.permute.xlu2 %1885  ;;  %v1542_v63 = vunpack.c.l.b16 %v1510_v22  ;;  %vm3137_vm7 = vmpackc.low %vm5556_vm4, %vm5551_vm3  ;;  %v3022_v2 = vor.u32 %v3020_v11, %v5564_v14  ;;  %v2935_v3 = vunpack.c.l.b16 %v2903_v40 }
 0x170   : > { %v795_v53 = vand.u32 15, %v657_v4  ;;  %v1762_v45 = vunpack.c.l.b16 %v1638_v46  ;;  %v1763_v22 = vunpack.c.h.b16 %v1638_v46  ;;  %v3272_v19 = vshrl.u32 %v5501_v44, 16 }
 0x171   : > { %v5520_v9 = vrot.slane %v3268_v56, 1  ;;  %v3023_v16 = vsel %vm2968_vm10, %v5438_v58, %v3022_v2 }
 0x172   : > { %1211 = vrot.lane.b32.xlu1 %v5385_v24, %s4603_s19  ;;  %2606 = vrot.lane.b32.xlu0 %v4308_v28, %s4603_s19  ;;  %vm5621_vm12 = vcmp.le.s32.totalorder %v795_v53, 14  ;;  %vm5636_vm14 = vcmp.ne.s32.totalorder %v1763_v22, %v4949_v6  ;;  %v659_v53 = vadd.s32 152, %v4848_v41 }
 0x173   : > { %v3271_v57 = vsel %vm3235_vm5, %v3266_v48, %v5520_v9  ;;  %vm2873_vm3 = vmpackc.low %vm5621_vm12, %vm5621_vm12 }
 0x174   : > { %v1198_v24 = vpop.permute.xlu1 %1197  ;;  %4255 = vmatmul.msk.bf16.gmra.mxu3 %vm2028_vm13, %v3271_v57  ;;  %v2593_v26 = vpop.permute.xlu0 %2592  ;;  %v3274_v57 = vor.u32 %v3272_v19, %v5520_v9  ;;  %v5643_v9 = vld [vmem:[#allocation2 + $0x80] sm:$0xff]   ;;  %v2905_v4 = vsel %vm2873_vm3, 65537, %v4602_v34 }
 0x175   : > { %v1282_v27 = vsel %vm1264_vm15, %v4527_v54, %v1198_v24  ;;  %1897 = vrot.lane.b32.xlu2 %v5460_v10, %s4603_s19  ;;  %v1954_v10 = vsel %vm1264_vm15, %v4528_v42, %v5412_v35  ;;  %v2675_v38 = vsel %vm1264_vm15, %v4529_v43, %v2593_v26  ;;  %v1512_v26 = vsel %vm1480_vm11, 65537, %v4602_v34  ;;  %v5690_v43 = vld [vmem:[#allocation2 + $0x78] sm:$0xff]  }
 0x176   : > { %v1333_v28 = vsel %vm1316_vm2, %v1282_v27, %v5359_v1  ;;  %v1567_v1 = vpack.c.b16 %v4888_v13, %v1542_v63  ;;  %v3138_v27 = vunpack.c.l.b16 %v3023_v16  ;;  %v802_v42 = vand.u32 15, %v658_v60 }
 0x177   : > { %v1844_v50 = vsel %vm1761_vm1, %v1333_v28, 0  ;;  %v5568_v33 = vpop.permute.xlu2 %1244  ;;  %vm5631_vm1 = vcmp.ne.s32.totalorder %v1762_v45, %v4946_v5  ;;  %v3139_v28 = vunpack.c.h.b16 %v3023_v16 }
 0x178   : > { %v2200_v15 = vshrl.u32 %v1844_v50, 16  ;;  %v2203_v17 = vshll.u32 %v1844_v50, 16  ;;  %v1640_v32 = vshrl.u32 %v1567_v1, 16  ;;  %v1643_v35 = vshll.u32 %v1567_v1, 16  ;;  %vm1768_vm4 = vmpackc.low %vm5636_vm14, %vm5631_vm1  ;;  %v4530_v1 = vld [vmem:[#allocation2 + $0x34] sm:$0xff]  }
 0x179   : > { %vm5678_vm9 = vcmp.ne.s32.totalorder %v3139_v28, %v4949_v6  ;;  %vm5696_vm11 = vcmp.ge.s32.totalorder %v802_v42, 1 }
 0x17a   : > { %v2202_v25 = vrot.slane %v2200_v15, 3  ;;  %v2205_v12 = vrot.slane %v2203_v17, 4  ;;  %2648 = vrot.lane.b32.xlu1 %v4309_v20, %s4604_s20  ;;  %1930 = vrot.lane.b32.xlu0 %v5570_v36, %s4604_s20  ;;  %v1642_v55 = vrot.slane %v1640_v32, 4  ;;  %v1645_v51 = vrot.slane %v1643_v35, 5  ;;  %v4310_v32 = vld [vmem:[#allocation2 + $0x80] sm:$0xff]  ;;  %vm1482_vm1 = vmpackc.low %vm5696_vm11, %vm5696_vm11 }
 0x17b   : > { %v5664_v17 = vunpack.c.h.b16 %v5643_v9 }
 0x17c   : > { %v2635_v21 = vpop.permute.xlu1 %2634  ;;  %v1917_v0 = vpop.permute.xlu0 %1916  ;;  %v5587_v37 = vor.u32 %v2205_v12, %v2202_v25  ;;  %v5651_v47 = vor.u32 %v1645_v51, %v1642_v55 }
 0x17d   : > { %v2725_v31 = vsel %vm1316_vm2, %v2675_v38, %v2635_v21  ;;  %v1997_v56 = vsel %vm1316_vm2, %v1954_v10, %v1917_v0  ;;  %1256 = vrot.lane.b32.xlu2 %v5595_v52, %s4604_s20  ;;  %v2937_v21 = vunpack.c.l.b16 %v2905_v4  ;;  %v5708_v45 = vpack.c.b16 %v4380_v23, %v5664_v17 }
 0x17e   : > { %v5602_v48 = vsel %vm3137_vm7, %v2725_v31, 0  ;;  %4142 = vmatmul.msk.bf16.gmra.mxu1 %vm2028_vm13, %v1997_v56  ;;  %v2207_v49 = vsel %vm2154_vm8, %v5485_v18, %v5587_v37  ;;  %v5619_v18 = vpack.c.b16 %v2935_v3, %v4888_v13  ;;  %vm5673_vm7 = vcmp.ne.s32.totalorder %v3138_v27, %v4946_v5  ;;  %v4531_v31 = vld [vmem:[#allocation2 + $0x30] sm:$0xff]  }
 0x17f   : > { %v3276_v61 = vshll.u32 %v5602_v48, 16  ;;  %4162 = vmatmul.msk.bf16.gmra.mxu2 %vm2028_vm13, %v2207_v49  ;;  %v5628_v63 = vpop.permute.xlu2 %1887  ;;  %v1957_v56 = vsel %vm1264_vm15, %v4531_v31, %v5522_v29  ;;  %vm3144_vm12 = vmpackc.low %vm5678_vm9, %vm5673_vm7  ;;  %v4532_v49 = vld [vmem:[#allocation2 + $0x38] sm:$0xff]  ;;  %v2960_v60 = vpack.c.b16 %v2937_v21, %v4888_v13  ;;  %v3280_v27 = vshrl.u32 %v5602_v48, 16 }
 0x180   : > { %v3025_v11 = vshrl.u32 %v5619_v18, 16 }
 0x181   : > { %v5626_v62 = vrot.slane %v3276_v61, 1  ;;  %v3033_v23 = vshrl.u32 %v2960_v60, 16  ;;  %v3036_v21 = vshll.u32 %v2960_v60, 16 }
 0x182   : > { %1213 = vrot.lane.b32.xlu1 %v5489_v7, %s4603_s19  ;;  %2608 = vrot.lane.b32.xlu0 %v4309_v20, %s4603_s19  ;;  %v1544_v20 = vunpack.c.l.b16 %v1512_v26  ;;  %v5685_v35 = vrot.slane %v3025_v11, 7 }
 0x183   : > { %v3279_v54 = vsel %vm3235_vm5, %v3274_v57, %v5626_v62  ;;  %v3282_v11 = vor.u32 %v3280_v27, %v5626_v62 }
 0x184   : > { %v1200_v7 = vpop.permute.xlu1 %1199  ;;  %4256 = vmatmul.msk.bf16.gmra.mxu3 %vm2028_vm13, %v3279_v54  ;;  %v2595_v50 = vpop.permute.xlu0 %2594  ;;  %v1568_v38 = vpack.c.b16 %v4888_v13, %v1544_v20  ;;  %v809_v54 = vand.u32 15, %v659_v53 }
 0x185   : > { %v1285_v15 = vsel %vm1264_vm15, %v4530_v1, %v1200_v7  ;;  %1899 = vrot.lane.b32.xlu2 %v5570_v36, %s4603_s19  ;;  %v3028_v36 = vshll.u32 %v5619_v18, 16  ;;  %v2678_v19 = vsel %vm1264_vm15, %v4532_v49, %v2595_v50  ;;  %v1514_v50 = vsel %vm1482_vm1, 65537, %v4602_v34 }
 0x186   : > { %v1336_v40 = vsel %vm1316_vm2, %v1285_v15, %v5458_v39  ;;  %v1647_v39 = vsel %vm1576_vm6, %v5560_v8, %v5651_v47  ;;  %v1649_v57 = vshrl.u32 %v1568_v38, 16  ;;  %v1652_v24 = vshll.u32 %v1568_v38, 16 }
 0x187   : > { %v1845_v10 = vsel %vm1768_vm4, %v1336_v40, 0  ;;  %v5688_v3 = vpop.permute.xlu2 %1246  ;;  %v1769_v22 = vunpack.c.l.b16 %v1647_v39  ;;  %v1770_v16 = vunpack.c.h.b16 %v1647_v39  ;;  %v3030_v18 = vor.u32 %v3028_v36, %v5685_v35  ;;  %v4533_v39 = vld [vmem:[#allocation2 + $0x3c] sm:$0xff]   ;;  %v5777_v36 = vld [vmem:[#allocation2 + $0x90] sm:$0xff]  }
 0x188   : > { %v2209_v46 = vshrl.u32 %v1845_v10, 16  ;;  %v2212_v2 = vshll.u32 %v1845_v10, 16  ;;  %v1651_v20 = vrot.slane %v1649_v57, 4  ;;  %v1654_v40 = vrot.slane %v1652_v24, 5  ;;  %v4534_v57 = vld [vmem:[#allocation2 + $0x38] sm:$0xff]  }
 0x189   : > { %vm5737_vm14 = vcmp.ne.s32.totalorder %v1769_v22, %v4946_v5  ;;  %vm5742_vm3 = vcmp.ne.s32.totalorder %v1770_v16, %v4949_v6  ;;  %v3031_v48 = vsel %vm2968_vm10, %v5564_v14, %v3030_v18  ;;  %vm5757_vm4 = vcmp.le.s32.totalorder %v809_v54, 14  ;;  %v4535_v54 = vld [vmem:[#allocation2 + $0x40] sm:$0xff] }
 0x18a   : > { %v2211_v0 = vrot.slane %v2209_v46, 3  ;;  %v2214_v30 = vrot.slane %v2212_v2, 4  ;;  %2650 = vrot.lane.b32.xlu1 %v4310_v32, %s4604_s20  ;;  %1932 = vrot.lane.b32.xlu0 %v5690_v43, %s4604_s20  ;;  %v660_v14 = vadd.s32 160, %v4848_v41  ;;  %v3145_v42 = vunpack.c.l.b16 %v3031_v48  ;;  %vm1775_vm7 = vmpackc.low %vm5742_vm3, %vm5737_vm14 }
 0x18b   : > { %v1546_v10 = vunpack.c.l.b16 %v1514_v50  ;;  %v3146_v12 = vunpack.c.h.b16 %v3031_v48  ;;  %v5770_v2 = vor.u32 %v1654_v40, %v1651_v20  ;;  %vm2875_vm9 = vmpackc.low %vm5757_vm4, %vm5757_vm4  ;;  %v5779_v38 = vrot.slane %v3033_v23, 7 }
 0x18c   : > { %v2637_v61 = vpop.permute.xlu1 %2636  ;;  %v1919_v55 = vpop.permute.xlu0 %1918  ;;  %v5711_v51 = vor.u32 %v2214_v30, %v2211_v0  ;;  %v816_v0 = vand.u32 15, %v660_v14  ;;  %vm5784_vm11 = vcmp.ne.s32.totalorder %v3145_v42, %v4946_v5  ;;  %v2907_v49 = vsel %vm2875_vm9, 65537, %v4602_v34 }
 0x18d   : > { %v2728_v29 = vsel %vm1316_vm2, %v2678_v19, %v2637_v61  ;;  %v1999_v44 = vsel %vm1316_vm2, %v1957_v56, %v1919_v55  ;;  %1258 = vrot.lane.b32.xlu2 %v5708_v45, %s4604_s20  ;;  %v1569_v53 = vpack.c.b16 %v4888_v13, %v1546_v10  ;;  %v4384_v61 = vunpack.c.l.b16 %v5777_v36 }
 0x18e   : > { %v5724_v58 = vsel %vm3144_vm12, %v2728_v29, 0  ;;  %4143 = vmatmul.msk.bf16.gmra.mxu1 %vm2028_vm13, %v1999_v44  ;;  %v2216_v26 = vsel %vm2154_vm8, %v5587_v37, %v5711_v51  ;;  %vm5790_vm12 = vcmp.ne.s32.totalorder %v3146_v12, %v4949_v6  ;;  %v1656_v55 = vsel %vm1576_vm6, %v5651_v47, %v5770_v2 }
 0x18f   : > { %v3284_v28 = vshll.u32 %v5724_v58, 16  ;;  %4163 = vmatmul.msk.bf16.gmra.mxu2 %vm2028_vm13, %v2216_v26  ;;  %v5752_v15 = vpop.permute.xlu2 %1889  ;;  %v3038_v29 = vor.u32 %v3036_v21, %v5779_v38  ;;  %vm5808_vm1 = vcmp.ge.s32.totalorder %v816_v0, 1  ;;  %v1960_v24 = vsel %vm1264_vm15, %v4534_v57, %v5628_v63  ;;  %vm3151_vm14 = vmpackc.low %vm5790_vm12, %vm5784_vm11  ;;  %v2487_v57 = vld [vmem:[#allocation2 + $0x90] sm:$0x1] }
 0x190   : > { %v1658_v47 = vshrl.u32 %v1569_v53, 16  ;;  %v1661_v26 = vshll.u32 %v1569_v53, 16  ;;  %v2939_v60 = vunpack.c.l.b16 %v2907_v49  ;;  %v1776_v48 = vunpack.c.l.b16 %v1656_v55  ;;  %vm1484_vm3 = vmpackc.low %vm5808_vm1, %vm5808_vm1  ;;  %v4536_v49 = vld [vmem:[#allocation2 + $0x44] sm:$0xff]  }
 0x191   : > { %v5750_v1 = vrot.slane %v3284_v28, 1  ;;  %v661_v50 = vadd.s32 168, %v4848_v41  ;;  %v1777_v40 = vunpack.c.h.b16 %v1656_v55  ;;  %v3288_v23 = vshrl.u32 %v5724_v58, 16 }
 0x192   : > { %1215 = vrot.lane.b32.xlu1 %v5595_v52, %s4603_s19  ;;  %2610 = vrot.lane.b32.xlu0 %v4310_v32, %s4603_s19  ;;  %v1660_v58 = vrot.slane %v1658_v47, 4  ;;  %v1663_v10 = vrot.slane %v1661_v26, 5  ;;  %vm5847_vm4 = vcmp.ne.s32.totalorder %v1776_v48, %v4946_v5  ;;  %v662_v21 = vadd.s32 176, %v4848_v41 }
 0x193   : > { %v3287_v62 = vsel %vm3235_vm5, %v3282_v11, %v5750_v1  ;;  %v823_v12 = vand.u32 15, %v661_v50  ;;  %v4385_v55 = vunpack.c.h.b16 %v5777_v36  ;;  %v4537_v50 = vld [vmem:[#allocation2 + $0x40] sm:$0xff]  }
 0x194   : > { %v1202_v52 = vpop.permute.xlu1 %1201  ;;  %4257 = vmatmul.msk.bf16.gmra.mxu3 %vm2028_vm13, %v3287_v62  ;;  %v2597_v25 = vpop.permute.xlu0 %2596  ;;  %v3039_v62 = vsel %vm2968_vm10, %v5685_v35, %v3038_v29  ;;  %v3290_v35 = vor.u32 %v3288_v23, %v5750_v1  ;;  %v5868_v8 = vor.u32 %v1663_v10, %v1660_v58  ;;  %v830_v22 = vand.u32 15, %v662_v21 }
 0x195   : > { %v1288_v46 = vsel %vm1264_vm15, %v4533_v39, %v1202_v52  ;;  %1901 = vrot.lane.b32.xlu2 %v5690_v43, %s4603_s19  ;;  %v5798_v43 = vunpack.c.h.b16 %v5649_v59  ;;  %v2681_v27 = vsel %vm1264_vm15, %v4535_v54, %v2597_v25  ;;  %v2961_v52 = vpack.c.b16 %v2939_v60, %v4888_v13 }
 0x196   : > { %v1339_v32 = vsel %vm1316_vm2, %v1288_v46, %v5568_v33  ;;  %v4311_v33 = vld [vmem:[#allocation2 + $0x88] sm:$0xff]  ;;  %v3152_v0 = vunpack.c.l.b16 %v3039_v62  ;;  %vm5875_vm11 = vcmp.le.s32.totalorder %v823_v12, 14  ;;  %v1229_v48 = vpack.c.b16 %v4385_v55, %v4385_v55 }
 0x197   : > { %v1846_v30 = vsel %vm1775_vm7, %v1339_v32, 0  ;;  %v5795_v19 = vpop.permute.xlu2 %1248  ;;  %v1228_v20 = vpack.c.b16 %v4384_v61, %v5798_v43  ;;  %vm5858_vm7 = vcmp.ne.s32.totalorder %v1777_v40, %v4949_v6  ;;  %v3041_v53 = vshrl.u32 %v2961_v52, 16 }
 0x198   : > { %v2218_v31 = vshrl.u32 %v1846_v30, 16  ;;  %v2221_v56 = vshll.u32 %v1846_v30, 16  ;;  %v3153_v30 = vunpack.c.h.b16 %v3039_v62  ;;  %vm1782_vm9 = vmpackc.low %vm5858_vm7, %vm5847_vm4  ;;  %vm5884_vm12 = vcmp.ne.s32.totalorder %v3152_v0, %v4946_v5 }
 0x199   : > { %v5898_v26 = vrot.slane %v3041_v53, 7  ;;  %v1186_v21 = vpack.c.b16 %v5798_v43, %v5798_v43 }
 0x19a   : > { %v2220_v16 = vrot.slane %v2218_v31, 3  ;;  %v2223_v18 = vrot.slane %v2221_v56, 4  ;;  %2652 = vrot.lane.b32.xlu1 %v4311_v33, %s4604_s20  ;;  %1934 = vrot.lane.b32.xlu0 %v5643_v9, %s4604_s20  ;;  %vm5889_vm1 = vcmp.ne.s32.totalorder %v3153_v30, %v4949_v6 }
 0x19b   : > { %vm3158_vm4 = vmpackc.low %vm5889_vm1, %vm5884_vm12 }
 0x19c   : > { %v2639_v28 = vpop.permute.xlu1 %2638  ;;  %v1921_v7 = vpop.permute.xlu0 %1920  ;;  %v5819_v37 = vor.u32 %v2223_v18, %v2220_v16  ;;  %v4312_v18 = vld [vmem:[#allocation2 + $0x90] sm:$0xff] }
 0x19d   : > { %v2731_v63 = vsel %vm1316_vm2, %v2681_v27, %v2639_v28  ;;  %v2001_v11 = vsel %vm1316_vm2, %v1960_v24, %v1921_v7  ;;  %1260 = vrot.lane.b32.xlu2 %v1228_v20, %s4604_s20  ;;  %v3044_v24 = vshll.u32 %v2961_v52, 16 }
 0x19e   : > { %v5834_v4 = vsel %vm3151_vm14, %v2731_v63, 0  ;;  %4144 = vmatmul.msk.bf16.gmra.mxu1 %vm2028_vm13, %v2001_v11  ;;  %v2225_v14 = vsel %vm2154_vm8, %v5711_v51, %v5819_v37  ;;  %v1516_v51 = vsel %vm1484_vm3, 65537, %v4602_v34  ;;  %vm2877_vm14 = vmpackc.low %vm5875_vm11, %vm5875_vm11  ;;  %vm5904_vm3 = vcmp.ge.s32.totalorder %v830_v22, 1 }
 0x19f   : > { %v3292_v42 = vshll.u32 %v5834_v4, 16  ;;  %4164 = vmatmul.msk.bf16.gmra.mxu2 %vm2028_vm13, %v2225_v14  ;;  %v5855_v46 = vpop.permute.xlu2 %1891  ;;  %v1548_v31 = vunpack.c.l.b16 %v1516_v51  ;;  %v1963_v63 = vsel %vm1264_vm15, %v4537_v50, %v5752_v15  ;;  %v2909_v40 = vsel %vm2877_vm14, 65537, %v4602_v34  ;;  %vm1486_vm7 = vmpackc.low %vm5904_vm3, %vm5904_vm3 }
 0x1a0   : > { %v3046_v14 = vor.u32 %v3044_v24, %v5898_v26  ;;  %v2941_v0 = vunpack.c.l.b16 %v2909_v40  ;;  %v1518_v43 = vsel %vm1486_vm7, 65537, %v4602_v34  ;;  %v4542_v40 = vld [vmem:[#allocation2 + $0x54] sm:$0xff]  }
 0x1a1   : > { %v5853_v39 = vrot.slane %v3292_v42, 1  ;;  %v1570_v60 = vpack.c.b16 %v4888_v13, %v1548_v31  ;;  %v4538_v42 = vld [vmem:[#allocation2 + $0x48] sm:$0xff]  ;;  %v3296_v31 = vshrl.u32 %v5834_v4, 16  ;;  %v1550_v44 = vunpack.c.l.b16 %v1518_v43 }
 0x1a2   : > { %1217 = vrot.lane.b32.xlu1 %v5708_v45, %s4603_s19  ;;  %2612 = vrot.lane.b32.xlu0 %v4311_v33, %s4603_s19  ;;  %v2490_v33 = vld [vmem:[#allocation2 + $0x98] sm:$0x1]  ;;  %v3047_v4 = vsel %vm2968_vm10, %v5779_v38, %v3046_v14  ;;  %v2962_v29 = vpack.c.b16 %v2941_v0, %v4888_v13 }
 0x1a3   : > { %v3295_v1 = vsel %vm3235_vm5, %v3290_v35, %v5853_v39  ;;  %v1667_v62 = vshrl.u32 %v1570_v60, 16  ;;  %v1670_v51 = vshll.u32 %v1570_v60, 16  ;;  %v3298_v55 = vor.u32 %v3296_v31, %v5853_v39 }
 0x1a4   : > { %v1204_v56 = vpop.permute.xlu1 %1203  ;;  %4258 = vmatmul.msk.bf16.gmra.mxu3 %vm2028_vm13, %v3295_v1  ;;  %v2599_v45 = vpop.permute.xlu0 %2598  ;;  %v2621_v38 = vunpack.c.l.b16 %v2490_v33 }
 0x1a5   : > { %v1291_v61 = vsel %vm1264_vm15, %v4536_v49, %v1204_v56  ;;  %1903 = vrot.lane.b32.xlu2 %v5643_v9, %s4603_s19  ;;  %v663_v9 = vadd.s32 184, %v4848_v41  ;;  %v2684_v58 = vsel %vm1264_vm15, %v4538_v42, %v2599_v45  ;;  %v1669_v22 = vrot.slane %v1667_v62, 4 }
 0x1a6   : > { %v1342_v16 = vsel %vm1316_vm2, %v1291_v61, %v5688_v3  ;;  %v1665_v3 = vsel %vm1576_vm6, %v5770_v2, %v5868_v8  ;;  %v2579_v2 = vunpack.c.l.b16 %v2487_v57  ;;  %v1672_v49 = vrot.slane %v1670_v51, 5 }
 0x1a7   : > { %v1847_v47 = vsel %vm1782_vm9, %v1342_v16, 0  ;;  %v5909_v7 = vpop.permute.xlu2 %1250  ;;  %v1783_v15 = vunpack.c.l.b16 %v1665_v3  ;;  %v1784_v23 = vunpack.c.h.b16 %v1665_v3  ;;  %v837_v12 = vand.u32 15, %v663_v9 }
 0x1a8   : > { %v2227_v54 = vshrl.u32 %v1847_v47, 16  ;;  %v2230_v27 = vshll.u32 %v1847_v47, 16  ;;  %v2581_v53 = vpack.c.b16 %v2579_v2, %v2579_v2  ;;  %v664_v57 = vadd.s32 192, %v4848_v41 }
 0x1a9   : > { %vm5959_vm9 = vcmp.ne.s32.totalorder %v1783_v15, %v4946_v5  ;;  %vm5964_vm11 = vcmp.ne.s32.totalorder %v1784_v23, %v4949_v6  ;;  %vm5970_vm12 = vcmp.le.s32.totalorder %v837_v12, 14  ;;  %v3159_v47 = vunpack.c.l.b16 %v3047_v4 }
 0x1aa   : > { %v2229_v11 = vrot.slane %v2227_v54, 3  ;;  %v2232_v20 = vrot.slane %v2230_v27, 4  ;;  %2654 = vrot.lane.b32.xlu1 %v4312_v18, %s4604_s20  ;;  %1936 = vrot.lane.b32.xlu0 %v5649_v59, %s4604_s20  ;;  %v3160_v3 = vunpack.c.h.b16 %v3047_v4  ;;  %vm2879_vm1 = vmpackc.low %vm5970_vm12, %vm5970_vm12  ;;  %v5993_v54 = vor.u32 %v1672_v49, %v1669_v22  ;;  %v4539_v27 = vld [vmem:[#allocation2 + $0x4c] sm:$0xff]  }
 0x1ab   : > { %vm1789_vm14 = vmpackc.low %vm5964_vm11, %vm5959_vm9  ;;  %v3049_v9 = vshrl.u32 %v2962_v29, 16  ;;  %v2623_v50 = vpack.c.b16 %v2621_v38, %v2621_v38  ;;  %vm6003_vm3 = vcmp.ne.s32.totalorder %v3159_v47, %v4946_v5  ;;  %v3052_v62 = vshll.u32 %v2962_v29, 16 }
 0x1ac   : > { %v2641_v10 = vpop.permute.xlu1 %2640  ;;  %v1923_v52 = vpop.permute.xlu0 %1922  ;;  %v5931_v25 = vor.u32 %v2232_v20, %v2229_v11  ;;  %v844_v11 = vand.u32 15, %v664_v57  ;;  %v1674_v14 = vsel %vm1576_vm6, %v5868_v8, %v5993_v54  ;;  %v4540_v8 = vld [vmem:[#allocation2 + $0x48] sm:$0xff]  }
 0x1ad   : > { %v2734_v35 = vsel %vm1316_vm2, %v2684_v58, %v2641_v10  ;;  %v2003_v32 = vsel %vm1316_vm2, %v1963_v63, %v1923_v52  ;;  %1262 = vrot.lane.b32.xlu2 %v1229_v48, %s4604_s20  ;;  %v1571_v48 = vpack.c.b16 %v4888_v13, %v1550_v44  ;;  %v2911_v63 = vsel %vm2879_vm1, 65537, %v4602_v34 }
 0x1ae   : > { %v5942_v30 = vsel %vm3158_vm4, %v2734_v35, 0  ;;  %4145 = vmatmul.msk.bf16.gmra.mxu1 %vm2028_vm13, %v2003_v32  ;;  %v2234_v1 = vsel %vm2154_vm8, %v5819_v37, %v5931_v25  ;;  %vm6008_vm4 = vcmp.ne.s32.totalorder %v3160_v3, %v4949_v6  ;;  %v6015_v42 = vrot.slane %v3049_v9, 7 }
 0x1af   : > { %v3300_v56 = vshll.u32 %v5942_v30, 16  ;;  %4165 = vmatmul.msk.bf16.gmra.mxu2 %vm2028_vm13, %v2234_v1  ;;  %v5977_v18 = vpop.permute.xlu2 %1893  ;;  %v2943_v58 = vunpack.c.l.b16 %v2911_v63  ;;  %v665_v10 = vadd.s32 200, %v4848_v41  ;;  %v1679_v12 = vshll.u32 %v1571_v48, 16  ;;  %vm3165_vm9 = vmpackc.low %vm6008_vm4, %vm6003_vm3 }
 0x1b0   : > { %vm6021_vm7 = vcmp.ge.s32.totalorder %v844_v11, 1  ;;  %v1966_v32 = vsel %vm1264_vm15, %v4540_v8, %v5855_v46  ;;  %v1790_v1 = vunpack.c.l.b16 %v1674_v14  ;;  %v1791_v45 = vunpack.c.h.b16 %v1674_v14 }
 0x1b1   : > { %v5975_v16 = vrot.slane %v3300_v56, 1  ;;  %v851_v37 = vand.u32 15, %v665_v10  ;;  %v3054_v4 = vor.u32 %v3052_v62, %v6015_v42  ;;  %v2963_v22 = vpack.c.b16 %v2943_v58, %v4888_v13  ;;  %vm1488_vm11 = vmpackc.low %vm6021_vm7, %vm6021_vm7 }
 0x1b2   : > { %1219 = vrot.lane.b32.xlu1 %v1186_v21, %s4603_s19  ;;  %2614 = vrot.lane.b32.xlu0 %v2581_v53, %s4603_s19  ;;  %v1681_v29 = vrot.slane %v1679_v12, 5  ;;  %v3304_v44 = vshrl.u32 %v5942_v30, 16  ;;  %vm6055_vm12 = vcmp.ne.s32.totalorder %v1790_v1, %v4946_v5  ;;  %vm6060_vm1 = vcmp.ne.s32.totalorder %v1791_v45, %v4949_v6 }
 0x1b3   : > { %v3303_v24 = vsel %vm3235_vm5, %v3298_v55, %v5975_v16  ;;  %v666_v9 = vadd.s32 208, %v4848_v41  ;;  %vm1796_vm4 = vmpackc.low %vm6060_vm1, %vm6055_vm12 }
 0x1b4   : > { %v1206_v39 = vpop.permute.xlu1 %1205  ;;  %4259 = vmatmul.msk.bf16.gmra.mxu3 %vm2028_vm13, %v3303_v24  ;;  %v2601_v60 = vpop.permute.xlu0 %2600  ;;  %v3306_v30 = vor.u32 %v3304_v44, %v5975_v16 }
 0x1b5   : > { %v1294_v28 = vsel %vm1264_vm15, %v4539_v27, %v1206_v39  ;;  %1905 = vrot.lane.b32.xlu2 %v5649_v59, %s4603_s19  ;;  %v1676_v59 = vshrl.u32 %v1571_v48, 16  ;;  %v3057_v27 = vshrl.u32 %v2963_v22, 16  ;;  %v858_v58 = vand.u32 15, %v666_v9 }
 0x1b6   : > { %v1345_v2 = vsel %vm1316_vm2, %v1294_v28, %v5795_v19 }
 0x1b7   : > { %v1848_v20 = vsel %vm1789_vm14, %v1345_v2, 0  ;;  %v6027_v21 = vpop.permute.xlu2 %1252  ;;  %v1678_v55 = vrot.slane %v1676_v59, 4  ;;  %vm6065_vm14 = vcmp.le.s32.totalorder %v851_v37, 14 }
 0x1b8   : > { %v2236_v23 = vshrl.u32 %v1848_v20, 16  ;;  %v2239_v19 = vshll.u32 %v1848_v20, 16  ;;  %vm2881_vm3 = vmpackc.low %vm6065_vm14, %vm6065_vm14 }
 0x1b9   : > { %v6074_v28 = vor.u32 %v1681_v29, %v1678_v55  ;;  %v2913_v59 = vsel %vm2881_vm3, 65537, %v4602_v34  ;;  %v4544_v55 = vld [vmem:[#allocation2 + $0x58] sm:$0xff] }
 0x1ba   : > { %v2238_v52 = vrot.slane %v2236_v23, 3  ;;  %v2241_v51 = vrot.slane %v2239_v19, 4  ;;  %2656 = vrot.lane.b32.xlu1 %v2623_v50, %s4604_s20  ;;  %1938 = vrot.lane.b32.xlu0 %v5777_v36, %s4604_s20  ;;  %v4541_v36 = vld [vmem:[#allocation2 + $0x50] sm:$0xff]  ;;  %v6090_v23 = vrot.slane %v3057_v27, 7  ;;  %v3060_v19 = vshll.u32 %v2963_v22, 16 }
 0x1bb   : > { %v6029_v0 = vpop.f32.mrf.mxu1  ;;  %v2687_v53 = vsel %vm1264_vm15, %v4541_v36, %v2601_v60  ;;  %v3055_v60 = vsel %vm2968_vm10, %v5898_v26, %v3054_v4  ;;  %v1683_v62 = vsel %vm1576_vm6, %v5993_v54, %v6074_v28  ;;  %v2945_v36 = vunpack.c.l.b16 %v2913_v59 }
 0x1bc   : > { %v2643_v43 = vpop.permute.xlu1 %2642  ;;  %v1925_v31 = vpop.permute.xlu0 %1924  ;;  %v6036_v56 = vor.u32 %v2241_v51, %v2238_v52  ;;  %v3166_v63 = vunpack.c.l.b16 %v3055_v60  ;;  %v3167_v11 = vunpack.c.h.b16 %v3055_v60  ;;  %v3062_v1 = vor.u32 %v3060_v19, %v6090_v23 }
 0x1bd   : > { %v2737_v46 = vsel %vm1316_vm2, %v2687_v53, %v2643_v43  ;;  %v2005_v33 = vsel %vm1316_vm2, %v1966_v32, %v1925_v31  ;;  %v1797_v32 = vunpack.c.l.b16 %v1683_v62  ;;  %v667_v53 = vadd.s32 216, %v4848_v41 }
 0x1be   : > { %v6045_v49 = vsel %vm3165_vm9, %v2737_v46, 0  ;;  %4146 = vmatmul.msk.bf16.gmra.mxu1 %vm2028_vm13, %v2005_v33  ;;  %v2243_v61 = vsel %vm2154_vm8, %v5931_v25, %v6036_v56  ;;  %v1520_v25 = vsel %vm1488_vm11, 65537, %v4602_v34  ;;  %vm6100_vm7 = vcmp.ne.s32.totalorder %v3166_v63, %v4946_v5  ;;  %v4543_v46 = vld [vmem:[#allocation2 + $0x50] sm:$0xff]  }
 0x1bf   : > { %v3308_v38 = vshll.u32 %v6045_v49, 16  ;;  %4166 = vmatmul.msk.bf16.gmra.mxu2 %vm2028_vm13, %v2243_v61  ;;  %v1552_v50 = vunpack.c.l.b16 %v1520_v25  ;;  %v6087_v20 = vpop.permute.xlu2 %1895  ;;  %vm6105_vm9 = vcmp.ne.s32.totalorder %v3167_v11, %v4949_v6  ;;  %vm6112_vm11 = vcmp.ge.s32.totalorder %v858_v58, 1 }
 0x1c0   : > { %v1969_v33 = vsel %vm1264_vm15, %v4543_v46, %v5977_v18  ;;  %vm3172_vm12 = vmpackc.low %vm6105_vm9, %vm6100_vm7  ;;  %v1798_v22 = vunpack.c.h.b16 %v1683_v62  ;;  %v865_v25 = vand.u32 15, %v667_v53  ;;  %vm6135_vm1 = vcmp.ne.s32.totalorder %v1797_v32, %v4946_v5  ;;  %v4545_v53 = vld [vmem:[#allocation2 + $0x5c] sm:$0xff]  }
 0x1c1   : > { %v6070_v3 = vrot.slane %v3308_v38, 1  ;;  %v2372_v39 = vpop.f32.mrf.mxu2  ;;  %v1572_v51 = vpack.c.b16 %v4888_v13, %v1552_v50  ;;  %v6128_v38 = vld [vmem:[%s7045_s4] ss:$0 sm:$0xff]  ;;  %v2964_v60 = vpack.c.b16 %v2945_v36, %v4888_v13  ;;  %vm1490_vm14 = vmpackc.low %vm6112_vm11, %vm6112_vm11  ;;  %v3063_v50 = vsel %vm2968_vm10, %v6015_v42, %v3062_v1 }
 0x1c2   : > { %v2373_v43 = vadd.f32 %v2372_v39, %v6029_v0  ;;  %vm6163_vm3 = vcmp.le.s32.totalorder %v865_v25, 14  ;;  %v3174_v1 = vunpack.c.h.b16 %v3063_v50 }
 0x1c3   : > { %v2076_v48 = vpop.f32.mrf.mxu1  ;;  %v3311_v2 = vsel %vm3235_vm5, %v3306_v30, %v6070_v3  ;;  %v1685_v61 = vshrl.u32 %v1572_v51, 16  ;;  %v1688_v0 = vshll.u32 %v1572_v51, 16  ;;  %v3065_v59 = vshrl.u32 %v2964_v60, 16  ;;  %vm2883_vm7 = vmpackc.low %vm6163_vm3, %vm6163_vm3 }
 0x1c4   : > { %v1208_v26 = vpop.permute.xlu1 %1207  ;;  %4260 = vmatmul.msk.bf16.gmra.mxu3 %vm2028_vm13, %v3311_v2  ;;  %v2603_v16 = vpop.permute.xlu0 %2602 }
 0x1c5   : > { %v1297_v15 = vsel %vm1264_vm15, %v4542_v40, %v1208_v26  ;;  %v2690_v29 = vsel %vm1264_vm15, %v4544_v55, %v2603_v16  ;;  %v3312_v26 = vshrl.u32 %v6045_v49, 16  ;;  %v1687_v11 = vrot.slane %v1685_v61, 4 }
 0x1c6   : > { %v1348_v14 = vsel %vm1316_vm2, %v1297_v15, %v5909_v7  ;;  %v1690_v40 = vrot.slane %v1688_v0, 5 }
 0x1c7   : > { %v1849_v10 = vsel %vm1796_vm4, %v1348_v14, 0  ;;  %v3433_v52 = vpop.f32.mrf.mxu3  ;;  %v6157_v16 = vpop.permute.xlu2 %1254  ;;  %v1522_v14 = vsel %vm1490_vm14, 65537, %v4602_v34  ;;  %v3314_v42 = vor.u32 %v3312_v26, %v6070_v3  ;;  %vm6171_vm4 = vcmp.ne.s32.totalorder %v1798_v22, %v4949_v6 }
 0x1c8   : > { %v2245_v12 = vshrl.u32 %v1849_v10, 16  ;;  %v2248_v35 = vshll.u32 %v1849_v10, 16  ;;  %v3513_v44 = vadd.f32 %v3433_v52, %v2373_v43  ;;  %v668_v52 = vadd.s32 224, %v4848_v41  ;;  %vm1803_vm9 = vmpackc.low %vm6171_vm4, %vm6135_vm1 }
 0x1c9   : > { %v2374_v54 = vpop.f32.mrf.mxu2  ;;  %v1554_v8 = vunpack.c.l.b16 %v1522_v14  ;;  %v6187_v36 = vor.u32 %v1690_v40, %v1687_v11  ;;  %v669_v26 = vadd.s32 232, %v4848_v41 }
 0x1ca   : > { %v2247_v31 = vrot.slane %v2245_v12, 3  ;;  %v2250_v45 = vrot.slane %v2248_v35, 4  ;;  %v2375_v27 = vadd.f32 %v2374_v54, %v2076_v48  ;;  %v3549_v15 = vadd.f32 %v6128_v38, %v3513_v44 }
 0x1cb   : > { %v6118_v4 = vpop.f32.mrf.mxu1  ;;  %v3173_v35 = vunpack.c.l.b16 %v3063_v50  ;;  %v872_v22 = vand.u32 15, %v668_v52 }
 0x1cc   : > { %v2645_v18 = vpop.permute.xlu1 %2644  ;;  %v1927_v57 = vpop.permute.xlu0 %1926  ;;  %v6130_v24 = vor.u32 %v2250_v45, %v2247_v31  ;;  %v3581_v3 = vmax.f32 %v3549_v15, 0.0  ;;  %v6190_v31 = vrot.slane %v3065_v59, 7  ;;  %v3068_v45 = vshll.u32 %v2964_v60, 16  ;;  %v4547_v15 = vld [vmem:[#allocation2 + $0x60] sm:$0xff] }
 0x1cd   : > { %v2740_v47 = vsel %vm1316_vm2, %v2690_v29, %v2645_v18  ;;  %v2007_v30 = vsel %vm1316_vm2, %v1969_v33, %v1927_v57  ;;  %v2915_v33 = vsel %vm2883_vm7, 65537, %v4602_v34  ;;  %vm6196_vm11 = vcmp.ne.s32.totalorder %v3173_v35, %v4946_v5 }
 0x1ce   : > { %v6148_v9 = vsel %vm3172_vm12, %v2740_v47, 0  ;;  %4147 = vmatmul.msk.bf16.gmra.mxu1 %vm2028_vm13, %v2007_v30  ;;  %v2252_v2 = vsel %vm2154_vm8, %v6036_v56, %v6130_v24  ;;  %v1573_v29 = vpack.c.b16 %v4888_v13, %v1554_v8  ;;  %vm6203_vm12 = vcmp.ne.s32.totalorder %v3174_v1, %v4949_v6 }
 0x1cf   : > { %v3316_v48 = vshll.u32 %v6148_v9, 16  ;;  %4167 = vmatmul.msk.bf16.gmra.mxu2 %vm2028_vm13, %v2252_v2  ;;  %v3435_v63 = vpop.f32.mrf.mxu3  ;;  %v6210_v25 = vpop.permute.xlu2 %1897  ;;  %v3070_v30 = vor.u32 %v3068_v45, %v6190_v31  ;;  %v2947_v39 = vunpack.c.l.b16 %v2915_v33  ;;  %vm6214_vm1 = vcmp.ge.s32.totalorder %v872_v22, 1  ;;  %vm3179_vm14 = vmpackc.low %vm6203_vm12, %vm6196_vm11 }
 0x1d0   : > { %v3514_v19 = vadd.f32 %v3435_v63, %v2375_v27  ;;  %v1694_v11 = vshrl.u32 %v1573_v29, 16  ;;  %v1697_v40 = vshll.u32 %v1573_v29, 16  ;;  %vm1492_vm3 = vmpackc.low %vm6214_vm1, %vm6214_vm1  ;;  %v879_v8 = vand.u32 15, %v669_v26 }
 0x1d1   : > { %v6168_v49 = vrot.slane %v3316_v48, 1  ;;  %v4546_v48 = vld [vmem:[#allocation2 + $0x58] sm:$0xff]   ;;  %v2965_v52 = vpack.c.b16 %v2947_v39, %v4888_v13  ;;  %v670_v57 = vadd.s32 240, %v4848_v41 }
 0x1d2   : > { %v3550_v58 = vadd.f32 %v6128_v38, %v3514_v19  ;;  %v2377_v10 = vpop.f32.mrf.mxu2 }
 0x1d3   : > { %v2081_v51 = vpop.f32.mrf.mxu1  ;;  %v3319_v12 = vsel %vm3235_vm5, %v3314_v42, %v6168_v49  ;;  %v2378_v47 = vadd.f32 %v2377_v10, %v6118_v4  ;;  %v3071_v10 = vsel %vm2968_vm10, %v6090_v23, %v3070_v30  ;;  %v3076_v26 = vshll.u32 %v2965_v52, 16 }
 0x1d4   : > { %v3582_v7 = vmax.f32 %v3550_v58, 0.0  ;;  %v1210_v54 = vpop.permute.xlu1 %1209  ;;  %4261 = vmatmul.msk.bf16.gmra.mxu3 %vm2028_vm13, %v3319_v12  ;;  %v2605_v32 = vpop.permute.xlu0 %2604 }
 0x1d5   : > { %v1300_v43 = vsel %vm1264_vm15, %v4545_v53, %v1210_v54  ;;  %v2693_v19 = vsel %vm1264_vm15, %v4547_v15, %v2605_v32  ;;  %v1696_v54 = vrot.slane %v1694_v11, 4  ;;  %v1699_v32 = vrot.slane %v1697_v40, 5 }
 0x1d6   : > { %v3613_v37 = vpack.c.bf16 %v3582_v7, %v3581_v3  ;;  %v1351_v46 = vsel %vm1316_vm2, %v1300_v43, %v6027_v21  ;;  %v1692_v21 = vsel %vm1576_vm6, %v6074_v28, %v6187_v36  ;;  %v1972_v28 = vsel %vm1264_vm15, %v4546_v48, %v6087_v20 }
 0x1d7   : > { %v1850_v61 = vsel %vm1803_vm9, %v1351_v46, 0  ;;  %v3438_v0 = vpop.f32.mrf.mxu3  ;;  %v1804_v4 = vunpack.c.l.b16 %v1692_v21  ;;  %v1805_v59 = vunpack.c.h.b16 %v1692_v21  ;;  %v3320_v3 = vshrl.u32 %v6148_v9, 16  ;;  %v6272_v55 = vpop.permute.xlu2 %1256 }
 0x1d8   : > { %v2254_v44 = vshrl.u32 %v1850_v61, 16  ;;  %v2257_v18 = vshll.u32 %v1850_v61, 16  ;;  %4268 = vmatmul.msk.bf16.vlgmr.msrb.gmra.mxu0 %vm1264_vm15, %v3613_v37  ;;  %v3515_v14 = vadd.f32 %v3438_v0, %v2378_v47  ;;  %v3073_v46 = vshrl.u32 %v2965_v52, 16 }
 0x1d9   : > { %vm6254_vm4 = vcmp.ne.s32.totalorder %v1804_v4, %v4946_v5  ;;  %v3322_v45 = vor.u32 %v3320_v3, %v6168_v49  ;;  %vm6263_vm7 = vcmp.ne.s32.totalorder %v1805_v59, %v4949_v6  ;;  %v3180_v61 = vunpack.c.l.b16 %v3071_v10 }
 0x1da   : > { %v2256_v60 = vrot.slane %v2254_v44, 3  ;;  %v2259_v27 = vrot.slane %v2257_v18, 4  ;;  %v2379_v2 = vpop.f32.mrf.mxu2  ;;  %v3551_v1 = vadd.f32 %v6128_v38, %v3515_v14  ;;  %vm6268_vm9 = vcmp.le.s32.totalorder %v879_v8, 14  ;;  %vm1810_vm11 = vmpackc.low %vm6263_vm7, %vm6254_vm4 }
 0x1db   : > { %v6221_v63 = vpop.f32.mrf.mxu1  ;;  %v2380_v12 = vadd.f32 %v2379_v2, %v2081_v51  ;;  %v6276_v44 = vor.u32 %v1699_v32, %v1696_v54  ;;  %v6285_v50 = vrot.slane %v3073_v46, 7  ;;  %vm2885_vm12 = vmpackc.low %vm6268_vm9, %vm6268_vm9  ;;  %vm6293_vm1 = vcmp.ne.s32.totalorder %v3180_v61, %v4946_v5  ;;  %v4550_v32 = vld [vmem:[#allocation2 + $0x68] sm:$0xff] }
 0x1dc   : > { %v2647_v56 = vpop.permute.xlu1 %2646  ;;  %v1929_v42 = vpop.permute.xlu0 %1928  ;;  %v6228_v62 = vor.u32 %v2259_v27, %v2256_v60  ;;  %v3583_v21 = vmax.f32 %v3551_v1, 0.0  ;;  %v3181_v60 = vunpack.c.h.b16 %v3071_v10  ;;  %v4548_v27 = vld [vmem:[#allocation2 + $0x64] sm:$0xff]   ;;  %v886_v14 = vand.u32 15, %v670_v57 }
 0x1dd   : > { %v2743_v20 = vsel %vm1316_vm2, %v2693_v19, %v2647_v56  ;;  %v2009_v58 = vsel %vm1316_vm2, %v1972_v28, %v1929_v42  ;;  %v1701_v15 = vsel %vm1576_vm6, %v6187_v36, %v6276_v44  ;;  %v2917_v59 = vsel %vm2885_vm12, 65537, %v4602_v34 }
 0x1de   : > { %v6243_v35 = vsel %vm3179_vm14, %v2743_v20, 0  ;;  %4148 = vmatmul.msk.bf16.gmra.mxu1 %vm2028_vm13, %v2009_v58  ;;  %v2261_v23 = vsel %vm2154_vm8, %v6130_v24, %v6228_v62  ;;  %v1524_v24 = vsel %vm1492_vm3, 65537, %v4602_v34  ;;  %vm6303_vm14 = vcmp.ne.s32.totalorder %v3181_v60, %v4949_v6  ;;  %v4549_v20 = vld [vmem:[#allocation2 + $0x60] sm:$0xff]  }
 0x1df   : > { %v3324_v7 = vshll.u32 %v6243_v35, 16  ;;  %4168 = vmatmul.msk.bf16.gmra.mxu2 %vm2028_vm13, %v2261_v23  ;;  %v3440_v51 = vpop.f32.mrf.mxu3  ;;  %v1556_v18 = vunpack.c.l.b16 %v1524_v24  ;;  %v1975_v58 = vsel %vm1264_vm15, %v4549_v20, %v6210_v25  ;;  %v3078_v36 = vor.u32 %v3076_v26, %v6285_v50  ;;  %vm3186_vm3 = vmpackc.low %vm6303_vm14, %vm6293_vm1  ;;  %v6326_v37 = vpop.permute.xlu2 %1899 }
 0x1e0   : > { %v3516_v53 = vadd.f32 %v3440_v51, %v2380_v12  ;;  %v1811_v8 = vunpack.c.l.b16 %v1701_v15  ;;  %v2949_v54 = vunpack.c.l.b16 %v2917_v59  ;;  %vm6318_vm4 = vcmp.ge.s32.totalorder %v886_v14, 1 }
 0x1e1   : > { %v6260_v9 = vrot.slane %v3324_v7, 1  ;;  %v1574_v19 = vpack.c.b16 %v4888_v13, %v1556_v18  ;;  %v3079_v61 = vsel %vm2968_vm10, %v6190_v31, %v3078_v36  ;;  %v3328_v0 = vshrl.u32 %v6243_v35, 16  ;;  %vm1494_vm7 = vmpackc.low %vm6318_vm4, %vm6318_vm4 }
 0x1e2   : > { %v3552_v33 = vadd.f32 %v6128_v38, %v3516_v53  ;;  %v2382_v22 = vpop.f32.mrf.mxu2  ;;  %vm6352_vm9 = vcmp.ne.s32.totalorder %v1811_v8, %v4946_v5  ;;  %v1526_v26 = vsel %vm1494_vm7, 65537, %v4602_v34  ;;  %v3187_v4 = vunpack.c.l.b16 %v3079_v61 }
 0x1e3   : > { %v2086_v29 = vpop.f32.mrf.mxu1  ;;  %v3327_v49 = vsel %vm3235_vm5, %v3322_v45, %v6260_v9  ;;  %v2383_v10 = vadd.f32 %v2382_v22, %v6221_v63  ;;  %v1703_v7 = vshrl.u32 %v1574_v19, 16  ;;  %v1706_v51 = vshll.u32 %v1574_v19, 16 }
 0x1e4   : > { %v3584_v47 = vmax.f32 %v3552_v33, 0.0  ;;  %v1212_v30 = vpop.permute.xlu1 %1211  ;;  %4262 = vmatmul.msk.bf16.gmra.mxu3 %vm2028_vm13, %v3327_v49  ;;  %v2607_v39 = vpop.permute.xlu0 %2606  ;;  %v671_v45 = vadd.s32 248, %v4848_v41  ;;  %v1812_v22 = vunpack.c.h.b16 %v1701_v15  ;;  %v3330_v60 = vor.u32 %v3328_v0, %v6260_v9 }
 0x1e5   : > { %v1303_v2 = vsel %vm1264_vm15, %v4548_v27, %v1212_v30  ;;  %v2696_v63 = vsel %vm1264_vm15, %v4550_v32, %v2607_v39  ;;  %v1708_v57 = vrot.slane %v1706_v51, 5  ;;  %v3188_v15 = vunpack.c.h.b16 %v3079_v61 }
 0x1e6   : > { %v1354_v48 = vsel %vm1316_vm2, %v1303_v2, %v6157_v16  ;;  %v3614_v28 = vpack.c.bf16 %v3584_v47, %v3583_v21  ;;  %v2966_v21 = vpack.c.b16 %v2949_v54, %v4888_v13  ;;  %v1558_v59 = vunpack.c.l.b16 %v1526_v26 }
 0x1e7   : > { %v1851_v11 = vsel %vm1810_vm11, %v1354_v48, 0  ;;  %v3443_v40 = vpop.f32.mrf.mxu3  ;;  %vm6360_vm11 = vcmp.ne.s32.totalorder %v1812_v22, %v4949_v6  ;;  %vm6383_vm14 = vcmp.ne.s32.totalorder %v3187_v4, %v4946_v5  ;;  %v4552_v22 = vld [vmem:[#allocation2 + $0x68] sm:$0xff]  }
 0x1e8   : > { %v2263_v56 = vshrl.u32 %v1851_v11, 16  ;;  %v2266_v42 = vshll.u32 %v1851_v11, 16  ;;  %4269 = vmatmul.msk.bf16.gmra.mxu0 %vm1264_vm15, %v3614_v28  ;;  %v3517_v1 = vadd.f32 %v3443_v40, %v2383_v10  ;;  %v3081_v9 = vshrl.u32 %v2966_v21, 16  ;;  %vm1817_vm12 = vmpackc.low %vm6360_vm11, %vm6352_vm9 }
 0x1e9   : > { %v3084_v25 = vshll.u32 %v2966_v21, 16  ;;  %v1978_v61 = vsel %vm1264_vm15, %v4552_v22, %v6326_v37 }
 0x1ea   : > { %v2265_v52 = vrot.slane %v2263_v56, 3  ;;  %v2268_v12 = vrot.slane %v2266_v42, 4  ;;  %v2384_v23 = vpop.f32.mrf.mxu2  ;;  %v3553_v47 = vadd.f32 %v6128_v38, %v3517_v1  ;;  %v6394_v54 = vrot.slane %v3081_v9, 7 }
 0x1eb   : > { %v6312_v3 = vpop.f32.mrf.mxu1  ;;  %v2385_v49 = vadd.f32 %v2384_v23, %v2086_v29  ;;  %v1705_v29 = vrot.slane %v1703_v7, 4  ;;  %v6387_v23 = vpop.permute.xlu2 %1258  ;;  %v1575_v1 = vpack.c.b16 %v4888_v13, %v1558_v59 }
 0x1ec   : > { %v2649_v53 = vpop.permute.xlu1 %2648  ;;  %v1931_v43 = vpop.permute.xlu0 %1930  ;;  %v6323_v24 = vor.u32 %v2268_v12, %v2265_v52  ;;  %v3585_v14 = vmax.f32 %v3553_v47, 0.0 }
 0x1ed   : > { %v2746_v46 = vsel %vm1316_vm2, %v2696_v63, %v2649_v53  ;;  %v2011_v33 = vsel %vm1316_vm2, %v1975_v58, %v1931_v43  ;;  %v6368_v19 = vor.u32 %v1708_v57, %v1705_v29  ;;  %v4551_v58 = vld [vmem:[#allocation2 + $0x6c] sm:$0xff]   ;;  %v1712_v37 = vshrl.u32 %v1575_v1, 16 }
 0x1ee   : > { %v6338_v18 = vsel %vm3186_vm3, %v2746_v46, 0  ;;  %4149 = vmatmul.msk.bf16.gmra.mxu1 %vm2028_vm13, %v2011_v33  ;;  %v2270_v41 = vsel %vm2154_vm8, %v6228_v62, %v6323_v24  ;;  %v893_v62 = vand.u32 15, %v671_v45  ;;  %vm6390_vm3 = vcmp.ne.s32.totalorder %v3188_v15, %v4949_v6 }
 0x1ef   : > { %v3332_v31 = vshll.u32 %v6338_v18, 16  ;;  %4169 = vmatmul.msk.bf16.gmra.mxu2 %vm2028_vm13, %v2270_v41  ;;  %v3445_v35 = vpop.f32.mrf.mxu3  ;;  %v1710_v63 = vsel %vm1576_vm6, %v6276_v44, %v6368_v19  ;;  %vm3193_vm7 = vmpackc.low %vm6390_vm3, %vm6383_vm14  ;;  %v4553_v41 = vld [vmem:[#allocation2 + $0x70] sm:$0xff]  ;;  %v3336_v26 = vshrl.u32 %v6338_v18, 16  ;;  %v1714_v15 = vrot.slane %v1712_v37, 4 }
 0x1f0   : > { %v3518_v30 = vadd.f32 %v3445_v35, %v2385_v49  ;;  %vm6375_vm1 = vcmp.le.s32.totalorder %v893_v62, 14  ;;  %v1818_v44 = vunpack.c.l.b16 %v1710_v63  ;;  %v1819_v49 = vunpack.c.h.b16 %v1710_v63 }
 0x1f1   : > { %v6357_v27 = vrot.slane %v3332_v31, 1  ;;  %vm2887_vm4 = vmpackc.low %vm6375_vm1, %vm6375_vm1 }
 0x1f2   : > { %v3554_v48 = vadd.f32 %v6128_v38, %v3518_v30  ;;  %v2387_v28 = vpop.f32.mrf.mxu2  ;;  %v2919_v33 = vsel %vm2887_vm4, 65537, %v4602_v34  ;;  %v1715_v30 = vshll.u32 %v1575_v1, 16  ;;  %vm6435_vm9 = vcmp.ne.s32.totalorder %v1818_v44, %v4946_v5 }
 0x1f3   : > { %v2091_v11 = vpop.f32.mrf.mxu1  ;;  %v3335_v40 = vsel %vm3235_vm5, %v3330_v60, %v6357_v27  ;;  %v2388_v53 = vadd.f32 %v2387_v28, %v6312_v3  ;;  %v3086_v3 = vor.u32 %v3084_v25, %v6394_v54  ;;  %v2951_v39 = vunpack.c.l.b16 %v2919_v33 }
 0x1f4   : > { %v3586_v56 = vmax.f32 %v3554_v48, 0.0  ;;  %v1214_v42 = vpop.permute.xlu1 %1213  ;;  %4263 = vmatmul.msk.bf16.gmra.mxu3 %vm2028_vm13, %v3335_v40  ;;  %v2609_v16 = vpop.permute.xlu0 %2608  ;;  %vm6440_vm11 = vcmp.ne.s32.totalorder %v1819_v49, %v4949_v6  ;;  %v3338_v9 = vor.u32 %v3336_v26, %v6357_v27 }
 0x1f5   : > { %v1306_v36 = vsel %vm1264_vm15, %v4551_v58, %v1214_v42  ;;  %v2699_v31 = vsel %vm1264_vm15, %v4553_v41, %v2609_v16  ;;  %v3087_v18 = vsel %vm2968_vm10, %v6285_v50, %v3086_v3  ;;  %v1717_v42 = vrot.slane %v1715_v30, 5  ;;  %v4555_v41 = vld [vmem:[#allocation2 + $0x70] sm:$0xff]  }
 0x1f6   : > { %v1357_v10 = vsel %vm1316_vm2, %v1306_v36, %v6272_v55  ;;  %v3615_v52 = vpack.c.bf16 %v3586_v56, %v3585_v14  ;;  %v1902_v14 = vpop.permute.xlu2 %1901  ;;  %v2967_v16 = vpack.c.b16 %v2951_v39, %v4888_v13  ;;  %v3194_v12 = vunpack.c.l.b16 %v3087_v18  ;;  %v4554_v13 = vld [vmem:[#allocation2 + $0x74] sm:$0xff]  }
 0x1f7   : > { %v1852_v8 = vsel %vm1817_vm12, %v1357_v10, 0  ;;  %v3448_v7 = vpop.f32.mrf.mxu3  ;;  %vm1824_vm12 = vmpackc.low %vm6440_vm11, %vm6435_vm9  ;;  %v6457_v51 = vor.u32 %v1717_v42, %v1714_v15 }
 0x1f8   : > { %v2272_v55 = vshrl.u32 %v1852_v8, 16  ;;  %v2275_v32 = vshll.u32 %v1852_v8, 16  ;;  %4270 = vmatmul.msk.bf16.gmra.mxu0 %vm1264_vm15, %v3615_v52  ;;  %v3519_v35 = vadd.f32 %v3448_v7, %v2388_v53  ;;  %v3195_v8 = vunpack.c.h.b16 %v3087_v18 }
 0x1f9   : > { %v3089_v25 = vshrl.u32 %v2967_v16, 16  ;;  %vm6463_vm1 = vcmp.ne.s32.totalorder %v3194_v12, %v4946_v5  ;;  %v3092_v22 = vshll.u32 %v2967_v16, 16  ;;  %v4557_v12 = vld [vmem:[#allocation2 + $0x7c] sm:$0xff]  }
 0x1fa   : > { %v2274_v43 = vrot.slane %v2272_v55, 3  ;;  %v2277_v45 = vrot.slane %v2275_v32, 4  ;;  %v2389_v46 = vpop.f32.mrf.mxu2  ;;  %v3555_v40 = vadd.f32 %v6128_v38, %v3519_v35  ;;  %vm6468_vm14 = vcmp.ne.s32.totalorder %v3195_v8, %v4949_v6 }
 0x1fb   : > { %v6408_v0 = vpop.f32.mrf.mxu1  ;;  %v2390_v62 = vadd.f32 %v2389_v46, %v2091_v11  ;;  %v6475_v33 = vrot.slane %v3089_v25, 7  ;;  %vm3200_vm3 = vmpackc.low %vm6468_vm14, %vm6463_vm1 }
 0x1fc   : > { %v2651_v34 = vpop.permute.xlu1 %2650  ;;  %v1933_v29 = vpop.permute.xlu0 %1932  ;;  %v6416_v57 = vor.u32 %v2277_v45, %v2274_v43  ;;  %v3587_v10 = vmax.f32 %v3555_v40, 0.0 }
 0x1fd   : > { %v2749_v21 = vsel %vm1316_vm2, %v2699_v31, %v2651_v34  ;;  %v2013_v47 = vsel %vm1316_vm2, %v1978_v61, %v1933_v29  ;;  %v1981_v31 = vsel %vm1264_vm15, %v4555_v41, %v1902_v14  ;;  %v4556_v29 = vld [vmem:[#allocation2 + $0x78] sm:$0xff]  ;;  %v3094_v26 = vor.u32 %v3092_v22, %v6475_v33 }
 0x1fe   : > { %v6425_v60 = vsel %vm3193_vm7, %v2749_v21, 0  ;;  %4150 = vmatmul.msk.bf16.gmra.mxu1 %vm2028_vm13, %v2013_v47  ;;  %v2279_v2 = vsel %vm2154_vm8, %v6323_v24, %v6416_v57  ;;  %v1261_v35 = vpop.permute.xlu2 %1260 }
 0x1ff   : > { %v3340_v48 = vshll.u32 %v6425_v60, 16  ;;  %4170 = vmatmul.msk.bf16.gmra.mxu2 %vm2028_vm13, %v2279_v2  ;;  %v3450_v28 = vpop.f32.mrf.mxu3  ;;  %v3344_v11 = vshrl.u32 %v6425_v60, 16  ;;  %v3095_v60 = vsel %vm2968_vm10, %v6394_v54, %v3094_v26 }
 0x200   : > { %v3520_v24 = vadd.f32 %v3450_v28, %v2390_v62 }
 0x201   : > { %v3342_v56 = vrot.slane %v3340_v48, 1 }
 0x202   : > { %v3556_v59 = vadd.f32 %v6128_v38, %v3520_v24  ;;  %v2392_v20 = vpop.f32.mrf.mxu2 }
 0x203   : > { %v2096_v58 = vpop.f32.mrf.mxu1  ;;  %v3343_v36 = vsel %vm3235_vm5, %v3338_v9, %v3342_v56  ;;  %v2393_v61 = vadd.f32 %v2392_v20, %v6408_v0  ;;  %v3346_v14 = vor.u32 %v3344_v11, %v3342_v56  ;;  %v1177_v9 = vpack.c.b16 %v5664_v17, %v5664_v17 }
 0x204   : > { %v3588_v52 = vmax.f32 %v3556_v59, 0.0  ;;  %v1216_v50 = vpop.permute.xlu1 %1215  ;;  %4264 = vmatmul.msk.bf16.gmra.mxu3 %vm2028_vm13, %v3343_v36  ;;  %v2611_v27 = vpop.permute.xlu0 %2610 }
 0x205   : > { %v1309_v7 = vsel %vm1264_vm15, %v4554_v13, %v1216_v50  ;;  %v3201_v50 = vunpack.c.l.b16 %v3095_v60 }
 0x206   : > { %v1360_v55 = vsel %vm1316_vm2, %v1309_v7, %v6387_v23  ;;  %v3616_v32 = vpack.c.bf16 %v3588_v52, %v3587_v10  ;;  %v1719_v23 = vsel %vm1576_vm6, %v6368_v19, %v6457_v51  ;;  %v2702_v19 = vsel %vm1264_vm15, %v4556_v29, %v2611_v27  ;;  %v1904_v54 = vpop.permute.xlu2 %1903 }
 0x207   : > { %v1853_v63 = vsel %vm1824_vm12, %v1360_v55, 0  ;;  %v3453_v1 = vpop.f32.mrf.mxu3  ;;  %v1825_v30 = vunpack.c.l.b16 %v1719_v23  ;;  %v1826_v2 = vunpack.c.h.b16 %v1719_v23  ;;  %v3202_v27 = vunpack.c.h.b16 %v3095_v60 }
 0x208   : > { %v2281_v53 = vshrl.u32 %v1853_v63, 16  ;;  %v2284_v43 = vshll.u32 %v1853_v63, 16  ;;  %4271 = vmatmul.msk.bf16.gmra.mxu0 %vm1264_vm15, %v3616_v32  ;;  %v3521_v37 = vadd.f32 %v3453_v1, %v2393_v61  ;;  %vm6522_vm10 = vcmp.ne.s32.totalorder %v3201_v50, %v4946_v5  ;;  %v4558_v61 = vld [vmem:[#allocation2 + $0x78] sm:$0xff]  }
 0x209   : > { %vm6500_vm6 = vcmp.ne.s32.totalorder %v1825_v30, %v4946_v5  ;;  %vm6505_vm4 = vcmp.ne.s32.totalorder %v1826_v2, %v4949_v6  ;;  %vm6527_vm9 = vcmp.ne.s32.totalorder %v3202_v27, %v4949_v6 }
 0x20a   : > { %v2283_v44 = vrot.slane %v2281_v53, 3  ;;  %v2286_v49 = vrot.slane %v2284_v43, 4  ;;  %v2394_v3 = vpop.f32.mrf.mxu2  ;;  %v3557_v18 = vadd.f32 %v6128_v38, %v3521_v37  ;;  %vm1831_vm7 = vmpackc.low %vm6505_vm4, %vm6500_vm6  ;;  %v1832_v37 = vunpack.c.l.b16 %v6457_v51 }
 0x20b   : > { %v2099_v34 = vpop.f32.mrf.mxu1  ;;  %v2395_v48 = vadd.f32 %v2394_v3, %v2096_v58  ;;  %vm3207_vm11 = vmpackc.low %vm6527_vm9, %vm6522_vm10 }
 0x20c   : > { %v2653_v21 = vpop.permute.xlu1 %2652  ;;  %v1935_v47 = vpop.permute.xlu0 %1934  ;;  %v6484_v0 = vor.u32 %v2286_v49, %v2283_v44  ;;  %v3589_v36 = vmax.f32 %v3557_v18, 0.0  ;;  %v1984_v44 = vsel %vm1264_vm15, %v4558_v61, %v1904_v54  ;;  %v4559_v49 = vld [vmem:[#allocation2 + $0x80] sm:$0xff]  ;;  %vm6554_vm12 = vcmp.ne.s32.totalorder %v1832_v37, %v4946_v5 }
 0x20d   : > { %v2752_v39 = vsel %vm1316_vm2, %v2702_v19, %v2653_v21  ;;  %v2015_v62 = vsel %vm1316_vm2, %v1981_v31, %v1935_v47  ;;  %v1833_v21 = vunpack.c.h.b16 %v6457_v51 }
 0x20e   : > { %v6489_v28 = vsel %vm3200_vm3, %v2752_v39, 0  ;;  %4151 = vmatmul.msk.bf16.gmra.mxu1 %vm2028_vm13, %v2015_v62  ;;  %v2288_v4 = vsel %vm2154_vm8, %v6416_v57, %v6484_v0  ;;  %v1263_v62 = vpop.permute.xlu2 %1262 }
 0x20f   : > { %v3348_v40 = vshll.u32 %v6489_v28, 16  ;;  %4171 = vmatmul.msk.bf16.gmra.mxu2 %vm2028_vm13, %v2288_v4  ;;  %v3455_v24 = vpop.f32.mrf.mxu3  ;;  %v3352_v2 = vshrl.u32 %v6489_v28, 16  ;;  %vm6559_vm1 = vcmp.ne.s32.totalorder %v1833_v21, %v4949_v6 }
 0x210   : > { %v3522_v15 = vadd.f32 %v3455_v24, %v2395_v48  ;;  %vm1838_vm14 = vmpackc.low %vm6559_vm1, %vm6554_vm12 }
 0x211   : > { %v3350_v42 = vrot.slane %v3348_v40, 1 }
 0x212   : > { %v3558_v16 = vadd.f32 %v6128_v38, %v3522_v15  ;;  %v2397_v59 = vpop.f32.mrf.mxu2 }
 0x213   : > { %v2101_v20 = vpop.f32.mrf.mxu1  ;;  %v3351_v58 = vsel %vm3235_vm5, %v3346_v14, %v3350_v42  ;;  %v2398_v43 = vadd.f32 %v2397_v59, %v2099_v34  ;;  %v3354_v11 = vor.u32 %v3352_v2, %v3350_v42  ;;  %v2484_v42 = vld [vmem:[#allocation2 + $0x88] sm:$0x1] }
 0x214   : > { %v3590_v10 = vmax.f32 %v3558_v16, 0.0  ;;  %v1218_v56 = vpop.permute.xlu1 %1217  ;;  %4265 = vmatmul.msk.bf16.gmra.mxu3 %vm2028_vm13, %v3351_v58  ;;  %v2613_v52 = vpop.permute.xlu0 %2612  ;;  %v3209_v58 = vunpack.c.h.b16 %v6475_v33 }
 0x215   : > { %v1312_v8 = vsel %vm1264_vm15, %v4557_v12, %v1218_v56  ;;  %v2705_v3 = vsel %vm1264_vm15, %v4559_v49, %v2613_v52 }
 0x216   : > { %v1363_v13 = vsel %vm1316_vm2, %v1312_v8, %v1261_v35  ;;  %v3617_v7 = vpack.c.bf16 %v3590_v10, %v3589_v36  ;;  %v2556_v10 = vunpack.c.l.b16 %v2484_v42  ;;  %vm6583_vm6 = vcmp.ne.s32.totalorder %v3209_v58, %v4949_v6  ;;  %v1906_v8 = vpop.permute.xlu2 %1905 }
 0x217   : > { %v1854_v25 = vsel %vm1831_vm7, %v1363_v13, 0  ;;  %v3458_v55 = vpop.f32.mrf.mxu3 }
 0x218   : > { %v2290_v32 = vshrl.u32 %v1854_v25, 16  ;;  %v2293_v63 = vshll.u32 %v1854_v25, 16  ;;  %4272 = vmatmul.msk.bf16.gmra.mxu0 %vm1264_vm15, %v3617_v7  ;;  %v3523_v41 = vadd.f32 %v3458_v55, %v2398_v43  ;;  %v2573_v55 = vpack.c.b16 %v2556_v10, %v2556_v10 }
 0x21a   : > { %v2292_v45 = vrot.slane %v2290_v32, 3  ;;  %v2295_v46 = vrot.slane %v2293_v63, 4  ;;  %v2399_v23 = vpop.f32.mrf.mxu2  ;;  %v3559_v4 = vadd.f32 %v6128_v38, %v3523_v41 }
 0x21b   : > { %v2104_v22 = vpop.f32.mrf.mxu1  ;;  %v2400_v47 = vadd.f32 %v2399_v23, %v2101_v20  ;;  %v3208_v20 = vunpack.c.l.b16 %v6475_v33 }
 0x21c   : > { %v2655_v31 = vpop.permute.xlu1 %2654  ;;  %v1937_v35 = vpop.permute.xlu0 %1936  ;;  %v6537_v29 = vor.u32 %v2295_v46, %v2292_v45  ;;  %v3591_v57 = vmax.f32 %v3559_v4, 0.0 }
 0x21d   : > { %v2755_v34 = vsel %vm1316_vm2, %v2705_v3, %v2655_v31  ;;  %v2017_v19 = vsel %vm1316_vm2, %v1984_v44, %v1937_v35  ;;  %vm6578_vm3 = vcmp.ne.s32.totalorder %v3208_v20, %v4946_v5  ;;  %v4560_v5 = vld [vmem:[#allocation2 + $0x80] sm:$0xff]  }
 0x21e   : > { %v6543_v30 = vsel %vm3207_vm11, %v2755_v34, 0  ;;  %4152 = vmatmul.msk.bf16.gmra.mxu1 %vm2028_vm13, %v2017_v19  ;;  %v2297_v39 = vsel %vm2154_vm8, %v6484_v0, %v6537_v29  ;;  %vm3214_vm4 = vmpackc.low %vm6583_vm6, %vm6578_vm3  ;;  %v1987_v1 = vsel %vm1264_vm15, %v4560_v5, %v1906_v8 }
 0x21f   : > { %v3356_v26 = vshll.u32 %v6543_v30, 16  ;;  %4172 = vmatmul.msk.bf16.gmra.mxu2 %vm2028_vm13, %v2297_v39  ;;  %v3460_v48 = vpop.f32.mrf.mxu3  ;;  %v3360_v3 = vshrl.u32 %v6543_v30, 16 }
 0x220   : > { %v3524_v51 = vadd.f32 %v3460_v48, %v2400_v47 }
 0x221   : > { %v3358_v40 = vrot.slane %v3356_v26, 1 }
 0x222   : > { %v3560_v28 = vadd.f32 %v6128_v38, %v3524_v51  ;;  %v2402_v18 = vpop.f32.mrf.mxu2 }
 0x223   : > { %v2106_v15 = vpop.f32.mrf.mxu1  ;;  %v3359_v14 = vsel %vm3235_vm5, %v3354_v11, %v3358_v40  ;;  %v2403_v13 = vadd.f32 %v2402_v18, %v2104_v22  ;;  %v3362_v19 = vor.u32 %v3360_v3, %v3358_v40 }
 0x224   : > { %v3592_v60 = vmax.f32 %v3560_v28, 0.0  ;;  %v1220_v16 = vpop.permute.xlu1 %1219  ;;  %4266 = vmatmul.msk.bf16.gmra.mxu3 %vm2028_vm13, %v3359_v14  ;;  %v2615_v59 = vpop.permute.xlu0 %2614 }
 0x225   : > { %v1315_v17 = vsel %vm1264_vm15, %v1177_v9, %v1220_v16  ;;  %v2708_v6 = vsel %vm1264_vm15, %v2573_v55, %v2615_v59 }
 0x226   : > { %v1366_v36 = vsel %vm1316_vm2, %v1315_v17, %v1263_v62  ;;  %v3618_v56 = vpack.c.bf16 %v3592_v60, %v3591_v57  ;;  %v3846_v60 = vld [vmem:[%s7048_s7 + $0x8] sm:$0xff] }
 0x227   : > { %v1855_v52 = vsel %vm1838_vm14, %v1366_v36, 0  ;;  %v3463_v50 = vpop.f32.mrf.mxu3  ;;  %3864 = vmatpush.msra.mxu1 %v3846_v60 }
 0x228   : > { %v2299_v27 = vshrl.u32 %v1855_v52, 16  ;;  %v2302_v54 = vshll.u32 %v1855_v52, 16  ;;  %4273 = vmatmul.msk.bf16.gmra.mxu0 %vm1264_vm15, %v3618_v56  ;;  %v3525_v53 = vadd.f32 %v3463_v50, %v2403_v13 }
 0x22a   : > { %v2301_v7 = vrot.slane %v2299_v27, 3  ;;  %v2304_v25 = vrot.slane %v2302_v54, 4  ;;  %v2404_v32 = vpop.f32.mrf.mxu2  ;;  %v3561_v35 = vadd.f32 %v6128_v38, %v3525_v53 }
 0x22b   : > { %v2109_v63 = vpop.f32.mrf.mxu1  ;;  %v2405_v61 = vadd.f32 %v2404_v32, %v2106_v15 }
 0x22c   : > { %v2657_v43 = vpop.permute.xlu1 %2656  ;;  %v1939_v45 = vpop.permute.xlu0 %1938  ;;  %v2305_v46 = vor.u32 %v2304_v25, %v2301_v7  ;;  %v3593_v2 = vmax.f32 %v3561_v35, 0.0 }
 0x22d   : > { %v2758_v23 = vsel %vm1316_vm2, %v2708_v6, %v2657_v43  ;;  %v2019_v22 = vsel %vm1316_vm2, %v1987_v1, %v1939_v45  ;;  %vm3876_vm2 = vcmask 1040384  }
 0x22e   : > { %v3231_v44 = vsel %vm3214_vm4, %v2758_v23, 0  ;;  %4153 = vmatmul.msk.bf16.gmra.mxu1 %vm2028_vm13, %v2019_v22  ;;  %v2306_v49 = vsel %vm2154_vm8, %v6537_v29, %v2305_v46 }
 0x22f   : > { %v3364_v41 = vshll.u32 %v3231_v44, 16  ;;  %4173 = vmatmul.msk.bf16.gmra.mxu2 %vm2028_vm13, %v2306_v49  ;;  %v3465_v31 = vpop.f32.mrf.mxu3 }
 0x230   : > { %v3526_v34 = vadd.f32 %v3465_v31, %v2405_v61 }
 0x231   : > { %v3366_v37 = vrot.slane %v3364_v41, 1 }
 0x232   : > { %v3562_v21 = vadd.f32 %v6128_v38, %v3526_v34  ;;  %v2407_v47 = vpop.f32.mrf.mxu2 }
 0x233   : > { %v2111_v39 = vpop.f32.mrf.mxu1  ;;  %v3367_v62 = vsel %vm3235_vm5, %v3362_v19, %v3366_v37  ;;  %v2408_v48 = vadd.f32 %v2407_v47, %v2109_v63 }
 0x234   : > { %v3594_v26 = vmax.f32 %v3562_v21, 0.0  ;;  %4267 = vmatmul.msk.bf16.gmra.mxu3 %vm2028_vm13, %v3367_v62 }
 0x236   : > { %v3619_v29 = vpack.c.bf16 %v3594_v26, %v3593_v2 }
 0x237   : > { %v3468_v30 = vpop.f32.mrf.mxu3 }
 0x238   : > { %4274 = vmatmul.msk.bf16.gmra.mxu0 %vm1264_vm15, %v3619_v29  ;;  %v3527_v11 = vadd.f32 %v3468_v30, %v2408_v48 }
 0x23a   : > { %v2409_v4 = vpop.f32.mrf.mxu2  ;;  %v3563_v0 = vadd.f32 %v6128_v38, %v3527_v11 }
 0x23b   : > { %v2114_v51 = vpop.f32.mrf.mxu1  ;;  %v2410_v40 = vadd.f32 %v2409_v4, %v2111_v39 }
 0x23c   : > { %v3595_v14 = vmax.f32 %v3563_v0, 0.0 }
 0x23f   : > { %v3470_v24 = vpop.f32.mrf.mxu3 }
 0x240   : > { %v3528_v28 = vadd.f32 %v3470_v24, %v2410_v40 }
 0x242   : > { %v3564_v18 = vadd.f32 %v6128_v38, %v3528_v28  ;;  %v2412_v15 = vpop.f32.mrf.mxu2 }
 0x243   : > { %v2116_v9 = vpop.f32.mrf.mxu1  ;;  %v2413_v59 = vadd.f32 %v2412_v15, %v2114_v51 }
 0x244   : > { %v3596_v42 = vmax.f32 %v3564_v18, 0.0 }
 0x246   : > { %v3620_v57 = vpack.c.bf16 %v3596_v42, %v3595_v14 }
 0x247   : > { %v3473_v16 = vpop.f32.mrf.mxu3 }
 0x248   : > { %4275 = vmatmul.msk.bf16.gmra.mxu0 %vm1264_vm15, %v3620_v57  ;;  %v3529_v17 = vadd.f32 %v3473_v16, %v2413_v59 }
 0x24a   : > { %v2414_v20 = vpop.f32.mrf.mxu2  ;;  %v3565_v56 = vadd.f32 %v6128_v38, %v3529_v17 }
 0x24b   : > { %v2119_v58 = vpop.f32.mrf.mxu1  ;;  %v2415_v36 = vadd.f32 %v2414_v20, %v2116_v9 }
 0x24c   : > { %v3597_v12 = vmax.f32 %v3565_v56, 0.0 }
 0x24f   : > { %v3475_v10 = vpop.f32.mrf.mxu3 }
 0x250   : > { %v3530_v52 = vadd.f32 %v3475_v10, %v2415_v36 }
 0x252   : > { %v3566_v50 = vadd.f32 %v6128_v38, %v3530_v52  ;;  %v2417_v27 = vpop.f32.mrf.mxu2 }
 0x253   : > { %v2121_v54 = vpop.f32.mrf.mxu1  ;;  %v2418_v25 = vadd.f32 %v2417_v27, %v2119_v58 }
 0x254   : > { %v3598_v33 = vmax.f32 %v3566_v50, 0.0 }
 0x255   : > { %v6613_v8 = vpop.f32.mrf.mxu0 }
 0x256   : > { %v3621_v13 = vpack.c.bf16 %v3598_v33, %v3597_v12 }
 0x257   : > { %v3478_v7 = vpop.f32.mrf.mxu3 }
 0x258   : > { %4276 = vmatmul.msk.bf16.gmra.mxu0 %vm1264_vm15, %v3621_v13  ;;  %v3531_v63 = vadd.f32 %v3478_v7, %v2418_v25 }
 0x25a   : > { %v2419_v55 = vpop.f32.mrf.mxu2  ;;  %v3567_v53 = vadd.f32 %v6128_v38, %v3531_v63 }
 0x25b   : > { %v2124_v32 = vpop.f32.mrf.mxu1  ;;  %v2420_v1 = vadd.f32 %v2419_v55, %v2121_v54 }
 0x25c   : > { %v3599_v22 = vmax.f32 %v3567_v53, 0.0 }
 0x25d   : > { %v6616_v5 = vpop.f32.mrf.mxu0 }
 0x25f   : > { %v3480_v6 = vpop.f32.mrf.mxu3 }
 0x260   : > { %v3532_v43 = vadd.f32 %v3480_v6, %v2420_v1 }
 0x262   : > { %v3568_v45 = vadd.f32 %v6128_v38, %v3532_v43  ;;  %v2422_v46 = vpop.f32.mrf.mxu2 }
 0x263   : > { %v2126_v23 = vpop.f32.mrf.mxu1  ;;  %v2423_v41 = vadd.f32 %v2422_v46, %v2124_v32 }
 0x264   : > { %v3600_v61 = vmax.f32 %v3568_v45, 0.0 }
 0x265   : > { %v6620_v44 = vpop.f32.mrf.mxu0 }
 0x266   : > { %v3622_v49 = vpack.c.bf16 %v3600_v61, %v3599_v22 }
 0x267   : > { %v3483_v3 = vpop.f32.mrf.mxu3 }
 0x268   : > { %4277 = vmatmul.msk.bf16.gmra.mxu0 %vm1264_vm15, %v3622_v49  ;;  %v3533_v34 = vadd.f32 %v3483_v3, %v2423_v41 }
 0x26a   : > { %v2424_v31 = vpop.f32.mrf.mxu2  ;;  %v3569_v47 = vadd.f32 %v6128_v38, %v3533_v34 }
 0x26b   : > { %v2129_v35 = vpop.f32.mrf.mxu1  ;;  %v2425_v37 = vadd.f32 %v2424_v31, %v2126_v23 }
 0x26c   : > { %v3601_v29 = vmax.f32 %v3569_v47, 0.0 }
 0x26d   : > { %v6623_v19 = vpop.f32.mrf.mxu0 }
 0x26f   : > { %v3485_v21 = vpop.f32.mrf.mxu3 }
 0x270   : > { %v3534_v39 = vadd.f32 %v3485_v21, %v2425_v37 }
 0x272   : > { %v3570_v62 = vadd.f32 %v6128_v38, %v3534_v39  ;;  %v2427_v2 = vpop.f32.mrf.mxu2  ;;  %v6635_v38 = vld [vmem:[%s7045_s4] ss:$0 sm:$0xff] }
 0x273   : > { %v2131_v26 = vpop.f32.mrf.mxu1  ;;  %v2428_v11 = vadd.f32 %v2427_v2, %v2129_v35 }
 0x274   : > { %v3602_v30 = vmax.f32 %v3570_v62, 0.0 }
 0x275   : > { %v6627_v48 = vpop.f32.mrf.mxu0 }
 0x276   : > { %v3623_v4 = vpack.c.bf16 %v3602_v30, %v3601_v29 }
 0x277   : > { %v3488_v51 = vpop.f32.mrf.mxu3 }
 0x278   : > { %4278 = vmatmul.msk.bf16.gmra.mxu0 %vm1264_vm15, %v3623_v4  ;;  %v3535_v0 = vadd.f32 %v3488_v51, %v2428_v11 }
 0x27a   : > { %v2429_v40 = vpop.f32.mrf.mxu2  ;;  %v3571_v9 = vadd.f32 %v6635_v38, %v3535_v0 }
 0x27b   : > { %v2134_v24 = vpop.f32.mrf.mxu1  ;;  %v2430_v18 = vadd.f32 %v2429_v40, %v2131_v26 }
 0x27c   : > { %v3603_v16 = vmax.f32 %v3571_v9, 0.0 }
 0x27d   : > { %v6630_v28 = vpop.f32.mrf.mxu0 }
 0x27f   : > { %v3490_v15 = vpop.f32.mrf.mxu3 }
 0x280   : > { %v3536_v14 = vadd.f32 %v3490_v15, %v2430_v18 }
 0x282   : > { %v3572_v42 = vadd.f32 %v6635_v38, %v3536_v14  ;;  %v2432_v57 = vpop.f32.mrf.mxu2 }
 0x283   : > { %v2136_v60 = vpop.f32.mrf.mxu1  ;;  %v2433_v36 = vadd.f32 %v2432_v57, %v2134_v24 }
 0x284   : > { %v3604_v59 = vmax.f32 %v3572_v42, 0.0 }
 0x285   : > { %v6639_v20 = vpop.f32.mrf.mxu0 }
 0x286   : > { %v3624_v58 = vpack.c.bf16 %v3604_v59, %v3603_v16 }
 0x287   : > { %v3493_v17 = vpop.f32.mrf.mxu3 }
 0x288   : > { %4279 = vmatmul.msk.bf16.gmra.mxu0 %vm1264_vm15, %v3624_v58  ;;  %v3537_v52 = vadd.f32 %v3493_v17, %v2433_v36 }
 0x28a   : > { %v2434_v10 = vpop.f32.mrf.mxu2  ;;  %v3573_v12 = vadd.f32 %v6635_v38, %v3537_v52  ;;  %v3845_v52 = vld [vmem:[%s7048_s7] sm:$0xff] }
 0x28b   : > { %v2139_v56 = vpop.f32.mrf.mxu1  ;;  %v2435_v27 = vadd.f32 %v2434_v10, %v2136_v60  ;;  %3865 = vmatpush.msra.mxu1 %v3845_v52 }
 0x28c   : > { %v3605_v25 = vmax.f32 %v3573_v12, 0.0 }
 0x28d   : > { %v6642_v50 = vpop.f32.mrf.mxu0 }
 0x28f   : > { %v3495_v54 = vpop.f32.mrf.mxu3 }
 0x290   : > { %v3538_v33 = vadd.f32 %v3495_v54, %v2435_v27  ;;  %v3871_v27 = vld [vmem:[%s7049_s8] sm:$0x1] }
 0x291   : > { %4285 = vmatpush.msk.msra.mxu2 %vm3876_vm2, %v3871_v27 }
 0x292   : > { %v3574_v13 = vadd.f32 %v6635_v38, %v3538_v33  ;;  %v2437_v7 = vpop.f32.mrf.mxu2 }
 0x293   : > { %v2141_v32 = vpop.f32.mrf.mxu1  ;;  %v2438_v53 = vadd.f32 %v2437_v7, %v2139_v56 }
 0x294   : > { %v3606_v55 = vmax.f32 %v3574_v13, 0.0 }
 0x295   : > { %v6646_v63 = vpop.f32.mrf.mxu0 }
 0x296   : > { %v3625_v1 = vpack.c.bf16 %v3606_v55, %v3605_v25 }
 0x297   : > { %v3498_v6 = vpop.f32.mrf.mxu3 }
 0x298   : > { %4280 = vmatmul.msk.bf16.gmra.mxu0 %vm1264_vm15, %v3625_v1  ;;  %v3539_v45 = vadd.f32 %v3498_v6, %v2438_v53 }
 0x29a   : > { %v2439_v43 = vpop.f32.mrf.mxu2  ;;  %v3575_v49 = vadd.f32 %v6635_v38, %v3539_v45 }
 0x29b   : > { %v2440_v23 = vadd.f32 %v2439_v43, %v2141_v32  ;;  %v2144_v22 = vpop.f32.mrf.mxu1 }
 0x29c   : > { %v3607_v35 = vmax.f32 %v3575_v49, 0.0 }
 0x29d   : > { %v6649_v46 = vpop.f32.mrf.mxu0 }
 0x29f   : > { %v3500_v61 = vpop.f32.mrf.mxu3 }
 0x2a0   : > { %v3540_v3 = vadd.f32 %v3500_v61, %v2440_v23 }
 0x2a2   : > { %v3576_v41 = vadd.f32 %v6635_v38, %v3540_v3  ;;  %v2442_v31 = vpop.f32.mrf.mxu2 }
 0x2a3   : > { %v2146_v39 = vpop.f32.mrf.mxu1  ;;  %v2443_v62 = vadd.f32 %v2442_v31, %v2144_v22 }
 0x2a4   : > { %v3608_v34 = vmax.f32 %v3576_v41, 0.0 }
 0x2a5   : > { %v6653_v37 = vpop.f32.mrf.mxu0 }
 0x2a6   : > { %v3626_v21 = vpack.c.bf16 %v3608_v34, %v3607_v35 }
 0x2a7   : > { %v3503_v47 = vpop.f32.mrf.mxu3 }
 0x2a8   : > { %4281 = vmatmul.msk.bf16.gmra.mxu0 %vm1264_vm15, %v3626_v21  ;;  %v3541_v26 = vadd.f32 %v3503_v47, %v2443_v62 }
 0x2aa   : > { %v2444_v2 = vpop.f32.mrf.mxu2  ;;  %v3577_v51 = vadd.f32 %v6635_v38, %v3541_v26 }
 0x2ab   : > { %v2445_v30 = vadd.f32 %v2444_v2, %v2146_v39  ;;  %v2149_v0 = vpop.f32.mrf.mxu1 }
 0x2ac   : > { %v3609_v18 = vmax.f32 %v3577_v51, 0.0 }
 0x2ad   : > { %v6656_v29 = vpop.f32.mrf.mxu0 }
 0x2af   : > { %v3505_v4 = vpop.f32.mrf.mxu3 }
 0x2b0   : > { %v3542_v11 = vadd.f32 %v3505_v4, %v2445_v30 }
 0x2b2   : > { %v3578_v40 = vadd.f32 %v6635_v38, %v3542_v11  ;;  %v2447_v24 = vpop.f32.mrf.mxu2 }
 0x2b3   : > { %v2448_v57 = vadd.f32 %v2447_v24, %v2149_v0  ;;  %v2151_v59 = vpop.f32.mrf.mxu1 }
 0x2b4   : > { %v3610_v15 = vmax.f32 %v3578_v40, 0.0 }
 0x2b5   : > { %v6660_v9 = vpop.f32.mrf.mxu0 }
 0x2b6   : > { %v3627_v14 = vpack.c.bf16 %v3610_v15, %v3609_v18 }
 0x2b7   : > { %v3508_v42 = vpop.f32.mrf.mxu3 }
 0x2b8   : > { %4282 = vmatmul.msk.bf16.gmra.mxu0 %vm1264_vm15, %v3627_v14  ;;  %v3543_v16 = vadd.f32 %v3508_v42, %v2448_v57 }
 0x2ba   : > { %v2449_v60 = vpop.f32.mrf.mxu2  ;;  %v3579_v10 = vadd.f32 %v6635_v38, %v3543_v16 }
 0x2bb   : > { %v2450_v17 = vadd.f32 %v2449_v60, %v2151_v59 }
 0x2bc   : > { %v3611_v12 = vmax.f32 %v3579_v10, 0.0 }
 0x2bd   : > { %v6663_v58 = vpop.f32.mrf.mxu0 }
 0x2bf   : > { %v3510_v36 = vpop.f32.mrf.mxu3 }
 0x2c0   : > { %v3544_v56 = vadd.f32 %v3510_v36, %v2450_v17 }
 0x2c2   : > { %v3580_v54 = vadd.f32 %v6635_v38, %v3544_v56  ;;  %v6683_v38 = vld [vmem:[%s7047_s6] ss:$0 sm:$0xff] }
 0x2c3   : > { %v6689_v22 = vadd.f32 %v6683_v38, %v6616_v5  ;;  %v6693_v61 = vadd.f32 %v6683_v38, %v6613_v8  ;;  %v6697_v49 = vadd.f32 %v6683_v38, %v6620_v44  ;;  %v6703_v41 = vadd.f32 %v6683_v38, %v6623_v19 }
 0x2c4   : > { %v3612_v33 = vmax.f32 %v3580_v54, 0.0  ;;  %v6711_v8 = vadd.f32 %v6683_v38, %v6627_v48  ;;  %v6719_v19 = vadd.f32 %v6683_v38, %v6630_v28  ;;  %v6725_v39 = vadd.f32 %v6683_v38, %v6639_v20 }
 0x2c5   : > { %v3730_v13 = vpop.f32.mrf.mxu0  ;;  %v3776_v3 = vsel %vm396_vm0, %v6689_v22, 0.0  ;;  %v3775_v31 = vsel %vm396_vm0, %v6693_v61, 0.0  ;;  %v3778_v5 = vsel %vm396_vm0, %v6697_v49, 0.0  ;;  %v3780_v34 = vsel %vm396_vm0, %v6703_v41, 0.0 }
 0x2c6   : > { %v3628_v7 = vpack.c.bf16 %v3612_v33, %v3611_v12  ;;  %v3777_v35 = vadd.f32 %v3776_v3, %v3775_v31  ;;  %v3782_v47 = vsel %vm396_vm0, %v6711_v8, 0.0  ;;  %v3784_v62 = vsel %vm396_vm0, %v6719_v19, 0.0 }
 0x2c7   : > { %v6731_v2 = vadd.f32 %v6683_v38, %v6642_v50  ;;  %v3786_v28 = vsel %vm396_vm0, %v6725_v39, 0.0  ;;  %v6737_v30 = vadd.f32 %v6683_v38, %v6646_v63  ;;  %v6743_v11 = vadd.f32 %v6683_v38, %v6649_v46 }
 0x2c8   : > { %4283 = vmatmul.msk.bf16.gmra.mxu0 %vm1264_vm15, %v3628_v7  ;;  %v3779_v21 = vadd.f32 %v3778_v5, %v3777_v35  ;;  %v6749_v24 = vadd.f32 %v6683_v38, %v6653_v37  ;;  %v6755_v18 = vadd.f32 %v6683_v38, %v6656_v29  ;;  %v6761_v14 = vadd.f32 %v6683_v38, %v6660_v9 }
 0x2c9   : > { %v3788_v20 = vsel %vm396_vm0, %v6731_v2, 0.0  ;;  %v3790_v50 = vsel %vm396_vm0, %v6737_v30, 0.0  ;;  %v3792_v63 = vsel %vm396_vm0, %v6743_v11, 0.0  ;;  %v6767_v60 = vadd.f32 %v6683_v38, %v6663_v58 }
 0x2ca   : > { %v3781_v48 = vadd.f32 %v3780_v34, %v3779_v21  ;;  %v3794_v46 = vsel %vm396_vm0, %v6749_v24, 0.0  ;;  %v3796_v37 = vsel %vm396_vm0, %v6755_v18, 0.0  ;;  %v3798_v29 = vsel %vm396_vm0, %v6761_v14, 0.0 }
 0x2cb   : > { %v6772_v59 = vadd.f32 %v6683_v38, %v3730_v13  ;;  %v3800_v9 = vsel %vm396_vm0, %v6767_v60, 0.0  ;;  %vm3872_vm15 = vcmask 7168  }
 0x2cc   : > { %v3783_v26 = vadd.f32 %v3782_v47, %v3781_v48 }
 0x2cd   : > { %v3732_v25 = vpop.f32.mrf.mxu0  ;;  %v3802_v56 = vsel %vm396_vm0, %v6772_v59, 0.0 }
 0x2ce   : > { %v3785_v4 = vadd.f32 %v3784_v62, %v3783_v26  ;;  %v6777_v36 = vadd.f32 %v6683_v38, %v3732_v25 }
 0x2d0   : > { %v3787_v40 = vadd.f32 %v3786_v28, %v3785_v4  ;;  %v3804_v54 = vsel %vm396_vm0, %v6777_v36, 0.0 }
 0x2d2   : > { %v3789_v0 = vadd.f32 %v3788_v20, %v3787_v40 }
 0x2d4   : > { %v3791_v15 = vadd.f32 %v3790_v50, %v3789_v0 }
 0x2d5   : > { %v3735_v55 = vpop.f32.mrf.mxu0 }
 0x2d6   : > { %v3793_v42 = vadd.f32 %v3792_v63, %v3791_v15  ;;  %v6782_v58 = vadd.f32 %v6683_v38, %v3735_v55 }
 0x2d8   : > { %v3795_v16 = vadd.f32 %v3794_v46, %v3793_v42  ;;  %v3806_v13 = vsel %vm396_vm0, %v6782_v58, 0.0 }
 0x2da   : > { %v3797_v17 = vadd.f32 %v3796_v37, %v3795_v16 }
 0x2dc   : > { %v3799_v10 = vadd.f32 %v3798_v29, %v3797_v17 }
 0x2dd   : > { %v3737_v32 = vpop.f32.mrf.mxu0 }
 0x2de   : > { %v3801_v52 = vadd.f32 %v3800_v9, %v3799_v10  ;;  %v6787_v12 = vadd.f32 %v6683_v38, %v3737_v32 }
 0x2e0   : > { %v3803_v33 = vadd.f32 %v3802_v56, %v3801_v52  ;;  %v3808_v55 = vsel %vm396_vm0, %v6787_v12, 0.0 }
 0x2e2   : > { %v3805_v25 = vadd.f32 %v3804_v54, %v3803_v33 }
 0x2e4   : > { %v3807_v31 = vadd.f32 %v3806_v13, %v3805_v25 }
 0x2e5   : > { %v3740_v1 = vpop.f32.mrf.mxu0 }
 0x2e6   : > { %v6792_v7 = vadd.f32 %v6683_v38, %v3740_v1  ;;  %v3809_v35 = vadd.f32 %v3808_v55, %v3807_v31 }
 0x2e8   : > { %v3810_v5 = vsel %vm396_vm0, %v6792_v7, 0.0 }
 0x2e9   : > { %v3811_v47 = vadd.f32 %v3810_v5, %v3809_v35 }
 0x2ed   : > { %v3742_v6 = vpop.f32.mrf.mxu0 }
 0x2ee   : > { %v6797_v3 = vadd.f32 %v6683_v38, %v3742_v6 }
 0x2f0   : > { %v3812_v1 = vsel %vm396_vm0, %v6797_v3, 0.0 }
 0x2f1   : > { %v3813_v62 = vadd.f32 %v3812_v1, %v3811_v47 }
 0x2f5   : > { %v6674_v53 = vpop.f32.mrf.mxu0 }
 0x2f6   : > { %v6803_v32 = vadd.f32 %v6683_v38, %v6674_v53 }
 0x2f8   : > { %v3814_v6 = vsel %vm396_vm0, %v6803_v32, 0.0 }
 0x2f9   : > { %v3815_v28 = vadd.f32 %v3814_v6, %v3813_v62 }
 0x2fd   : > { %v6676_v43 = vpop.f32.mrf.mxu0 }
 0x2fe   : > { %v6809_v21 = vadd.f32 %v6683_v38, %v6676_v43 }
 0x300   : > { %v3816_v53 = vsel %vm396_vm0, %v6809_v21, 0.0 }
 0x301   : > { %v3817_v20 = vadd.f32 %v3816_v53, %v3815_v28 }
 0x305   : > { %v6678_v45 = vpop.f32.mrf.mxu0 }
 0x306   : > { %v6815_v48 = vadd.f32 %v6683_v38, %v6678_v45 }
 0x308   : > { %v3818_v43 = vsel %vm396_vm0, %v6815_v48, 0.0 }
 0x309   : > { %v3819_v0 = vadd.f32 %v3818_v43, %v3817_v20 }
 0x30d   : > { %v6685_v23 = vpop.f32.mrf.mxu0 }
 0x30e   : > { %v6821_v26 = vadd.f32 %v6683_v38, %v6685_v23 }
 0x310   : > { %v3820_v45 = vsel %vm396_vm0, %v6821_v26, 0.0 }
 0x311   : > { %v3821_v15 = vadd.f32 %v3820_v45, %v3819_v0 }
 0x315   : > { %v6713_v44 = vpop.f32.mrf.mxu0 }
 0x316   : > { %v6827_v4 = vadd.f32 %v6683_v38, %v6713_v44 }
 0x318   : > { %v3822_v23 = vsel %vm396_vm0, %v6827_v4, 0.0 }
 0x319   : > { %v3823_v42 = vadd.f32 %v3822_v23, %v3821_v15 }
 0x31d   : > { %v3757_v51 = vpop.f32.mrf.mxu0 }
 0x31e   : > { %v6832_v50 = vadd.f32 %v6683_v38, %v3757_v51 }
 0x320   : > { %v3824_v44 = vsel %vm396_vm0, %v6832_v50, 0.0 }
 0x321   : > { %v3825_v16 = vadd.f32 %v3824_v44, %v3823_v42 }
 0x325   : > { %v3760_v57 = vpop.f32.mrf.mxu0 }
 0x326   : > { %v6837_v63 = vadd.f32 %v6683_v38, %v3760_v57 }
 0x328   : > { %v3826_v37 = vsel %vm396_vm0, %v6837_v63, 0.0 }
 0x329   : > { %v3827_v9 = vadd.f32 %v3826_v37, %v3825_v16 }
 0x32d   : > { %v3762_v27 = vpop.f32.mrf.mxu0 }
 0x32e   : > { %v6842_v46 = vadd.f32 %v6683_v38, %v3762_v27 }
 0x330   : > { %v3828_v57 = vsel %vm396_vm0, %v6842_v46, 0.0 }
 0x331   : > { %v3829_v52 = vadd.f32 %v3828_v57, %v3827_v9 }
 0x335   : > { %v3765_v34 = vpop.f32.mrf.mxu0 }
 0x336   : > { %v6847_v51 = vadd.f32 %v6683_v38, %v3765_v34 }
 0x338   : > { %v3830_v10 = vsel %vm396_vm0, %v6847_v51, 0.0 }
 0x339   : > { %v3831_v54 = vadd.f32 %v3830_v10, %v3829_v52 }
 0x33d   : > { %v3767_v40 = vpop.f32.mrf.mxu0 }
 0x33e   : > { %v6852_v17 = vadd.f32 %v6683_v38, %v3767_v40 }
 0x340   : > { %v3832_v27 = vsel %vm396_vm0, %v6852_v17, 0.0 }
 0x341   : > { %v3833_v13 = vadd.f32 %v3832_v27, %v3831_v54 }
 0x345   : > { %v3770_v29 = vpop.f32.mrf.mxu0 }
 0x346   : > { %v6857_v56 = vadd.f32 %v6683_v38, %v3770_v29 }
 0x348   : > { %v3834_v33 = vsel %vm396_vm0, %v6857_v56, 0.0 }
 0x349   : > { %v3835_v31 = vadd.f32 %v3834_v33, %v3833_v13 }
 0x34d   : > { %v3772_v25 = vpop.f32.mrf.mxu0 }
 0x34e   : > { %v6864_v55 = vadd.f32 %v6683_v38, %v3772_v25 }
 0x350   : > { %v3836_v5 = vsel %vm396_vm0, %v6864_v55, 0.0 }
 0x351   : > { %v3837_v35 = vadd.f32 %v3836_v5, %v3835_v31  ;;  %v4562_v5 = vld [vmem:[%s4675_s16] sm:$0xff] }
 0x353   : > { %v3838_v34 = vrot.slane %v3837_v35, 4 }
 0x355   : > { %v3839_v1 = vadd.f32 %v3838_v34, %v3837_v35  ;;  %v4563_v35 = vld [vmem:[%s4675_s16 + $0x8] sm:$0xff] }
 0x357   : > { %v3840_v47 = vrot.slane %v3839_v1, 2 }
 0x359   : > { %v3841_v6 = vadd.f32 %v3840_v47, %v3839_v1  ;;  %v4565_v47 = vld [vmem:[%s4675_s16 + $0x18] sm:$0xff] }
 0x35b   : > { %v3842_v62 = vrot.slane %v3841_v6, 1 }
 0x35d   : > { %v3843_v53 = vadd.f32 %v3842_v62, %v3841_v6  ;;  %v4566_v6 = vld [vmem:[%s4675_s16 + $0x20] sm:$0xff] }
 0x35f   : > { %v3844_v28 = vmul.f32 0.00390625, %v3843_v53  ;;  %v4567_v53 = vld [vmem:[%s4675_s16 + $0x28] sm:$0xff] }
 0x361   : > { %4284 = vmatmul.msk.f32.vlgmr.msra.gmra.mxu1 %vm396_vm0, %v3844_v28 }
 0x3de   : > { %v3867_v43 = vpop.f32.mrf.mxu1 }
 0x3df   : > { %v3870_v20 = vmax.f32 %v3867_v43, 0.0 }
 0x3e1   : > { %4286 = vmatmul.msk.f32.vlgmr.msra.gmra.mxu2 %vm3872_vm15, %v3870_v20 }
 0x464   : > { %v3897_v38 = vpop.f32.mrf.mxu2 }
 0x465   : > { %v4287_v40 = vmul.f32 -1.442695, %v3897_v38 }
 0x467   : > { %4518 = vpow2.f32 %v4287_v40 }
 0x46d   : > { %v4519_v45 = vpop.eup %4518 }
 0x46e   : > { %v3903_v0 = vadd.f32 1.0, %v4519_v45 }
 0x470   : > { %4520 = vrcp.f32 %v3903_v0  ;;  %v3915_v16 = vand.u32 2147483648, %v3903_v0  ;;  %vm3909_vm13 = vweird.f32 %v3903_v0  ;;  %v3913_v29 = vand.u32 2147483647, %v3903_v0 }
 0x472   : > { %v3916_v9 = vor.u32 1.1754944e-38, %v3915_v16  ;;  %vm3914_vm7 = vcmp.eq.f32.partialorder %v3913_v29, 8.507059e+37  ;;  %v4571_v16 = vld [vmem:[%s4675_s16 + $0x48] sm:$0xff] }
 0x476   : > { %v4521_v23 = vpop.eup %4520 }
 0x477   : > { %v3905_v15 = vmul.f32 %v4521_v23, %v3903_v0  ;;  %vm3910_vm8 = vweird.f32 %v4521_v23  ;;  %v4569_v0 = vld [vmem:[%s4675_s16 + $0x38] sm:$0xff] }
 0x478   : > { %vm3911_vm5 = vmor %vm3909_vm13, %vm3910_vm8 }
 0x479   : > { %v3906_v44 = vsub.f32 1.0, %v3905_v15  ;;  %v4570_v15 = vld [vmem:[%s4675_s16 + $0x40] sm:$0xff] }
 0x47b   : > { %v3907_v42 = vmul.f32 %v4521_v23, %v3906_v44 }
 0x47d   : > { %v3908_v37 = vadd.f32 %v4521_v23, %v3907_v42 }
 0x47f   : > { %v3912_v57 = vsel %vm3911_vm5, %v4521_v23, %v3908_v37 }
 0x480   : > { %v3917_v10 = vsel %vm3914_vm7, %v3916_v9, %v3912_v57  ;;  %v4572_v57 = vld [vmem:[%s4675_s16 + $0x50] sm:$0xff] }
 0x481   : > { %v6869_v52 = vperm.slane %v3917_v10, 0 }
 0x483   : > { %v3920_v27 = vmul.f32 %v6869_v52, %v6693_v61  ;;  %v3921_v54 = vmul.f32 %v6869_v52, %v6689_v22  ;;  %v3922_v33 = vmul.f32 %v6869_v52, %v6697_v49  ;;  %v3923_v13 = vmul.f32 %v6869_v52, %v6703_v41  ;;  %v4564_v49 = vld [vmem:[%s4675_s16 + $0x10] sm:$0xff] }
 0x484   : > { %v3924_v25 = vmul.f32 %v6869_v52, %v6711_v8  ;;  %v3925_v31 = vmul.f32 %v6869_v52, %v6719_v19  ;;  %v3926_v61 = vmul.f32 %v6869_v52, %v6725_v39  ;;  %v3927_v41 = vmul.f32 %v6869_v52, %v6731_v2 }
 0x485   : > { %v3952_v22 = vadd.f32 %v4562_v5, %v3920_v27  ;;  %v3953_v34 = vadd.f32 %v4563_v35, %v3921_v54  ;;  %v3954_v1 = vadd.f32 %v4564_v49, %v3922_v33  ;;  %v3955_v8 = vadd.f32 %v4565_v47, %v3923_v13  ;;  %v4573_v27 = vld [vmem:[%s4675_s16 + $0x58] sm:$0xff]  ;;  %v4574_v13 = vld [vmem:[%s4675_s16 + $0x60] sm:$0xff]  ;;  %v4576_v35 = vld [vmem:[%s4675_s16 + $0x70] sm:$0xff] }
 0x486   : > { %v3928_v19 = vmul.f32 %v6869_v52, %v6737_v30  ;;  %v3956_v62 = vadd.f32 %v4566_v6, %v3924_v25  ;;  %v3929_v39 = vmul.f32 %v6869_v52, %v6743_v11  ;;  %v3930_v2 = vmul.f32 %v6869_v52, %v6749_v24  ;;  %v4568_v30 = vld [vmem:[%s4675_s16 + $0x30] sm:$0xff] }
 0x487   : > { %v3957_v28 = vadd.f32 %v4567_v53, %v3925_v31  ;;  %v3958_v43 = vadd.f32 %v4568_v30, %v3926_v61  ;;  %v3984_v20 = vmax.f32 %v3952_v22, 0.0  ;;  %v3985_v38 = vmax.f32 %v3953_v34, 0.0  ;;  %v4575_v61 = vld [vmem:[%s4675_s16 + $0x68] sm:$0xff]  ;;  %v4580_v53 = vld [vmem:[%s4675_s16 + $0x90] sm:$0xff] }
 0x488   : > { %v3986_v40 = vmax.f32 %v3954_v1, 0.0  ;;  %v3931_v45 = vmul.f32 %v6869_v52, %v6755_v18  ;;  %v3959_v23 = vadd.f32 %v4569_v0, %v3927_v41  ;;  %v3987_v11 = vmax.f32 %v3955_v8, 0.0  ;;  %v4577_v1 = vld [vmem:[%s4675_s16 + $0x78] sm:$0xff]  ;;  %v4578_v8 = vld [vmem:[%s4675_s16 + $0x80] sm:$0xff] }
 0x489   : > { %v3932_v24 = vmul.f32 %v6869_v52, %v6761_v14  ;;  %v3960_v44 = vadd.f32 %v4570_v15, %v3928_v19  ;;  %v3988_v42 = vmax.f32 %v3956_v62, 0.0  ;;  %4016 = vst.msk [vmem:[%s6899_s17] sm:$0xff] %vm396_vm0, %v3984_v20  ;;  %v3933_v37 = vmul.f32 %v6869_v52, %v6767_v60  ;;  %v4579_v62 = vld [vmem:[%s4675_s16 + $0x88] sm:$0xff]  ;;  %v4584_v15 = vld [vmem:[%s4675_s16 + $0xb0] sm:$0xff] }
 0x48a   : > { %v3961_v18 = vadd.f32 %v4571_v16, %v3929_v39  ;;  %v3989_v29 = vmax.f32 %v3957_v28, 0.0  ;;  %4017 = vst.msk [vmem:[%s6899_s17 + $0x8] sm:$0xff] %vm396_vm0, %v3985_v38  ;;  %v3934_v14 = vmul.f32 %v6869_v52, %v6772_v59  ;;  %v3962_v9 = vadd.f32 %v4572_v57, %v3930_v2 }
 0x48b   : > { %v3990_v10 = vmax.f32 %v3958_v43, 0.0  ;;  %4018 = vst.msk [vmem:[%s6899_s17 + $0x10] sm:$0xff] %vm396_vm0, %v3986_v40  ;;  %v3935_v60 = vmul.f32 %v6869_v52, %v6777_v36  ;;  %v3963_v54 = vadd.f32 %v4573_v27, %v3931_v45  ;;  %v3991_v33 = vmax.f32 %v3959_v23, 0.0  ;;  %v4581_v43 = vld [vmem:[%s4675_s16 + $0x98] sm:$0xff]  ;;  %v4582_v40 = vld [vmem:[%s4675_s16 + $0xa0] sm:$0xff]  ;;  %v4583_v23 = vld [vmem:[%s4675_s16 + $0xa8] sm:$0xff] }
 0x48c   : > { %4019 = vst.msk [vmem:[%s6899_s17 + $0x18] sm:$0xff] %vm396_vm0, %v3987_v11  ;;  %v3936_v59 = vmul.f32 %v6869_v52, %v6782_v58  ;;  %v3964_v25 = vadd.f32 %v4574_v13, %v3932_v24  ;;  %v3992_v31 = vmax.f32 %v3960_v44, 0.0  ;;  %v3937_v36 = vmul.f32 %v6869_v52, %v6787_v12  ;;  %v4588_v27 = vld [vmem:[%s4675_s16 + $0xd0] sm:$0xff] }
 0x48d   : > { %4020 = vst.msk [vmem:[%s6899_s17 + $0x20] sm:$0xff] %vm396_vm0, %v3988_v42  ;;  %v3965_v5 = vadd.f32 %v4575_v61, %v3933_v37  ;;  %v3993_v22 = vmax.f32 %v3961_v18, 0.0  ;;  %v3938_v58 = vmul.f32 %v6869_v52, %v6792_v7  ;;  %v3966_v34 = vadd.f32 %v4576_v35, %v3934_v14  ;;  %v4585_v37 = vld [vmem:[%s4675_s16 + $0xb8] sm:$0xff]  ;;  %v4591_v61 = vld [vmem:[%s4675_s16 + $0xe8] sm:$0xff] }
 0x48e   : > { %4021 = vst.msk [vmem:[%s6899_s17 + $0x28] sm:$0xff] %vm396_vm0, %v3989_v29  ;;  %v3994_v49 = vmax.f32 %v3962_v9, 0.0  ;;  %v3939_v12 = vmul.f32 %v6869_v52, %v6797_v3  ;;  %v3967_v41 = vadd.f32 %v4577_v1, %v3935_v60  ;;  %v3995_v47 = vmax.f32 %v3963_v54, 0.0  ;;  %v4586_v29 = vld [vmem:[%s4675_s16 + $0xc0] sm:$0xff]  ;;  %v4587_v9 = vld [vmem:[%s4675_s16 + $0xc8] sm:$0xff]  ;;  %v4593_v35 = vld [vmem:[%s4675_s16 + $0xf8] sm:$0xff] }
 0x48f   : > { %4022 = vst.msk [vmem:[%s6899_s17 + $0x30] sm:$0xff] %vm396_vm0, %v3990_v10  ;;  %v3940_v7 = vmul.f32 %v6869_v52, %v6803_v32  ;;  %v3968_v19 = vadd.f32 %v4578_v8, %v3936_v59  ;;  %v3996_v6 = vmax.f32 %v3964_v25, 0.0  ;;  %v3941_v3 = vmul.f32 %v6869_v52, %v6809_v21  ;;  %v4589_v59 = vld [vmem:[%s4675_s16 + $0xd8] sm:$0xff] }
 0x490   : > { %4023 = vst.msk [vmem:[%s6899_s17 + $0x38] sm:$0xff] %vm396_vm0, %v3991_v33  ;;  %v3969_v39 = vadd.f32 %v4579_v62, %v3937_v36  ;;  %v3997_v2 = vmax.f32 %v3965_v5, 0.0  ;;  %v3942_v32 = vmul.f32 %v6869_v52, %v6815_v48  ;;  %v3970_v28 = vadd.f32 %v4580_v53, %v3938_v58 }
 0x491   : > { %4024 = vst.msk [vmem:[%s6899_s17 + $0x40] sm:$0xff] %vm396_vm0, %v3992_v31  ;;  %v3998_v30 = vmax.f32 %v3966_v34, 0.0  ;;  %v3943_v21 = vmul.f32 %v6869_v52, %v6821_v26  ;;  %v3971_v20 = vadd.f32 %v4581_v43, %v3939_v12  ;;  %v3999_v38 = vmax.f32 %v3967_v41, 0.0  ;;  %v4590_v31 = vld [vmem:[%s4675_s16 + $0xe0] sm:$0xff] }
 0x492   : > { %4025 = vst.msk [vmem:[%s6899_s17 + $0x48] sm:$0xff] %vm396_vm0, %v3993_v22  ;;  %v3944_v48 = vmul.f32 %v6869_v52, %v6827_v4  ;;  %v3972_v45 = vadd.f32 %v4582_v40, %v3940_v7  ;;  %v4000_v0 = vmax.f32 %v3968_v19, 0.0  ;;  %v3945_v26 = vmul.f32 %v6869_v52, %v6832_v50 }
 0x493   : > { %4026 = vst.msk [vmem:[%s6899_s17 + $0x50] sm:$0xff] %vm396_vm0, %v3994_v49  ;;  %v3973_v11 = vadd.f32 %v4583_v23, %v3941_v3  ;;  %v4001_v24 = vmax.f32 %v3969_v39, 0.0  ;;  %v3946_v4 = vmul.f32 %v6869_v52, %v6837_v63  ;;  %v3974_v44 = vadd.f32 %v4584_v15, %v3942_v32 }
 0x494   : > { %4027 = vst.msk [vmem:[%s6899_s17 + $0x58] sm:$0xff] %vm396_vm0, %v3995_v47  ;;  %v4002_v42 = vmax.f32 %v3970_v28, 0.0  ;;  %v3947_v50 = vmul.f32 %v6869_v52, %v6842_v46  ;;  %v3975_v16 = vadd.f32 %v4585_v37, %v3943_v21  ;;  %v4003_v18 = vmax.f32 %v3971_v20, 0.0 }
 0x495   : > { %4028 = vst.msk [vmem:[%s6899_s17 + $0x60] sm:$0xff] %vm396_vm0, %v3996_v6  ;;  %v3948_v63 = vmul.f32 %v6869_v52, %v6847_v51  ;;  %v3976_v14 = vadd.f32 %v4586_v29, %v3944_v48  ;;  %v4004_v57 = vmax.f32 %v3972_v45, 0.0  ;;  %v3949_v46 = vmul.f32 %v6869_v52, %v6852_v17 }
 0x496   : > { %4029 = vst.msk [vmem:[%s6899_s17 + $0x68] sm:$0xff] %vm396_vm0, %v3997_v2  ;;  %v3977_v10 = vadd.f32 %v4587_v9, %v3945_v26  ;;  %v4005_v60 = vmax.f32 %v3973_v11, 0.0  ;;  %v3950_v51 = vmul.f32 %v6869_v52, %v6857_v56  ;;  %v3978_v54 = vadd.f32 %v4588_v27, %v3946_v4 }
 0x497   : > { %4030 = vst.msk [vmem:[%s6899_s17 + $0x70] sm:$0xff] %vm396_vm0, %v3998_v30  ;;  %v4006_v33 = vmax.f32 %v3974_v44, 0.0  ;;  %v3951_v17 = vmul.f32 %v6869_v52, %v6864_v55  ;;  %v3979_v13 = vadd.f32 %v4589_v59, %v3947_v50  ;;  %v4007_v25 = vmax.f32 %v3975_v16, 0.0  ;;  %v4592_v55 = vld [vmem:[%s4675_s16 + $0xf0] sm:$0xff] }
 0x498   : > { %4031 = vst.msk [vmem:[%s6899_s17 + $0x78] sm:$0xff] %vm396_vm0, %v3999_v38  ;;  %v3980_v56 = vadd.f32 %v4590_v31, %v3948_v63  ;;  %v4008_v36 = vmax.f32 %v3976_v14, 0.0  ;;  %v3981_v5 = vadd.f32 %v4591_v61, %v3949_v46  ;;  %v4009_v22 = vmax.f32 %v3977_v10, 0.0 }
 0x499   : > { %4032 = vst.msk [vmem:[%s6899_s17 + $0x80] sm:$0xff] %vm396_vm0, %v4000_v0  ;;  %v3982_v52 = vadd.f32 %v4592_v55, %v3950_v51  ;;  %v4010_v58 = vmax.f32 %v3978_v54, 0.0  ;;  %v3983_v34 = vadd.f32 %v4593_v35, %v3951_v17  ;;  %v4011_v49 = vmax.f32 %v3979_v13, 0.0 }
 0x49a   : > { %4033 = vst.msk [vmem:[%s6899_s17 + $0x88] sm:$0xff] %vm396_vm0, %v4001_v24  ;;  %v4012_v12 = vmax.f32 %v3980_v56, 0.0  ;;  %v4013_v1 = vmax.f32 %v3981_v5, 0.0 }
 0x49b   : > { %4034 = vst.msk [vmem:[%s6899_s17 + $0x90] sm:$0xff] %vm396_vm0, %v4002_v42  ;;  %v4014_v41 = vmax.f32 %v3982_v52, 0.0  ;;  %v4015_v47 = vmax.f32 %v3983_v34, 0.0 }
 0x49c   : > { %4035 = vst.msk [vmem:[%s6899_s17 + $0x98] sm:$0xff] %vm396_vm0, %v4003_v18 }
 0x49d   : > { %4036 = vst.msk [vmem:[%s6899_s17 + $0xa0] sm:$0xff] %vm396_vm0, %v4004_v57 }
 0x49e   : > { %4037 = vst.msk [vmem:[%s6899_s17 + $0xa8] sm:$0xff] %vm396_vm0, %v4005_v60 }
 0x49f   : > { %4038 = vst.msk [vmem:[%s6899_s17 + $0xb0] sm:$0xff] %vm396_vm0, %v4006_v33 }
 0x4a0   : > { %4039 = vst.msk [vmem:[%s6899_s17 + $0xb8] sm:$0xff] %vm396_vm0, %v4007_v25 }
 0x4a1   : > { %4040 = vst.msk [vmem:[%s6899_s17 + $0xc0] sm:$0xff] %vm396_vm0, %v4008_v36 }
 0x4a2   : > { %4041 = vst.msk [vmem:[%s6899_s17 + $0xc8] sm:$0xff] %vm396_vm0, %v4009_v22 }
 0x4a3   : > { %4042 = vst.msk [vmem:[%s6899_s17 + $0xd0] sm:$0xff] %vm396_vm0, %v4010_v58 }
 0x4a4   : > { %4043 = vst.msk [vmem:[%s6899_s17 + $0xd8] sm:$0xff] %vm396_vm0, %v4011_v49 }
 0x4a5   : > { %4044 = vst.msk [vmem:[%s6899_s17 + $0xe0] sm:$0xff] %vm396_vm0, %v4012_v12 }
 0x4a6   : > { %4045 = vst.msk [vmem:[%s6899_s17 + $0xe8] sm:$0xff] %vm396_vm0, %v4013_v1 }
 0x4a7   : > { %4046 = vst.msk [vmem:[%s6899_s17 + $0xf0] sm:$0xff] %vm396_vm0, %v4014_v41 }
 0x4a8   : > { %4047 = vst.msk [vmem:[%s6899_s17 + $0xf8] sm:$0xff] %vm396_vm0, %v4015_v47 }
 0x4a9 PF: > { %s19_s30 = sadd.s32 1, %s4600_s30  }
 0x4aa   : > { %p16_p4 = scmp.ge.s32.totalorder %s19_s30, 4  }
 0x4ac   :  { %18 = sbr.rel (!%p16_p4) target bundleno = 1 (0x1), region = 88 }

</bundles_post_ra>
